<compile_context>
chip_gen: v7x
topology: tpu7x:2x2x1
jax: 0.10.0
libtpu: 0.0.40
codegen_flags: <defaults>
</compile_context>

<pallas_src>
import jax
import jax.numpy as jnp
from jax.experimental import pallas as pl
from jax.experimental.pallas import tpu as pltpu


def _se_gate_conv1x1_kernel(x_ref, g_ref, w_ref, o_ref):
    # x_ref : (Cin, HW)       feature map (channels on sublanes, pixels on lanes)
    # g_ref : (1, Cin)        per-channel gate logits, lane-dense
    # w_ref : (tile_co, Cin)  1x1 conv weight tile (PyTorch OI layout, no transpose)
    # o_ref : (tile_co, HW)
    gate = jax.nn.sigmoid(g_ref[...])                    # (1, Cin)   EUP, ~Cin/128 vregs
    w_scaled = w_ref[...].astype(jnp.float32) * gate     # fold gate into weight rows (VPU)
    o_ref[...] = jnp.dot(
        w_scaled, x_ref[...], preferred_element_type=jnp.float32
    ).astype(o_ref.dtype)                                # (tile_co, HW) on the MXU


def se_gate_conv1x1(x_nchw, gate_nc11, weight_oi11, *, weight_dtype=None):
    """Fused sigmoid-gate + 1x1 conv (no bias), computed in NCHW orientation.

    x_nchw:      (1, Cin, H, W)    float32
    gate_nc11:   (1, Cin, 1, 1)    float32
    weight_oi11: (Cout, Cin, 1, 1) float32
    weight_dtype: optional dtype for the streamed weight (e.g. jnp.bfloat16 to
                  halve the dominant HBM read on v5e/v6e if tolerance allows).
    returns      (1, Cout, H, W)   float32
    """
    N, Cin, H, W = x_nchw.shape
    Cout = weight_oi11.shape[0]
    assert gate_nc11.shape == (N, Cin, 1, 1)
    assert N == 1, "kernel specialized for batch 1 (as in the reference module)"
    HW = H * W

    # Contiguity-preserving reshapes only (no transposes anywhere).
    x_rows = x_nchw.reshape(Cin, HW)          # (Cin, HW)
    gate = gate_nc11.reshape(1, Cin)          # (1, Cin)  lane-dense gate row
    w = weight_oi11.reshape(Cout, Cin)        # (Cout, Cin) -- PyTorch layout as-is
    if weight_dtype is not None:
        w = w.astype(weight_dtype)

    # Cout tiling: 2 x 192 balances v7x's two TensorCores (1 tile per TC) and
    # minimizes per-grid-step overhead on the single-core chips.
    if Cout % 192 == 0:
        tile_co = 192
    elif Cout % 128 == 0:
        tile_co = 128
    else:
        tile_co = Cout
    n_tiles = Cout // tile_co

    itemsize = jnp.dtype(x_nchw.dtype).itemsize
    cost = pl.CostEstimate(
        flops=2 * Cout * Cin * HW,
        transcendentals=Cin,
        bytes_accessed=(x_rows.size * itemsize
                        + gate.size * itemsize
                        + w.size * jnp.dtype(w.dtype).itemsize
                        + Cout * HW * itemsize),
    )

    out = pl.pallas_call(
        _se_gate_conv1x1_kernel,
        out_shape=jax.ShapeDtypeStruct((Cout, HW), x_nchw.dtype),
        grid_spec=pltpu.PrefetchScalarGridSpec(
            num_scalar_prefetch=0,
            grid=(n_tiles,),
            in_specs=[
                pl.BlockSpec((Cin, HW), lambda j: (0, 0)),       # x: resident (constant block)
                pl.BlockSpec((1, Cin), lambda j: (0, 0)),        # gate: resident, lane-dense
                pl.BlockSpec((tile_co, Cin), lambda j: (j, 0)),  # weight: streamed / double-buffered
            ],
            out_specs=pl.BlockSpec((tile_co, HW), lambda j: (j, 0)),
        ),
        compiler_params=pltpu.CompilerParams(
            dimension_semantics=("parallel",),   # disjoint Cout tiles -> v7x can split across TCs
        ),
        cost_estimate=cost,
    )(x_rows, gate, w)

    # (Cout, HW) -> (1, Cout, H, W): pure reshape, no transpose.
    return out.reshape(N, Cout, H, W)


if __name__ == "__main__":
    key = jax.random.PRNGKey(0)
    k1, k2, k3 = jax.random.split(key, 3)

    # Shapes implied by the module's forward pass (Conv2d(2304, 384, 1) is fixed).
    N, Cin, H, W, Cout = 1, 2304, 7, 7, 384
    x670 = jax.random.normal(k1, (N, Cin, H, W), dtype=jnp.float32)
    x674 = jax.random.normal(k2, (N, Cin, 1, 1), dtype=jnp.float32)
    # Deterministic synthetic conv weight (matches Conv2d(2304, 384, 1, bias=False)).
    weight = jax.random.normal(k3, (Cout, Cin, 1, 1), dtype=jnp.float32) * 0.02

    out = se_gate_conv1x1(x670, x674, weight)
    out = jax.block_until_ready(out)

    # Pure-JAX reference for sanity (same semantics as the PyTorch module).
    gated = x670 * jax.nn.sigmoid(x674)
    ref = jax.lax.conv_general_dilated(
        gated, weight, window_strides=(1, 1), padding="VALID",
        dimension_numbers=("NCHW", "OIHW", "NCHW"),
    )
    assert out.shape == (N, Cout, H, W)
    # Both sides run at default MXU precision; folding the gate into the weight
    # changes the rounding grouping slightly, so allow 2e-3.
    assert jnp.allclose(out, ref, atol=2e-3, rtol=2e-3), float(jnp.max(jnp.abs(out - ref)))

    print("KERNEL_OK")
</pallas_src>

<mosaic_0001>
module attributes {stable_mosaic.version = 11 : i64} {
  func.func @_se_gate_conv1x1_kernel(%arg0: i32, %arg1: memref<2304x49xf32, #tpu.memory_space<vmem>>, %arg2: memref<1x2304xf32, #tpu.memory_space<vmem>>, %arg3: memref<192x2304xf32, #tpu.memory_space<vmem>>, %arg4: memref<192x49xf32, #tpu.memory_space<vmem>>) attributes {dimension_semantics = [#tpu.dimension_semantics<parallel>], iteration_bounds = array<i64: 2>, scalar_prefetch = 0 : i64, scratch_operands = 0 : i64, tpu.core_type = #tpu.core_type<tc>, window_params = [{pipeline_mode = #tpu.pipeline_mode<synchronous>, transform_indices = @transform_0, window_bounds = array<i64: 2304, 49>}, {pipeline_mode = #tpu.pipeline_mode<synchronous>, transform_indices = @transform_1, window_bounds = array<i64: 1, 2304>}, {transform_indices = @transform_2, window_bounds = array<i64: 192, 2304>}, {transform_indices = @transform_3, window_bounds = array<i64: 192, 49>}]} {
    %c0 = arith.constant 0 : index
    %c0_0 = arith.constant 0 : index
    %0 = vector.load %arg2[%c0, %c0_0] : memref<1x2304xf32, #tpu.memory_space<vmem>>, vector<1x2304xf32>
    %1 = arith.negf %0 : vector<1x2304xf32>
    %2 = math.exp %1 : vector<1x2304xf32>
    %cst = arith.constant 1.000000e+00 : f32
    %3 = vector.broadcast %cst : f32 to vector<1x2304xf32>
    %4 = arith.addf %3, %2 : vector<1x2304xf32>
    %5 = arith.divf %3, %4 : vector<1x2304xf32>
    %c0_1 = arith.constant 0 : index
    %c0_2 = arith.constant 0 : index
    %6 = vector.load %arg3[%c0_1, %c0_2] : memref<192x2304xf32, #tpu.memory_space<vmem>>, vector<192x2304xf32>
    %7 = vector.broadcast %5 : vector<1x2304xf32> to vector<192x2304xf32>
    %8 = arith.mulf %6, %7 : vector<192x2304xf32>
    %c0_3 = arith.constant 0 : index
    %c0_4 = arith.constant 0 : index
    %9 = vector.load %arg1[%c0_3, %c0_4] : memref<2304x49xf32, #tpu.memory_space<vmem>>, vector<2304x49xf32>
    %cst_5 = arith.constant dense<0.000000e+00> : vector<192x49xf32>
    %10 = tpu.matmul %8, %9, %cst_5 {dimension_numbers = #tpu.dot_dimension_numbers<[1], [0], [0], [1], [0, 0, 1, 1], [], []>} : vector<192x2304xf32>, vector<2304x49xf32>, vector<192x49xf32> -> vector<192x49xf32>
    %c0_6 = arith.constant 0 : index
    %c0_7 = arith.constant 0 : index
    %11 = vector.load %arg4[%c0_6, %c0_7] : memref<192x49xf32, #tpu.memory_space<vmem>>, vector<192x49xf32>
    tpu.vector_store %arg4[%c0_6, %c0_7], %10 {strides = array<i32>} : memref<192x49xf32, #tpu.memory_space<vmem>>, vector<192x49xf32>,
    return
  }
  func.func @transform_0(%arg0: i32) -> (i32, i32) {
    %c0_i32 = arith.constant 0 : i32
    %c0_i32_0 = arith.constant 0 : i32
    %c0_i32_1 = arith.constant 0 : i32
    return %c0_i32, %c0_i32_0 : i32, i32
  }
  func.func @transform_1(%arg0: i32) -> (i32, i32) {
    %c0_i32 = arith.constant 0 : i32
    %c0_i32_0 = arith.constant 0 : i32
    %c0_i32_1 = arith.constant 0 : i32
    return %c0_i32, %c0_i32_0 : i32, i32
  }
  func.func @transform_2(%arg0: i32) -> (i32, i32) {
    %c0_i32 = arith.constant 0 : i32
    %c0_i32_0 = arith.constant 0 : i32
    return %arg0, %c0_i32 : i32, i32
  }
  func.func @transform_3(%arg0: i32) -> (i32, i32) {
    %c0_i32 = arith.constant 0 : i32
    %c0_i32_0 = arith.constant 0 : i32
    return %arg0, %c0_i32 : i32, i32
  }
}

</mosaic_0001>

<bundles_post_ra>
// kernel: tpu_custom_call.1
= control target key start
LH: loop header
LB: loop body
LE: loop exit
PB: predicated region body
PF: predicated region fallthrough
CT: control target
= control target key end

     0   :  { %8 = vsyncpa [#allocation3], 0  ;;  %s6499_s0 = inlined_call_operand.vmem [shape: f32[2304,49], index: 0, kind: input, shape index: {}]   ;;  %s6500_s1 = inlined_call_operand.hbm [shape: f32[1,2304], index: 1, kind: input, shape index: {}]   ;;  %s6501_s2 = inlined_call_operand.hbm [shape: f32[384,2304], index: 2, kind: input, shape index: {}]   ;;  %s6502_s3 = inlined_call_operand.vmem [shape: f32[384,49], index: 3, kind: output, shape index: {}]  }
   0x1   :  { %9 = vsyncpa [#allocation5], 0 }
   0x2   :  { %11 = vsyncpa [#allocation5 + $0x1], 0  ;;  %s4260_s12 = smov 0   ;;  %s4262_s13 = smov 0  }
   0x3   :  { %s4264_s14 = smov 0   ;;  %s4266_s15 = smov 0  }
   0x4 LB: > { %s3242_s16 = sadd.s32 4294967295, %s4233_s15   ;;  %s4280_s17 = sadd.s32 1, %s4233_s15   ;;  %s4233_s15 = sphi %s4266_s15, %s6521_s15   ;;  %s4229_s14 = sphi %s4264_s14, %s6520_s14   ;;  %s4225_s13 = sphi %s4262_s13, %s6519_s13   ;;  %s4221_s12 = sphi %s4260_s12, %s6518_s12  }
   0x5   : > { %s63_s18 = ssub.s32 %s4233_s15, %s4280_s17  ;;  %s66_s19 = sadd.s32 1, %s4229_s14 }
   0x6   : > { %p64_p0 = scmp.eq.s32.totalorder %s63_s18, 0  ;;  %p73_p1 = scmp.ne.s32.totalorder %s4229_s14, %s4225_s13 }
   0x7   : > { %p74_p2 = scmp.eq.s32.totalorder %s4233_s15, 0  ;;  %p79_p3 = scmp.ne.s32.totalorder %s4225_s13, %s4221_s12 }
   0x8   : > { %s4290_s20 = scalar_select %p64_p0, %s4229_s14, %s66_s19  }
   0x9   : > { %p4292_p4 = por %p74_p2, %p73_p1  ;;  %p4298_p5 = scmp.eq.s32.totalorder %s3242_s16, 0 }
   0xa   : > { %p3244_p6 = scmp.ge.s32.totalorder %s4233_s15, 1  ;;  %p116_p7 = scmp.lt.s32.totalorder %s4233_s15, 3 }
   0xb   : > { %s6509_s22 = scalar_select %p4298_p5, 1, 0 }
   0xc   : > { %p4306_p8 = por %p4298_p5, %p79_p3  ;;  %p4310_p9 = pnand %p3244_p6, %p116_p7 }
   0xd   : > { %s4235_s25 = smov [#allocation2]   ;;  %p4086_p11 = scmp.lt.s32.totalorder %s4233_s15, 2 }
   0xe   : > { %s6510_s23 = scalar_select %p4306_p8, 1, 0 }
   0xf   : > { %s6511_s24 = scalar_select %p4310_p9, 1, 0 }
  0x10   : > { %s132_s26 = sshll.u32 %s4235_s25, 4  ;;  %p4077_p10 = pneg %p4310_p9  ;;  %s133_s26 = int_to_ptr.vmem [resolvable:$true] %s132_s26 }
  0x11   : > { %s143_s28 = sand.u32 1, %s4229_s14   ;;  %p4326_p13 = pnand %p4086_p11, %p4292_p4 }
  0x12   : > { %p4319_p12 = pnand %p4077_p10, %p4298_p5  ;;  %s4068_s30 = smul.u32 3456, %s143_s28 }
  0x13   : > { %s6513_s29 = scalar_select %p4326_p13, 1, 0 }
  0x14   : > { %s4137_s6 = scalar_lea.hbm %s6500_s1, 288  ;;  %p4139_p1 = pneg %p4319_p12 }
  0x15   : > { %p4138_p0 = scmp.ne.s32.totalorder %s6500_s1, %s4137_s6  ;;  %p4144_p4 = scmp.lt.u32.totalorder %s4137_s6, %s6500_s1 }
  0x17   : > { %p4140_p2 = pnand %p4139_p1, %p4138_p0 }
  0x19   : > { %p4141_p3 = pneg %p4140_p2 }
  0x1b   : > { %p4146_p6 = pnand %p4144_p4, %p4141_p3 }
  0x1d   : > { %4149 = shalt.err (!%p4146_p6)
}
  0x1e   : > { %s4150_s11 = scalar_lea.vmem %s133_s26, 288  ;;  %p4158_p8 = scmp.lt.s32.totalorder %s133_s26, %s133_s26 }
  0x1f   : > { %p4151_p7 = scmp.ne.s32.totalorder %s133_s26, %s4150_s11  ;;  %p4159_p5 = scmp.lt.s32.totalorder %s4150_s11, %s4150_s11 }
  0x21   : > { %p4153_p10 = pnand %p4151_p7, %p4139_p1  ;;  %p4160_p9 = por %p4159_p5, %p4158_p8 }
  0x23   : > { %p4154_p11 = pneg %p4153_p10 }
  0x25   : > { %p4161_p13 = pnand %p4160_p9, %p4154_p11 }
  0x27   : > { %4164 = shalt.err (!%p4161_p13)
}
  0x28   : > { %4080 = dma.hbm_to_vmem [thread:$0]  (!%p4319_p12), %s6500_s1, 288, %s133_s26, [#allocation3]  }
  0x29   : > { %s4087_s19 = smul.u32 55296, %s4233_s15  ;;  %s147_s21 = scalar_lea.vmem [#allocation4], %s4068_s30 }
  0x2a   : > { %s155_s25 = sshll.u32 %s147_s21, 4  ;;  %s4354_s27 = scalar_lea.sflag [#allocation5], %s143_s28  ;;  %s4347_s25 = int_to_ptr.vmem [resolvable:$true] %s155_s25 }
  0x2b   : > { %s4352_s6 = scalar_lea.hbm %s6501_s2, %s4087_s19  ;;  %p6514_p8 = scmp.ne.s32.totalorder %s6513_s29, 0 }
  0x2c   : > { %s4165_s7 = scalar_lea.hbm %s4352_s6, 55296  ;;  %s4170_s8 = scalar_lea.hbm %s6501_s2, 110592 }
  0x2d   : > { %p4166_p5 = scmp.ne.s32.totalorder %s4352_s6, %s4165_s7  ;;  %p4167_p9 = pneg %p6514_p8 }
  0x2e   : > { %p4171_p0 = scmp.lt.u32.totalorder %s4352_s6, %s6501_s2  ;;  %p4172_p1 = scmp.lt.u32.totalorder %s4170_s8, %s4165_s7 }
  0x2f   : > { %p4168_p12 = pnand %p4167_p9, %p4166_p5  ;;  %p4174_p3 = scmp.lt.u32.totalorder %s4165_s7, %s4352_s6 }
  0x30   : > { %p4173_p2 = por %p4172_p1, %p4171_p0 }
  0x31   : > { %p4169_p13 = pneg %p4168_p12 }
  0x32   : > { %p4175_p4 = por %p4174_p3, %p4173_p2 }
  0x34   : > { %p4176_p6 = pnand %p4175_p4, %p4169_p13 }
  0x36   : > { %4179 = shalt.err (!%p4176_p6)
}
  0x37   : > { %s4180_s28 = scalar_lea.vmem %s4347_s25, 55296  ;;  %s4236_s11 = smov [#allocation4]  }
  0x38   : > { %p4181_p7 = scmp.ne.s32.totalorder %s4347_s25, %s4180_s28  ;;  %s4185_s12 = sshll.u32 %s4236_s11, 4  ;;  %s4186_s12 = int_to_ptr.vmem [resolvable:$false] %s4185_s12 }
  0x39   : > { %s4187_s18 = scalar_lea.vmem %s4186_s12, 110592  ;;  %p4188_p5 = scmp.lt.s32.totalorder %s4347_s25, %s4186_s12 }
  0x3a   : > { %p4183_p10 = pnand %p4181_p7, %p4167_p9  ;;  %p4189_p12 = scmp.lt.s32.totalorder %s4187_s18, %s4180_s28 }
  0x3c   : > { %p4184_p11 = pneg %p4183_p10  ;;  %p4190_p0 = por %p4189_p12, %p4188_p5 }
  0x3e   : > { %p4191_p1 = pnand %p4190_p0, %p4184_p11 }
  0x40   : > { %4194 = shalt.err (!%p4191_p1)
}
  0x41   : > { %s4237_s19 = smov 2304   ;;  %s4238_s21 = smov 144  }
  0x42   : > { %4084 = dma.hbm_to_vmem [thread:$0]  (!%p6514_p8), %s4352_s6, 55296, %s4347_s25, %s4354_s27, %s4237_s19, %s4237_s19, %s4238_s21  }
  0x43   : > { %p6515_p9 = scmp.ne.s32.totalorder %s6511_s24, 0 }
  0x44   : > { %p6516_p13 = scmp.ne.s32.totalorder (!%p6515_p9), %s6509_s22, 0 }
  0x45   : > { %167 = sbr.rel (%p6515_p9) target bundleno = 792 (0x318), region = 32 }
  0x4c   : > { %4212 = dma.done.wait (%p6516_p13), [#allocation3], 288  }
  0x4d   : > { %4214 = vsyncadd (%p6516_p13), [#allocation3], 4294967008  ;;  %s173_s4 = sand.u32 1, %s4225_s13   ;;  %p6517_p2 = scmp.ne.s32.totalorder %s6510_s23, 0 }
  0x4e   : > { %s4070_s5 = smul.u32 3456, %s173_s4  ;;  %s174_s7 = scalar_lea.sflag [#allocation5], %s173_s4 }
  0x50   : > { %s4389_s26 = scalar_lea.vmem [#allocation4], %s4070_s5 }
  0x51   : > { %4216 = dma.done.wait (%p6517_p2), %s174_s7, 55296  }
  0x52   : > { %4218 = vsyncadd (%p6517_p2), %s174_s7, 4294912000  ;;  %v4239_v0 = vmov 0.0|0.0   ;;  %v1185_v1 = vld [vmem:[%s6499_s0] sm:$0xff]  ;;  %v1186_v2 = vld [vmem:[%s6499_s0 + $0x8] sm:$0xff]  ;;  %vm3138_vm0 = vcmask 400384  }
  0x53   : > { %3256 = vmatprep.subr.bf16.mxu1 %v4239_v0  ;;  %3448 = vmatprep.subr.bf16.mxu0 %v4239_v0  ;;  %v1313_v3 = vld [vmem:[%s6499_s0 + $0x400] sm:$0xff]  ;;  %v3257_v4 = vpack.c.bf16 %v1186_v2, %v1185_v1  ;;  %v1314_v5 = vld [vmem:[%s6499_s0 + $0x408] sm:$0xff]  ;;  %v1187_v6 = vld [vmem:[%s6499_s0 + $0x10] sm:$0xff] }
  0x54   : > { %v1188_v7 = vld [vmem:[%s6499_s0 + $0x18] sm:$0xff]  ;;  %v3449_v8 = vpack.c.bf16 %v1314_v5, %v1313_v3  ;;  %v1315_v9 = vld [vmem:[%s6499_s0 + $0x410] sm:$0xff]  ;;  %v1189_v13 = vld [vmem:[%s6499_s0 + $0x20] sm:$0xff] }
  0x55   : > { %v1316_v10 = vld [vmem:[%s6499_s0 + $0x418] sm:$0xff]  ;;  %3258 = vmatpush1.bf16.msra.mxu1 %v3257_v4  ;;  %v3260_v11 = vpack.c.bf16 %v1188_v7, %v1187_v6  ;;  %v1190_v14 = vld [vmem:[%s6499_s0 + $0x28] sm:$0xff]  ;;  %v1317_v15 = vld [vmem:[%s6499_s0 + $0x420] sm:$0xff]  ;;  %v663_v7 = vlaneseq }
  0x56   : > { %3450 = vmatpush1.bf16.msra.mxu0 %v3449_v8  ;;  %3259 = vmatprep.subr.bf16.mxu1 %v4239_v0  ;;  %v3452_v12 = vpack.c.bf16 %v1316_v10, %v1315_v9  ;;  %v1318_v16 = vld [vmem:[%s6499_s0 + $0x428] sm:$0xff]  ;;  %v3263_v17 = vpack.c.bf16 %v1190_v14, %v1189_v13  ;;  %v1191_v19 = vld [vmem:[%s6499_s0 + $0x30] sm:$0xff]  ;;  %v1192_v20 = vld [vmem:[%s6499_s0 + $0x38] sm:$0xff] }
  0x57   : > { %3451 = vmatprep.subr.bf16.mxu0 %v4239_v0  ;;  %v3455_v18 = vpack.c.bf16 %v1318_v16, %v1317_v15  ;;  %v1319_v21 = vld [vmem:[%s6499_s0 + $0x430] sm:$0xff]  ;;  %v1320_v22 = vld [vmem:[%s6499_s0 + $0x438] sm:$0xff]  ;;  %v3266_v23 = vpack.c.bf16 %v1192_v20, %v1191_v19  ;;  %v1193_v25 = vld [vmem:[%s6499_s0 + $0x40] sm:$0xff]  ;;  %v4554_v15 = vshrl.u32 %v663_v7, 7 }
  0x58   : > { %v3458_v24 = vpack.c.bf16 %v1320_v22, %v1319_v21  ;;  %v1194_v26 = vld [vmem:[%s6499_s0 + $0x48] sm:$0xff]  ;;  %v1321_v27 = vld [vmem:[%s6499_s0 + $0x440] sm:$0xff]  ;;  %v1195_v31 = vld [vmem:[%s6499_s0 + $0x50] sm:$0xff] }
  0x59   : > { %3261 = vmatpush1.bf16.msra.mxu1 %v3260_v11  ;;  %v1322_v28 = vld [vmem:[%s6499_s0 + $0x448] sm:$0xff]  ;;  %v3269_v29 = vpack.c.bf16 %v1194_v26, %v1193_v25  ;;  %v1196_v32 = vld [vmem:[%s6499_s0 + $0x58] sm:$0xff]  ;;  %v1323_v33 = vld [vmem:[%s6499_s0 + $0x450] sm:$0xff]  ;;  %v4571_v22 = vsub.s32 1, %v4554_v15 }
  0x5a   : > { %3453 = vmatpush1.bf16.msra.mxu0 %v3452_v12  ;;  %3262 = vmatprep.subr.bf16.mxu1 %v4239_v0  ;;  %v3461_v30 = vpack.c.bf16 %v1322_v28, %v1321_v27  ;;  %v1324_v34 = vld [vmem:[%s6499_s0 + $0x458] sm:$0xff]  ;;  %v3272_v35 = vpack.c.bf16 %v1196_v32, %v1195_v31  ;;  %v1197_v37 = vld [vmem:[%s6499_s0 + $0x60] sm:$0xff]  ;;  %v1198_v38 = vld [vmem:[%s6499_s0 + $0x68] sm:$0xff] }
  0x5b   : > { %3454 = vmatprep.subr.bf16.mxu0 %v4239_v0  ;;  %v3464_v36 = vpack.c.bf16 %v1324_v34, %v1323_v33  ;;  %v1325_v39 = vld [vmem:[%s6499_s0 + $0x460] sm:$0xff]  ;;  %v1326_v40 = vld [vmem:[%s6499_s0 + $0x468] sm:$0xff]  ;;  %v3275_v44 = vpack.c.bf16 %v1198_v38, %v1197_v37  ;;  %v1199_v47 = vld [vmem:[%s6499_s0 + $0x70] sm:$0xff] }
  0x5c   : > { %v207_v41 = vld [vmem:[#allocation2] sm:$0xff]  ;;  %v208_v43 = vld [vmem:[#allocation2 + $0x8] sm:$0xff]  ;;  %v3467_v46 = vpack.c.bf16 %v1326_v40, %v1325_v39  ;;  %v1200_v48 = vld [vmem:[%s6499_s0 + $0x78] sm:$0xff] }
  0x5d   : > { %3264 = vmatpush1.bf16.msra.mxu1 %v3263_v17  ;;  %v3251_v42 = vmul.f32 -1.442695, %v207_v41  ;;  %v3252_v45 = vmul.f32 -1.442695, %v208_v43  ;;  %v1327_v49 = vld [vmem:[%s6499_s0 + $0x470] sm:$0xff]  ;;  %v1328_v50 = vld [vmem:[%s6499_s0 + $0x478] sm:$0xff]  ;;  %v3278_v51 = vpack.c.bf16 %v1200_v48, %v1199_v47 }
  0x5e   : > { %3456 = vmatpush1.bf16.msra.mxu0 %v3455_v18  ;;  %3265 = vmatprep.subr.bf16.mxu1 %v4239_v0  ;;  %v3470_v52 = vpack.c.bf16 %v1328_v50, %v1327_v49  ;;  %v1201_v53 = vld [vmem:[%s6499_s0 + $0x80] sm:$0xff]  ;;  %v1202_v54 = vld [vmem:[%s6499_s0 + $0x88] sm:$0xff]  ;;  %v1203_v59 = vld [vmem:[%s6499_s0 + $0x90] sm:$0xff] }
  0x5f   : > { %3457 = vmatprep.subr.bf16.mxu0 %v4239_v0  ;;  %4125 = vpow2.f32 %v3251_v42  ;;  %v1329_v55 = vld [vmem:[%s6499_s0 + $0x480] sm:$0xff]  ;;  %v1330_v56 = vld [vmem:[%s6499_s0 + $0x488] sm:$0xff]  ;;  %v3281_v57 = vpack.c.bf16 %v1202_v54, %v1201_v53  ;;  %v1204_v60 = vld [vmem:[%s6499_s0 + $0x98] sm:$0xff] }
  0x60   : > { %4127 = vpow2.f32 %v3252_v45  ;;  %v3473_v58 = vpack.c.bf16 %v1330_v56, %v1329_v55  ;;  %v1331_v61 = vld [vmem:[%s6499_s0 + $0x490] sm:$0xff]  ;;  %v1332_v62 = vld [vmem:[%s6499_s0 + $0x498] sm:$0xff]  ;;  %v3284_v2 = vpack.c.bf16 %v1204_v60, %v1203_v59  ;;  %v1205_v5 = vld [vmem:[%s6499_s0 + $0xa0] sm:$0xff]  ;;  %v4625_v45 = vsub.s32 0, %v4554_v15 }
  0x61   : > { %3267 = vmatpush1.bf16.msra.mxu1 %v3266_v23  ;;  %v3476_v4 = vpack.c.bf16 %v1332_v62, %v1331_v61  ;;  %v1206_v6 = vld [vmem:[%s6499_s0 + $0xa8] sm:$0xff]  ;;  %v1333_v9 = vld [vmem:[%s6499_s0 + $0x4a0] sm:$0xff]  ;;  %v1207_v13 = vld [vmem:[%s6499_s0 + $0xb0] sm:$0xff] }
  0x62   : > { %3459 = vmatpush1.bf16.msra.mxu0 %v3458_v24  ;;  %3268 = vmatprep.subr.bf16.mxu1 %v4239_v0  ;;  %v1334_v10 = vld [vmem:[%s6499_s0 + $0x4a8] sm:$0xff]  ;;  %v3287_v11 = vpack.c.bf16 %v1206_v6, %v1205_v5  ;;  %v1208_v14 = vld [vmem:[%s6499_s0 + $0xb8] sm:$0xff]  ;;  %v1335_v16 = vld [vmem:[%s6499_s0 + $0x4b0] sm:$0xff] }
  0x63   : > { %3460 = vmatprep.subr.bf16.mxu0 %v4239_v0  ;;  %v3479_v12 = vpack.c.bf16 %v1334_v10, %v1333_v9  ;;  %v1336_v17 = vld [vmem:[%s6499_s0 + $0x4b8] sm:$0xff]  ;;  %v3290_v18 = vpack.c.bf16 %v1208_v14, %v1207_v13  ;;  %v1209_v20 = vld [vmem:[%s6499_s0 + $0xc0] sm:$0xff]  ;;  %v1210_v21 = vld [vmem:[%s6499_s0 + $0xc8] sm:$0xff] }
  0x64   : > { %v3482_v19 = vpack.c.bf16 %v1336_v17, %v1335_v16  ;;  %v1337_v23 = vld [vmem:[%s6499_s0 + $0x4c0] sm:$0xff]  ;;  %v1338_v24 = vld [vmem:[%s6499_s0 + $0x4c8] sm:$0xff]  ;;  %v3293_v26 = vpack.c.bf16 %v1210_v21, %v1209_v20  ;;  %v1212_v31 = vld [vmem:[%s6499_s0 + $0xd8] sm:$0xff] }
  0x65   : > { %3270 = vmatpush1.bf16.msra.mxu1 %v3269_v29  ;;  %v229_v27 = vld [vmem:[%s4389_s26 + $0x8] sm:$0xff]  ;;  %v3485_v29 = vpack.c.bf16 %v1338_v24, %v1337_v23  ;;  %v1339_v34 = vld [vmem:[%s6499_s0 + $0x4d0] sm:$0xff]  ;;  %v1214_v42 = vld [vmem:[%s6499_s0 + $0xe8] sm:$0xff] }
  0x66   : > { %3462 = vmatpush1.bf16.msra.mxu0 %v3461_v30  ;;  %3271 = vmatprep.subr.bf16.mxu1 %v4239_v0  ;;  %v1211_v30 = vld [vmem:[%s6499_s0 + $0xd0] sm:$0xff]  ;;  %v237_v33 = vld [vmem:[%s4389_s26 + $0x48] sm:$0xff]  ;;  %v1218_v59 = vld [vmem:[%s6499_s0 + $0x108] sm:$0xff] }
  0x67   : > { %3463 = vmatprep.subr.bf16.mxu0 %v4239_v0  ;;  %v3296_v38 = vpack.c.bf16 %v1212_v31, %v1211_v30  ;;  %v1213_v41 = vld [vmem:[%s6499_s0 + $0xe0] sm:$0xff]  ;;  %v1215_v48 = vld [vmem:[%s6499_s0 + $0xf0] sm:$0xff]  ;;  %v1216_v49 = vld [vmem:[%s6499_s0 + $0xf8] sm:$0xff] }
  0x68   : > { %v1341_v43 = vld [vmem:[%s6499_s0 + $0x4e0] sm:$0xff]  ;;  %v1343_v50 = vld [vmem:[%s6499_s0 + $0x4f0] sm:$0xff]  ;;  %v3302_v53 = vpack.c.bf16 %v1216_v49, %v1215_v48  ;;  %v1346_v61 = vld [vmem:[%s6499_s0 + $0x508] sm:$0xff] }
  0x69   : > { %3273 = vmatpush1.bf16.msra.mxu1 %v3272_v35  ;;  %v4126_v63 = vpop.eup %4125  ;;  %v1340_v35 = vld [vmem:[%s6499_s0 + $0x4d8] sm:$0xff]  ;;  %v1345_v60 = vld [vmem:[%s6499_s0 + $0x500] sm:$0xff]  ;;  %v247_v62 = vld [vmem:[%s4389_s26 + $0x98] sm:$0xff] }
  0x6a   : > { %3465 = vmatpush1.bf16.msra.mxu0 %v3464_v36  ;;  %3274 = vmatprep.subr.bf16.mxu1 %v4239_v0  ;;  %v4128_v1 = vpop.eup %4127  ;;  %v219_v3 = vadd.f32 1.0, %v4126_v63  ;;  %v3488_v40 = vpack.c.bf16 %v1340_v35, %v1339_v34  ;;  %v228_v54 = vld [vmem:[%s4389_s26] sm:$0xff]  ;;  %v3497_v5 = vpack.c.bf16 %v1346_v61, %v1345_v60  ;;  %v254_v7 = vld [vmem:[%s4389_s26 + $0xd0] sm:$0xff]  ;;  %v283_v24 = vld [vmem:[%s4389_s26 + $0x1b8] sm:$0xff] }
  0x6b   : > { %3466 = vmatprep.subr.bf16.mxu0 %v4239_v0  ;;  %v220_v8 = vadd.f32 1.0, %v4128_v1  ;;  %v255_v1 = vld [vmem:[%s4389_s26 + $0xd8] sm:$0xff]  ;;  %v1348_v16 = vld [vmem:[%s6499_s0 + $0x518] sm:$0xff] }
  0x6c   : > { %4129 = vrcp.f32 %v219_v3  ;;  %v1219_v10 = vld [vmem:[%s6499_s0 + $0x110] sm:$0xff]  ;;  %v1222_v30 = vld [vmem:[%s6499_s0 + $0x128] sm:$0xff] }
  0x6d   : > { %3276 = vmatpush1.bf16.msra.mxu1 %v3275_v44  ;;  %4131 = vrcp.f32 %v220_v8  ;;  %v1342_v44 = vld [vmem:[%s6499_s0 + $0x4e8] sm:$0xff]  ;;  %v265_v8 = vld [vmem:[%s4389_s26 + $0x128] sm:$0xff]  ;;  %v1347_v14 = vld [vmem:[%s6499_s0 + $0x510] sm:$0xff] }
  0x6e   : > { %3468 = vmatpush1.bf16.msra.mxu0 %v3467_v46  ;;  %3277 = vmatprep.subr.bf16.mxu1 %v4239_v0  ;;  %v3299_v46 = vpack.c.bf16 %v1214_v42, %v1213_v41  ;;  %v3491_v47 = vpack.c.bf16 %v1342_v44, %v1341_v43  ;;  %v272_v23 = vld [vmem:[%s4389_s26 + $0x160] sm:$0xff]  ;;  %v1350_v34 = vld [vmem:[%s6499_s0 + $0x528] sm:$0xff]  ;;  %v301_v42 = vld [vmem:[%s4389_s26 + $0x248] sm:$0xff] }
  0x6f   : > { %3469 = vmatprep.subr.bf16.mxu0 %v4239_v0  ;;  %v309_v44 = vld [vmem:[%s4389_s26 + $0x288] sm:$0xff]  ;;  %v1351_v49 = vld [vmem:[%s6499_s0 + $0x530] sm:$0xff] }
  0x70   : > { %v327_v60 = vld [vmem:[%s4389_s26 + $0x318] sm:$0xff] }
  0x71   : > { %3279 = vmatpush1.bf16.msra.mxu1 %v3278_v51  ;;  %v1344_v51 = vld [vmem:[%s6499_s0 + $0x4f8] sm:$0xff] }
  0x72   : > { %3471 = vmatpush1.bf16.msra.mxu0 %v3470_v52  ;;  %3280 = vmatprep.subr.bf16.mxu1 %v4239_v0  ;;  %v3494_v56 = vpack.c.bf16 %v1344_v51, %v1343_v50  ;;  %v1352_v50 = vld [vmem:[%s6499_s0 + $0x538] sm:$0xff] }
  0x73   : > { %3472 = vmatprep.subr.bf16.mxu0 %v4239_v0  ;;  %v3506_v61 = vpack.c.bf16 %v1352_v50, %v1351_v49  ;;  %v1232_v49 = vld [vmem:[%s6499_s0 + $0x178] sm:$0xff] }
  0x75   : > { %3282 = vmatpush1.bf16.msra.mxu1 %v3281_v57  ;;  %v236_v57 = vld [vmem:[%s4389_s26 + $0x40] sm:$0xff] }
  0x76   : > { %3474 = vmatpush1.bf16.msra.mxu0 %v3473_v58  ;;  %3283 = vmatprep.subr.bf16.mxu1 %v4239_v0  ;;  %v4580_v25 = vpop.eup %4129  ;;  %v1217_v58 = vld [vmem:[%s6499_s0 + $0x100] sm:$0xff] }
  0x77   : > { %3475 = vmatprep.subr.bf16.mxu0 %v4239_v0  ;;  %v4583_v28 = vpop.eup %4131  ;;  %v4594_v32 = vrot.slane %v4580_v25, %v4571_v22  ;;  %v4643_v52 = vrot.slane %v4580_v25, %v4625_v45  ;;  %v3305_v3 = vpack.c.bf16 %v1218_v59, %v1217_v58  ;;  %v319_v58 = vld [vmem:[%s4389_s26 + $0x2d8] sm:$0xff] }
  0x78   : > { %v4606_v36 = vrot.slane %v4583_v28, %v4571_v22  ;;  %v4648_v55 = vrot.slane %v4583_v28, %v4625_v45 }
  0x79   : > { %3285 = vmatpush1.bf16.msra.mxu1 %v3284_v2  ;;  %v754_v37 = vmul.f32 %v4594_v32, %v229_v27  ;;  %v753_v63 = vmul.f32 %v4643_v52, %v228_v54  ;;  %v772_v6 = vmul.f32 %v4594_v32, %v247_v62  ;;  %v291_v27 = vld [vmem:[%s4389_s26 + $0x1f8] sm:$0xff]  ;;  %v300_v54 = vld [vmem:[%s4389_s26 + $0x240] sm:$0xff]  ;;  %v1225_v62 = vld [vmem:[%s6499_s0 + $0x140] sm:$0xff] }
  0x7a   : > { %3477 = vmatpush1.bf16.msra.mxu0 %v3476_v4  ;;  %3286 = vmatprep.subr.bf16.mxu1 %v4239_v0  ;;  %v762_v39 = vmul.f32 %v4606_v36, %v237_v33  ;;  %v761_v2 = vmul.f32 %v4648_v55, %v236_v57  ;;  %v246_v4 = vld [vmem:[%s4389_s26 + $0x90] sm:$0xff]  ;;  %v780_v9 = vmul.f32 %v4606_v36, %v255_v1  ;;  %v308_v57 = vld [vmem:[%s4389_s26 + $0x280] sm:$0xff] }
  0x7b   : > { %3478 = vmatprep.subr.bf16.mxu0 %v4239_v0  ;;  %1537 = vmatprep.mubr.f32.mxu1 %v754_v37  ;;  %v771_v13 = vmul.f32 %v4643_v52, %v246_v4  ;;  %v779_v17 = vmul.f32 %v4648_v55, %v254_v7  ;;  %v1349_v33 = vld [vmem:[%s6499_s0 + $0x520] sm:$0xff]  ;;  %v797_v35 = vmul.f32 %v4648_v55, %v272_v23 }
  0x7c   : > { %2277 = vmatprep.mubr.f32.mxu0 %v762_v39  ;;  %v808_v37 = vmul.f32 %v4594_v32, %v283_v24  ;;  %v816_v39 = vmul.f32 %v4606_v36, %v291_v27  ;;  %v3503_v43 = vpack.c.bf16 %v1350_v34, %v1349_v33  ;;  %v825_v1 = vmul.f32 %v4643_v52, %v300_v54  ;;  %v344_v24 = vld [vmem:[%s4389_s26 + $0x3a0] sm:$0xff]  ;;  %v1230_v33 = vld [vmem:[%s6499_s0 + $0x168] sm:$0xff] }
  0x7d   : > { %3288 = vmatpush1.bf16.msra.mxu1 %v3287_v11  ;;  %v1220_v11 = vld [vmem:[%s6499_s0 + $0x118] sm:$0xff]  ;;  %v833_v4 = vmul.f32 %v4648_v55, %v308_v57  ;;  %v852_v7 = vmul.f32 %v4606_v36, %v327_v60  ;;  %v391_v60 = vld [vmem:[%s4389_s26 + $0x518] sm:$0xff] }
  0x7e   : > { %3480 = vmatpush1.bf16.msra.mxu0 %v3479_v12  ;;  %3289 = vmatprep.subr.bf16.mxu1 %v4239_v0  ;;  %v273_v12 = vld [vmem:[%s4389_s26 + $0x168] sm:$0xff]  ;;  %v3308_v20 = vpack.c.bf16 %v1220_v11, %v1219_v10  ;;  %v372_v57 = vld [vmem:[%s4389_s26 + $0x480] sm:$0xff] }
  0x7f   : > { %3481 = vmatprep.subr.bf16.mxu0 %v4239_v0  ;;  %v798_v21 = vmul.f32 %v4606_v36, %v273_v12  ;;  %v345_v11 = vld [vmem:[%s4389_s26 + $0x3a8] sm:$0xff] }
  0x80   : > { %v870_v23 = vmul.f32 %v4606_v36, %v345_v11  ;;  %v409_v11 = vld [vmem:[%s4389_s26 + $0x5a8] sm:$0xff] }
  0x81   : > { %3291 = vmatpush1.bf16.msra.mxu1 %v3290_v18  ;;  %v790_v18 = vmul.f32 %v4594_v32, %v265_v8  ;;  %v326_v8 = vld [vmem:[%s4389_s26 + $0x310] sm:$0xff] }
  0x82   : > { %3483 = vmatpush1.bf16.msra.mxu0 %v3482_v19  ;;  %3292 = vmatprep.subr.bf16.mxu1 %v4239_v0  ;;  %v264_v19 = vld [vmem:[%s4389_s26 + $0x120] sm:$0xff] }
  0x83   : > { %3484 = vmatprep.subr.bf16.mxu0 %v4239_v0  ;;  %v789_v31 = vmul.f32 %v4643_v52, %v264_v19  ;;  %v851_v19 = vmul.f32 %v4648_v55, %v326_v8  ;;  %v390_v8 = vld [vmem:[%s4389_s26 + $0x510] sm:$0xff] }
  0x85   : > { %3294 = vmatpush1.bf16.msra.mxu1 %v3293_v26  ;;  %v3500_v26 = vpack.c.bf16 %v1348_v16, %v1347_v14  ;;  %v1228_v14 = vld [vmem:[%s6499_s0 + $0x158] sm:$0xff] }
  0x86   : > { %3486 = vmatpush1.bf16.msra.mxu0 %v3485_v29  ;;  %3295 = vmatprep.subr.bf16.mxu1 %v4239_v0  ;;  %v1221_v29 = vld [vmem:[%s6499_s0 + $0x120] sm:$0xff] }
  0x87   : > { %3487 = vmatprep.subr.bf16.mxu0 %v4239_v0  ;;  %v3311_v41 = vpack.c.bf16 %v1222_v30, %v1221_v29  ;;  %v363_v29 = vld [vmem:[%s4389_s26 + $0x438] sm:$0xff] }
  0x89   : > { %3297 = vmatpush1.bf16.msra.mxu1 %v3296_v38  ;;  %v282_v38 = vld [vmem:[%s4389_s26 + $0x1b0] sm:$0xff] }
  0x8a   : > { %3489 = vmatpush1.bf16.msra.mxu0 %v3488_v40  ;;  %3298 = vmatprep.subr.bf16.mxu1 %v4239_v0  ;;  %v290_v40 = vld [vmem:[%s4389_s26 + $0x1f0] sm:$0xff]  ;;  %v807_v48 = vmul.f32 %v4643_v52, %v282_v38  ;;  %v869_v38 = vmul.f32 %v4648_v55, %v344_v24  ;;  %v408_v24 = vld [vmem:[%s4389_s26 + $0x5a0] sm:$0xff] }
  0x8b   : > { %3490 = vmatprep.subr.bf16.mxu0 %v4239_v0  ;;  %v815_v51 = vmul.f32 %v4648_v55, %v290_v40  ;;  %v354_v40 = vld [vmem:[%s4389_s26 + $0x3f0] sm:$0xff] }
  0x8c   : > { %v879_v50 = vmul.f32 %v4643_v52, %v354_v40 }
  0x8d   : > { %3300 = vmatpush1.bf16.msra.mxu1 %v3299_v46  ;;  %v1223_v46 = vld [vmem:[%s6499_s0 + $0x130] sm:$0xff] }
  0x8e   : > { %3492 = vmatpush1.bf16.msra.mxu0 %v3491_v47  ;;  %3301 = vmatprep.subr.bf16.mxu1 %v4239_v0  ;;  %v1224_v47 = vld [vmem:[%s6499_s0 + $0x138] sm:$0xff] }
  0x8f   : > { %3493 = vmatprep.subr.bf16.mxu0 %v4239_v0  ;;  %v3314_v59 = vpack.c.bf16 %v1224_v47, %v1223_v46  ;;  %v381_v46 = vld [vmem:[%s4389_s26 + $0x4c8] sm:$0xff] }
  0x91   : > { %3303 = vmatpush1.bf16.msra.mxu1 %v3302_v53  ;;  %v826_v53 = vmul.f32 %v4594_v32, %v301_v42  ;;  %v362_v42 = vld [vmem:[%s4389_s26 + $0x430] sm:$0xff] }
  0x92   : > { %3495 = vmatpush1.bf16.msra.mxu0 %v3494_v56  ;;  %3304 = vmatprep.subr.bf16.mxu1 %v4239_v0  ;;  %v834_v56 = vmul.f32 %v4606_v36, %v309_v44  ;;  %v887_v54 = vmul.f32 %v4648_v55, %v362_v42  ;;  %v426_v42 = vld [vmem:[%s4389_s26 + $0x630] sm:$0xff] }
  0x93   : > { %3496 = vmatprep.subr.bf16.mxu0 %v4239_v0 }
  0x94   : > { %1538 = vmatmul.mubr.f32.vlgmr.msra.gmra.mrb[0].mxu1 %v753_v63  ;;  %v1226_v63 = vld [vmem:[%s6499_s0 + $0x148] sm:$0xff] }
  0x95   : > { %2278 = vmatmul.mubr.f32.vlgmr.msra.gmra.mrb[0].mxu0 %v761_v2  ;;  %3306 = vmatpush1.bf16.msra.mxu1 %v3305_v3  ;;  %v1353_v2 = vld [vmem:[%s6499_s0 + $0x540] sm:$0xff]  ;;  %v1354_v3 = vld [vmem:[%s6499_s0 + $0x548] sm:$0xff]  ;;  %v3317_v10 = vpack.c.bf16 %v1226_v63, %v1225_v62 }
  0x96   : > { %3498 = vmatpush1.bf16.msra.mxu0 %v3497_v5  ;;  %1542 = vmatprep.mubr.f32.mxu1 %v772_v6  ;;  %v844_v5 = vmul.f32 %v4594_v32, %v319_v58  ;;  %v318_v6 = vld [vmem:[%s4389_s26 + $0x2d0] sm:$0xff]  ;;  %v3509_v12 = vpack.c.bf16 %v1354_v3, %v1353_v2  ;;  %v906_v58 = vmul.f32 %v4606_v36, %v381_v46  ;;  %v399_v62 = vld [vmem:[%s4389_s26 + $0x558] sm:$0xff]  ;;  %v445_v46 = vld [vmem:[%s4389_s26 + $0x6c8] sm:$0xff] }
  0x97   : > { %2282 = vmatprep.mubr.f32.mxu0 %v780_v9  ;;  %3307 = vmatprep.subr.bf16.mxu1 %v4239_v0  ;;  %v337_v9 = vld [vmem:[%s4389_s26 + $0x368] sm:$0xff]  ;;  %v843_v16 = vmul.f32 %v4643_v52, %v318_v6  ;;  %v1234_v2 = vld [vmem:[%s6499_s0 + $0x188] sm:$0xff]  ;;  %v897_v3 = vmul.f32 %v4643_v52, %v372_v57 }
  0x98   : > { %1543 = vmatmul.mubr.f32.gmra.mrb[2].mxu1 %v771_v13  ;;  %3499 = vmatprep.subr.bf16.mxu0 %v4239_v0  ;;  %v1227_v13 = vld [vmem:[%s6499_s0 + $0x150] sm:$0xff] }
  0x99   : > { %2283 = vmatmul.mubr.f32.gmra.mrb[2].mxu0 %v779_v17  ;;  %1547 = vmatprep.mubr.f32.mxu1 %v790_v18  ;;  %v1355_v17 = vld [vmem:[%s6499_s0 + $0x550] sm:$0xff]  ;;  %v1356_v18 = vld [vmem:[%s6499_s0 + $0x558] sm:$0xff]  ;;  %v3320_v27 = vpack.c.bf16 %v1228_v14, %v1227_v13 }
  0x9a   : > { %3309 = vmatpush1.bf16.msra.mxu1 %v3308_v20  ;;  %2287 = vmatprep.mubr.f32.mxu0 %v798_v21  ;;  %v862_v20 = vmul.f32 %v4594_v32, %v337_v9  ;;  %v336_v21 = vld [vmem:[%s4389_s26 + $0x360] sm:$0xff]  ;;  %v3512_v30 = vpack.c.bf16 %v1356_v18, %v1355_v17  ;;  %v924_v9 = vmul.f32 %v4606_v36, %v399_v62  ;;  %v417_v13 = vld [vmem:[%s4389_s26 + $0x5e8] sm:$0xff]  ;;  %v463_v62 = vld [vmem:[%s4389_s26 + $0x758] sm:$0xff] }
  0x9b   : > { %3501 = vmatpush1.bf16.msra.mxu0 %v3500_v26  ;;  %3310 = vmatprep.subr.bf16.mxu1 %v4239_v0  ;;  %v355_v26 = vld [vmem:[%s4389_s26 + $0x3f8] sm:$0xff]  ;;  %v861_v34 = vmul.f32 %v4643_v52, %v336_v21  ;;  %v1236_v17 = vld [vmem:[%s6499_s0 + $0x198] sm:$0xff]  ;;  %v915_v18 = vmul.f32 %v4643_v52, %v390_v8 }
  0x9c   : > { %1548 = vmatmul.mubr.f32.gmra.mrb[4].mxu1 %v789_v31  ;;  %3502 = vmatprep.subr.bf16.mxu0 %v4239_v0  ;;  %v1229_v31 = vld [vmem:[%s6499_s0 + $0x160] sm:$0xff] }
  0x9d   : > { %2288 = vmatmul.mubr.f32.gmra.mrb[4].mxu0 %v797_v35  ;;  %1552 = vmatprep.mubr.f32.mxu1 %v808_v37  ;;  %v1357_v35 = vld [vmem:[%s6499_s0 + $0x560] sm:$0xff]  ;;  %v1358_v37 = vld [vmem:[%s6499_s0 + $0x568] sm:$0xff]  ;;  %v3323_v44 = vpack.c.bf16 %v1230_v33, %v1229_v31 }
  0x9e   : > { %2292 = vmatprep.mubr.f32.mxu0 %v816_v39  ;;  %3312 = vmatpush1.bf16.msra.mxu1 %v3311_v41  ;;  %v880_v39 = vmul.f32 %v4594_v32, %v355_v26  ;;  %v888_v41 = vmul.f32 %v4606_v36, %v363_v29  ;;  %v3515_v47 = vpack.c.bf16 %v1358_v37, %v1357_v35  ;;  %v427_v29 = vld [vmem:[%s4389_s26 + $0x638] sm:$0xff] }
  0x9f   : > { %3504 = vmatpush1.bf16.msra.mxu0 %v3503_v43  ;;  %3313 = vmatprep.subr.bf16.mxu1 %v4239_v0  ;;  %v373_v43 = vld [vmem:[%s4389_s26 + $0x488] sm:$0xff]  ;;  %v942_v26 = vmul.f32 %v4606_v36, %v417_v13  ;;  %v435_v31 = vld [vmem:[%s4389_s26 + $0x678] sm:$0xff]  ;;  %v933_v37 = vmul.f32 %v4643_v52, %v408_v24 }
  0xa0   : > { %1553 = vmatmul.mubr.f32.gmra.mrb[6].mxu1 %v807_v48  ;;  %3505 = vmatprep.subr.bf16.mxu0 %v4239_v0  ;;  %v1231_v48 = vld [vmem:[%s6499_s0 + $0x170] sm:$0xff]  ;;  %v1238_v35 = vld [vmem:[%s6499_s0 + $0x1a8] sm:$0xff]  ;;  %v481_v13 = vld [vmem:[%s4389_s26 + $0x7e8] sm:$0xff] }
  0xa1   : > { %2293 = vmatmul.mubr.f32.gmra.mrb[6].mxu0 %v815_v51  ;;  %1557 = vmatprep.mubr.f32.mxu1 %v826_v53  ;;  %v1359_v51 = vld [vmem:[%s6499_s0 + $0x570] sm:$0xff]  ;;  %v1360_v53 = vld [vmem:[%s6499_s0 + $0x578] sm:$0xff] }
  0xa2   : > { %2297 = vmatprep.mubr.f32.mxu0 %v834_v56  ;;  %3315 = vmatpush1.bf16.msra.mxu1 %v3314_v59  ;;  %v898_v56 = vmul.f32 %v4594_v32, %v373_v43  ;;  %v380_v59 = vld [vmem:[%s4389_s26 + $0x4c0] sm:$0xff]  ;;  %v3518_v63 = vpack.c.bf16 %v1360_v53, %v1359_v51  ;;  %v960_v43 = vmul.f32 %v4606_v36, %v435_v31  ;;  %v499_v31 = vld [vmem:[%s4389_s26 + $0x878] sm:$0xff] }
  0xa3   : > { %3507 = vmatpush1.bf16.msra.mxu0 %v3506_v61  ;;  %3316 = vmatprep.subr.bf16.mxu1 %v4239_v0  ;;  %v3326_v61 = vpack.c.bf16 %v1232_v49, %v1231_v48  ;;  %v905_v6 = vmul.f32 %v4648_v55, %v380_v59  ;;  %v453_v48 = vld [vmem:[%s4389_s26 + $0x708] sm:$0xff]  ;;  %v951_v53 = vmul.f32 %v4643_v52, %v426_v42  ;;  %v444_v59 = vld [vmem:[%s4389_s26 + $0x6c0] sm:$0xff] }
  0xa4   : > { %1558 = vmatmul.mubr.f32.gmra.mrb[8].mxu1 %v825_v1  ;;  %3508 = vmatprep.subr.bf16.mxu0 %v4239_v0  ;;  %v1233_v1 = vld [vmem:[%s6499_s0 + $0x180] sm:$0xff]  ;;  %v1240_v51 = vld [vmem:[%s6499_s0 + $0x1b8] sm:$0xff] }
  0xa5   : > { %2298 = vmatmul.mubr.f32.gmra.mrb[8].mxu0 %v833_v4  ;;  %1562 = vmatprep.mubr.f32.mxu1 %v844_v5  ;;  %v1361_v4 = vld [vmem:[%s6499_s0 + $0x580] sm:$0xff]  ;;  %v1362_v5 = vld [vmem:[%s6499_s0 + $0x588] sm:$0xff] }
  0xa6   : > { %2302 = vmatprep.mubr.f32.mxu0 %v852_v7  ;;  %3318 = vmatpush1.bf16.msra.mxu1 %v3317_v10  ;;  %v916_v7 = vmul.f32 %v4594_v32, %v391_v60  ;;  %v398_v10 = vld [vmem:[%s4389_s26 + $0x550] sm:$0xff]  ;;  %v3521_v14 = vpack.c.bf16 %v1362_v5, %v1361_v4  ;;  %v978_v60 = vmul.f32 %v4606_v36, %v453_v48  ;;  %v517_v48 = vld [vmem:[%s4389_s26 + $0x908] sm:$0xff] }
  0xa7   : > { %3510 = vmatpush1.bf16.msra.mxu0 %v3509_v12  ;;  %3319 = vmatprep.subr.bf16.mxu1 %v4239_v0  ;;  %v3329_v12 = vpack.c.bf16 %v1234_v2, %v1233_v1  ;;  %v923_v21 = vmul.f32 %v4648_v55, %v398_v10  ;;  %v471_v1 = vld [vmem:[%s4389_s26 + $0x798] sm:$0xff]  ;;  %v969_v5 = vmul.f32 %v4643_v52, %v444_v59  ;;  %v462_v10 = vld [vmem:[%s4389_s26 + $0x750] sm:$0xff] }
  0xa8   : > { %1563 = vmatmul.mubr.f32.gmra.mrb[10].mxu1 %v843_v16  ;;  %3511 = vmatprep.subr.bf16.mxu0 %v4239_v0  ;;  %v1235_v16 = vld [vmem:[%s6499_s0 + $0x190] sm:$0xff]  ;;  %v1242_v4 = vld [vmem:[%s6499_s0 + $0x1c8] sm:$0xff] }
  0xa9   : > { %2303 = vmatmul.mubr.f32.gmra.mrb[10].mxu0 %v851_v19  ;;  %1567 = vmatprep.mubr.f32.mxu1 %v862_v20  ;;  %v1363_v19 = vld [vmem:[%s6499_s0 + $0x590] sm:$0xff]  ;;  %v1364_v20 = vld [vmem:[%s6499_s0 + $0x598] sm:$0xff] }
  0xaa   : > { %2307 = vmatprep.mubr.f32.mxu0 %v870_v23  ;;  %3321 = vmatpush1.bf16.msra.mxu1 %v3320_v27  ;;  %v934_v23 = vmul.f32 %v4594_v32, %v409_v11  ;;  %v416_v27 = vld [vmem:[%s4389_s26 + $0x5e0] sm:$0xff]  ;;  %v3524_v33 = vpack.c.bf16 %v1364_v20, %v1363_v19  ;;  %v996_v11 = vmul.f32 %v4606_v36, %v471_v1  ;;  %v535_v1 = vld [vmem:[%s4389_s26 + $0x998] sm:$0xff] }
  0xab   : > { %3513 = vmatpush1.bf16.msra.mxu0 %v3512_v30  ;;  %3322 = vmatprep.subr.bf16.mxu1 %v4239_v0  ;;  %v3332_v30 = vpack.c.bf16 %v1236_v17, %v1235_v16  ;;  %v941_v40 = vmul.f32 %v4648_v55, %v416_v27  ;;  %v489_v16 = vld [vmem:[%s4389_s26 + $0x828] sm:$0xff]  ;;  %v987_v20 = vmul.f32 %v4643_v52, %v462_v10  ;;  %v480_v27 = vld [vmem:[%s4389_s26 + $0x7e0] sm:$0xff]  ;;  %v542_v10 = vld [vmem:[%s4389_s26 + $0x9d0] sm:$0xff] }
  0xac   : > { %1568 = vmatmul.mubr.f32.gmra.mrb[12].mxu1 %v861_v34  ;;  %3514 = vmatprep.subr.bf16.mxu0 %v4239_v0  ;;  %v1237_v34 = vld [vmem:[%s6499_s0 + $0x1a0] sm:$0xff]  ;;  %v1244_v19 = vld [vmem:[%s6499_s0 + $0x1d8] sm:$0xff] }
  0xad   : > { %2308 = vmatmul.mubr.f32.gmra.mrb[12].mxu0 %v869_v38  ;;  %1572 = vmatprep.mubr.f32.mxu1 %v880_v39  ;;  %v1365_v38 = vld [vmem:[%s6499_s0 + $0x5a0] sm:$0xff]  ;;  %v1366_v39 = vld [vmem:[%s6499_s0 + $0x5a8] sm:$0xff] }
  0xae   : > { %2312 = vmatprep.mubr.f32.mxu0 %v888_v41  ;;  %3324 = vmatpush1.bf16.msra.mxu1 %v3323_v44  ;;  %v952_v41 = vmul.f32 %v4594_v32, %v427_v29  ;;  %v434_v44 = vld [vmem:[%s4389_s26 + $0x670] sm:$0xff]  ;;  %v3527_v49 = vpack.c.bf16 %v1366_v39, %v1365_v38  ;;  %v1014_v29 = vmul.f32 %v4606_v36, %v489_v16 }
  0xaf   : > { %3516 = vmatpush1.bf16.msra.mxu0 %v3515_v47  ;;  %3325 = vmatprep.subr.bf16.mxu1 %v4239_v0  ;;  %v3335_v47 = vpack.c.bf16 %v1238_v35, %v1237_v34  ;;  %v959_v57 = vmul.f32 %v4648_v55, %v434_v44  ;;  %v507_v34 = vld [vmem:[%s4389_s26 + $0x8b8] sm:$0xff]  ;;  %v1005_v39 = vmul.f32 %v4643_v52, %v480_v27  ;;  %v498_v44 = vld [vmem:[%s4389_s26 + $0x870] sm:$0xff] }
  0xb0   : > { %1573 = vmatmul.mubr.f32.gmra.mrb[14].mxu1 %v879_v50  ;;  %3517 = vmatprep.subr.bf16.mxu0 %v4239_v0  ;;  %v1239_v50 = vld [vmem:[%s6499_s0 + $0x1b0] sm:$0xff]  ;;  %v1246_v38 = vld [vmem:[%s6499_s0 + $0x1e8] sm:$0xff] }
  0xb1   : > { %2313 = vmatmul.mubr.f32.gmra.mrb[14].mxu0 %v887_v54  ;;  %1577 = vmatprep.mubr.f32.mxu1 %v898_v56  ;;  %v1367_v54 = vld [vmem:[%s6499_s0 + $0x5b0] sm:$0xff]  ;;  %v1368_v56 = vld [vmem:[%s6499_s0 + $0x5b8] sm:$0xff]  ;;  %v570_v27 = vld [vmem:[%s4389_s26 + $0xab0] sm:$0xff] }
  0xb2   : > { %2317 = vmatprep.mubr.f32.mxu0 %v906_v58  ;;  %3327 = vmatpush1.bf16.msra.mxu1 %v3326_v61  ;;  %v970_v58 = vmul.f32 %v4594_v32, %v445_v46  ;;  %v452_v61 = vld [vmem:[%s4389_s26 + $0x700] sm:$0xff]  ;;  %v3530_v2 = vpack.c.bf16 %v1368_v56, %v1367_v54  ;;  %v1032_v46 = vmul.f32 %v4606_v36, %v507_v34 }
  0xb3   : > { %3519 = vmatpush1.bf16.msra.mxu0 %v3518_v63  ;;  %3328 = vmatprep.subr.bf16.mxu1 %v4239_v0  ;;  %v3338_v63 = vpack.c.bf16 %v1240_v51, %v1239_v50  ;;  %v977_v8 = vmul.f32 %v4648_v55, %v452_v61  ;;  %v525_v50 = vld [vmem:[%s4389_s26 + $0x948] sm:$0xff]  ;;  %v1023_v56 = vmul.f32 %v4643_v52, %v498_v44  ;;  %v516_v61 = vld [vmem:[%s4389_s26 + $0x900] sm:$0xff] }
  0xb4   : > { %1578 = vmatmul.mubr.f32.gmra.mrb[16].mxu1 %v897_v3  ;;  %3520 = vmatprep.subr.bf16.mxu0 %v4239_v0  ;;  %v1241_v3 = vld [vmem:[%s6499_s0 + $0x1c0] sm:$0xff]  ;;  %v1248_v54 = vld [vmem:[%s6499_s0 + $0x1f8] sm:$0xff]  ;;  %v1095_v34 = vmul.f32 %v4643_v52, %v570_v27 }
  0xb5   : > { %2318 = vmatmul.mubr.f32.gmra.mrb[16].mxu0 %v905_v6  ;;  %1582 = vmatprep.mubr.f32.mxu1 %v916_v7  ;;  %v1369_v6 = vld [vmem:[%s6499_s0 + $0x5c0] sm:$0xff]  ;;  %v1370_v7 = vld [vmem:[%s6499_s0 + $0x5c8] sm:$0xff]  ;;  %v248_v27 = vld [vmem:[%s4389_s26 + $0xa0] sm:$0xff] }
  0xb6   : > { %2322 = vmatprep.mubr.f32.mxu0 %v924_v9  ;;  %3330 = vmatpush1.bf16.msra.mxu1 %v3329_v12  ;;  %v988_v9 = vmul.f32 %v4594_v32, %v463_v62  ;;  %v470_v12 = vld [vmem:[%s4389_s26 + $0x790] sm:$0xff]  ;;  %v3533_v17 = vpack.c.bf16 %v1370_v7, %v1369_v6  ;;  %v1050_v62 = vmul.f32 %v4606_v36, %v525_v50  ;;  %v625_v50 = vld [vmem:[%s4389_s26 + $0xc68] sm:$0xff] }
  0xb7   : > { %3522 = vmatpush1.bf16.msra.mxu0 %v3521_v14  ;;  %3331 = vmatprep.subr.bf16.mxu1 %v4239_v0  ;;  %v3341_v14 = vpack.c.bf16 %v1242_v4, %v1241_v3  ;;  %v995_v24 = vmul.f32 %v4648_v55, %v470_v12  ;;  %v543_v3 = vld [vmem:[%s4389_s26 + $0x9d8] sm:$0xff]  ;;  %v1060_v7 = vmul.f32 %v4594_v32, %v535_v1  ;;  %v561_v12 = vld [vmem:[%s4389_s26 + $0xa68] sm:$0xff]  ;;  %v673_v1 = vsub.s32 2, %v4554_v15 }
  0xb8   : > { %1583 = vmatmul.mubr.f32.gmra.mrb[18].mxu1 %v915_v18  ;;  %3523 = vmatprep.subr.bf16.mxu0 %v4239_v0  ;;  %v1243_v18 = vld [vmem:[%s6499_s0 + $0x1d0] sm:$0xff] }
  0xb9   : > { %2323 = vmatmul.mubr.f32.gmra.mrb[18].mxu0 %v923_v21  ;;  %1587 = vmatprep.mubr.f32.mxu1 %v934_v23  ;;  %v1371_v21 = vld [vmem:[%s6499_s0 + $0x5d0] sm:$0xff]  ;;  %v1372_v23 = vld [vmem:[%s6499_s0 + $0x5d8] sm:$0xff] }
  0xba   : > { %2327 = vmatprep.mubr.f32.mxu0 %v942_v26  ;;  %3333 = vmatpush1.bf16.msra.mxu1 %v3332_v30  ;;  %v1006_v26 = vmul.f32 %v4594_v32, %v481_v13  ;;  %v488_v30 = vld [vmem:[%s4389_s26 + $0x820] sm:$0xff]  ;;  %v3536_v35 = vpack.c.bf16 %v1372_v23, %v1371_v21  ;;  %v579_v21 = vld [vmem:[%s4389_s26 + $0xaf8] sm:$0xff] }
  0xbb   : > { %3525 = vmatpush1.bf16.msra.mxu0 %v3524_v33  ;;  %3334 = vmatprep.subr.bf16.mxu1 %v4239_v0  ;;  %v3344_v33 = vpack.c.bf16 %v1244_v19, %v1243_v18  ;;  %v1013_v42 = vmul.f32 %v4648_v55, %v488_v30  ;;  %v1086_v18 = vmul.f32 %v4606_v36, %v561_v12  ;;  %v560_v19 = vld [vmem:[%s4389_s26 + $0xa60] sm:$0xff]  ;;  %v578_v30 = vld [vmem:[%s4389_s26 + $0xaf0] sm:$0xff] }
  0xbc   : > { %1588 = vmatmul.mubr.f32.gmra.mrb[20].mxu1 %v933_v37  ;;  %3526 = vmatprep.subr.bf16.mxu0 %v4239_v0  ;;  %v1245_v37 = vld [vmem:[%s6499_s0 + $0x1e0] sm:$0xff] }
  0xbd   : > { %2328 = vmatmul.mubr.f32.gmra.mrb[20].mxu0 %v941_v40  ;;  %1592 = vmatprep.mubr.f32.mxu1 %v952_v41  ;;  %v1373_v40 = vld [vmem:[%s6499_s0 + $0x5e0] sm:$0xff]  ;;  %v1374_v41 = vld [vmem:[%s6499_s0 + $0x5e8] sm:$0xff] }
  0xbe   : > { %2332 = vmatprep.mubr.f32.mxu0 %v960_v43  ;;  %3336 = vmatpush1.bf16.msra.mxu1 %v3335_v47  ;;  %v1024_v43 = vmul.f32 %v4594_v32, %v499_v31  ;;  %v506_v47 = vld [vmem:[%s4389_s26 + $0x8b0] sm:$0xff]  ;;  %v3539_v51 = vpack.c.bf16 %v1374_v41, %v1373_v40  ;;  %v589_v31 = vld [vmem:[%s4389_s26 + $0xb48] sm:$0xff]  ;;  %v596_v40 = vld [vmem:[%s4389_s26 + $0xb80] sm:$0xff] }
  0xbf   : > { %3528 = vmatpush1.bf16.msra.mxu0 %v3527_v49  ;;  %3337 = vmatprep.subr.bf16.mxu1 %v4239_v0  ;;  %v3347_v49 = vpack.c.bf16 %v1246_v38, %v1245_v37  ;;  %v1031_v59 = vmul.f32 %v4648_v55, %v506_v47  ;;  %v1114_v37 = vmul.f32 %v4594_v32, %v589_v31  ;;  %v588_v38 = vld [vmem:[%s4389_s26 + $0xb40] sm:$0xff]  ;;  %v607_v41 = vld [vmem:[%s4389_s26 + $0xbd8] sm:$0xff]  ;;  %v606_v47 = vld [vmem:[%s4389_s26 + $0xbd0] sm:$0xff] }
  0xc0   : > { %1593 = vmatmul.mubr.f32.gmra.mrb[22].mxu1 %v951_v53  ;;  %3529 = vmatprep.subr.bf16.mxu0 %v4239_v0  ;;  %v1247_v53 = vld [vmem:[%s6499_s0 + $0x1f0] sm:$0xff]  ;;  %v1121_v44 = vmul.f32 %v4648_v55, %v596_v40 }
  0xc1   : > { %2333 = vmatmul.mubr.f32.gmra.mrb[22].mxu0 %v959_v57  ;;  %1597 = vmatprep.mubr.f32.mxu1 %v970_v58  ;;  %v1375_v57 = vld [vmem:[%s6499_s0 + $0x5f0] sm:$0xff]  ;;  %v1376_v58 = vld [vmem:[%s6499_s0 + $0x5f8] sm:$0xff] }
  0xc2   : > { %2337 = vmatprep.mubr.f32.mxu0 %v978_v60  ;;  %3339 = vmatpush1.bf16.msra.mxu1 %v3338_v63  ;;  %v1042_v60 = vmul.f32 %v4594_v32, %v517_v48  ;;  %v524_v63 = vld [vmem:[%s4389_s26 + $0x940] sm:$0xff]  ;;  %v3542_v4 = vpack.c.bf16 %v1376_v58, %v1375_v57  ;;  %v677_v58 = vsub.s32 3, %v4554_v15 }
  0xc3   : > { %3531 = vmatpush1.bf16.msra.mxu0 %v3530_v2  ;;  %3340 = vmatprep.subr.bf16.mxu1 %v4239_v0  ;;  %v3350_v2 = vpack.c.bf16 %v1248_v54, %v1247_v53  ;;  %v1049_v6 = vmul.f32 %v4648_v55, %v524_v63  ;;  %v1131_v53 = vmul.f32 %v4643_v52, %v606_v47  ;;  %v624_v57 = vld [vmem:[%s4389_s26 + $0xc60] sm:$0xff] }
  0xc4   : > { %1598 = vmatmul.mubr.f32.gmra.mrb[24].mxu1 %v969_v5  ;;  %3532 = vmatprep.subr.bf16.mxu0 %v4239_v0  ;;  %v1041_v5 = vmul.f32 %v4643_v52, %v516_v61  ;;  %v643_v61 = vld [vmem:[%s4389_s26 + $0xcf8] sm:$0xff]  ;;  %v1149_v63 = vmul.f32 %v4643_v52, %v624_v57  ;;  %v256_v31 = vld [vmem:[%s4389_s26 + $0xe0] sm:$0xff]  ;;  %v1381_v57 = vld [vmem:[%s6499_s0 + $0x620] sm:$0xff] }
  0xc5   : > { %2338 = vmatmul.mubr.f32.gmra.mrb[24].mxu0 %v977_v8  ;;  %1602 = vmatprep.mubr.f32.mxu1 %v988_v9  ;;  %v534_v8 = vld [vmem:[%s4389_s26 + $0x990] sm:$0xff]  ;;  %v1068_v9 = vmul.f32 %v4606_v36, %v543_v3  ;;  %v1168_v3 = vmul.f32 %v4594_v32, %v643_v61  ;;  %v1379_v40 = vld [vmem:[%s6499_s0 + $0x610] sm:$0xff] }
  0xc6   : > { %2342 = vmatprep.mubr.f32.mxu0 %v996_v11  ;;  %3342 = vmatpush1.bf16.msra.mxu1 %v3341_v14  ;;  %v553_v11 = vld [vmem:[%s4389_s26 + $0xa28] sm:$0xff]  ;;  %v1059_v13 = vmul.f32 %v4643_v52, %v534_v8  ;;  %v1067_v14 = vmul.f32 %v4648_v55, %v542_v10  ;;  %v231_v8 = vld [vmem:[%s4389_s26 + $0x18] sm:$0xff]  ;;  %v284_v61 = vld [vmem:[%s4389_s26 + $0x1c0] sm:$0xff] }
  0xc7   : > { %3534 = vmatpush1.bf16.msra.mxu0 %v3533_v17  ;;  %3343 = vmatprep.subr.bf16.mxu1 %v4239_v0  ;;  %v1078_v16 = vmul.f32 %v4594_v32, %v553_v11  ;;  %v552_v17 = vld [vmem:[%s4389_s26 + $0xa20] sm:$0xff]  ;;  %v239_v10 = vld [vmem:[%s4389_s26 + $0x58] sm:$0xff] }
  0xc8   : > { %1603 = vmatmul.mubr.f32.gmra.mrb[26].mxu1 %v987_v20  ;;  %3535 = vmatprep.subr.bf16.mxu0 %v4239_v0  ;;  %v571_v20 = vld [vmem:[%s4389_s26 + $0xab8] sm:$0xff]  ;;  %v1077_v23 = vmul.f32 %v4643_v52, %v552_v17  ;;  %v238_v17 = vld [vmem:[%s4389_s26 + $0x50] sm:$0xff] }
  0xc9   : > { %2343 = vmatmul.mubr.f32.gmra.mrb[26].mxu0 %v995_v24  ;;  %1607 = vmatprep.mubr.f32.mxu1 %v1006_v26  ;;  %v1085_v24 = vmul.f32 %v4648_v55, %v560_v19  ;;  %v1096_v26 = vmul.f32 %v4594_v32, %v571_v20  ;;  %v1378_v19 = vld [vmem:[%s6499_s0 + $0x608] sm:$0xff]  ;;  %v249_v20 = vld [vmem:[%s4389_s26 + $0xa8] sm:$0xff] }
  0xca   : > { %2347 = vmatprep.mubr.f32.mxu0 %v1014_v29  ;;  %3345 = vmatpush1.bf16.msra.mxu1 %v3344_v33  ;;  %v1104_v29 = vmul.f32 %v4606_v36, %v579_v21  ;;  %v597_v33 = vld [vmem:[%s4389_s26 + $0xb88] sm:$0xff] }
  0xcb   : > { %3537 = vmatpush1.bf16.msra.mxu0 %v3536_v35  ;;  %3346 = vmatprep.subr.bf16.mxu1 %v4239_v0  ;;  %v1103_v35 = vmul.f32 %v4648_v55, %v578_v30 }
  0xcc   : > { %1608 = vmatmul.mubr.f32.gmra.mrb[28].mxu1 %v1005_v39  ;;  %3538 = vmatprep.subr.bf16.mxu0 %v4239_v0  ;;  %v1122_v39 = vmul.f32 %v4606_v36, %v597_v33  ;;  %v267_v33 = vld [vmem:[%s4389_s26 + $0x138] sm:$0xff] }
  0xcd   : > { %2348 = vmatmul.mubr.f32.gmra.mrb[28].mxu0 %v1013_v42  ;;  %1612 = vmatprep.mubr.f32.mxu1 %v1024_v43  ;;  %v615_v42 = vld [vmem:[%s4389_s26 + $0xc18] sm:$0xff]  ;;  %v1113_v43 = vmul.f32 %v4643_v52, %v588_v38 }
  0xce   : > { %2352 = vmatprep.mubr.f32.mxu0 %v1032_v46  ;;  %3348 = vmatpush1.bf16.msra.mxu1 %v3347_v49  ;;  %v1132_v46 = vmul.f32 %v4594_v32, %v607_v41  ;;  %v1140_v48 = vmul.f32 %v4606_v36, %v615_v42  ;;  %v614_v49 = vld [vmem:[%s4389_s26 + $0xc10] sm:$0xff]  ;;  %v275_v38 = vld [vmem:[%s4389_s26 + $0x178] sm:$0xff]  ;;  %v1380_v41 = vld [vmem:[%s6499_s0 + $0x618] sm:$0xff] }
  0xcf   : > { %3540 = vmatpush1.bf16.msra.mxu0 %v3539_v51  ;;  %3349 = vmatprep.subr.bf16.mxu1 %v4239_v0  ;;  %v633_v51 = vld [vmem:[%s4389_s26 + $0xca8] sm:$0xff]  ;;  %v1139_v54 = vmul.f32 %v4648_v55, %v614_v49 }
  0xd0   : > { %1613 = vmatmul.mubr.f32.gmra.mrb[30].mxu1 %v1023_v56  ;;  %3541 = vmatprep.subr.bf16.mxu0 %v4239_v0  ;;  %v1150_v56 = vmul.f32 %v4594_v32, %v625_v50  ;;  %v5075_v32 = vrot.slane %v4580_v25, %v673_v1  ;;  %v285_v49 = vld [vmem:[%s4389_s26 + $0x1c8] sm:$0xff]  ;;  %v3548_v50 = vpack.c.bf16 %v1380_v41, %v1379_v40 }
  0xd1   : > { %2353 = vmatmul.mubr.f32.gmra.mrb[30].mxu0 %v1031_v59  ;;  %1617 = vmatprep.mubr.f32.mxu1 %v1042_v60  ;;  %v1158_v59 = vmul.f32 %v4606_v36, %v633_v51  ;;  %v632_v60 = vld [vmem:[%s4389_s26 + $0xca0] sm:$0xff]  ;;  %v293_v51 = vld [vmem:[%s4389_s26 + $0x208] sm:$0xff] }
  0xd2   : > { %2357 = vmatprep.mubr.f32.mxu0 %v1050_v62  ;;  %3351 = vmatpush1.bf16.msra.mxu1 %v3350_v2  ;;  %v651_v62 = vld [vmem:[%s4389_s26 + $0xd38] sm:$0xff]  ;;  %v1157_v2 = vmul.f32 %v4648_v55, %v632_v60  ;;  %v1260_v40 = vld [vmem:[%s6499_s0 + $0x258] sm:$0xff] }
  0xd3   : > { %3543 = vmatpush1.bf16.msra.mxu0 %v3542_v4  ;;  %3352 = vmatprep.subr.bf16.mxu1 %v4239_v0  ;;  %v642_v4 = vld [vmem:[%s4389_s26 + $0xcf0] sm:$0xff] }
  0xd4   : > { %1618 = vmatmul.mubr.f32.gmra.mrb[32].mxu1 %v1041_v5  ;;  %3544 = vmatprep.subr.bf16.mxu0 %v4239_v0  ;;  %v5064_v5 = vrot.slane %v4580_v25, %v677_v58  ;;  %v1167_v11 = vmul.f32 %v4643_v52, %v642_v4  ;;  %v1249_v52 = vld [vmem:[%s6499_s0 + $0x200] sm:$0xff]  ;;  %v311_v4 = vld [vmem:[%s4389_s26 + $0x298] sm:$0xff] }
  0xd5   : > { %2358 = vmatmul.mubr.f32.gmra.mrb[32].mxu0 %v1049_v6  ;;  %1622 = vmatprep.mubr.f32.mxu1 %v1060_v7  ;;  %v1176_v6 = vmul.f32 %v4606_v36, %v651_v62  ;;  %v650_v7 = vld [vmem:[%s4389_s26 + $0xd30] sm:$0xff] }
  0xd6   : > { %2362 = vmatprep.mubr.f32.mxu0 %v1068_v9  ;;  %v5070_v9 = vrot.slane %v4583_v28, %v677_v58  ;;  %v1175_v12 = vmul.f32 %v4648_v55, %v650_v7  ;;  %v756_v36 = vmul.f32 %v5064_v5, %v231_v8  ;;  %v1250_v55 = vld [vmem:[%s6499_s0 + $0x208] sm:$0xff]  ;;  %v774_v30 = vmul.f32 %v5064_v5, %v249_v20  ;;  %v1256_v7 = vld [vmem:[%s6499_s0 + $0x238] sm:$0xff]  ;;  %v1257_v20 = vld [vmem:[%s6499_s0 + $0x240] sm:$0xff] }
  0xd7   : > { %v1382_v58 = vld [vmem:[%s6499_s0 + $0x628] sm:$0xff]  ;;  %v810_v60 = vmul.f32 %v5064_v5, %v285_v49  ;;  %v809_v8 = vmul.f32 %v5075_v32, %v284_v61 }
  0xd8   : > { %1623 = vmatmul.mubr.f32.gmra.mrb[34].mxu1 %v1059_v13  ;;  %v230_v13 = vld [vmem:[%s4389_s26 + $0x10] sm:$0xff]  ;;  %v800_v47 = vmul.f32 %v5070_v9, %v275_v38  ;;  %v818_v62 = vmul.f32 %v5070_v9, %v293_v51 }
  0xd9   : > { %2363 = vmatmul.mubr.f32.gmra.mrb[34].mxu0 %v1067_v14  ;;  %1627 = vmatprep.mubr.f32.mxu1 %v1078_v16  ;;  %v5081_v14 = vrot.slane %v4583_v28, %v673_v1  ;;  %v764_v16 = vmul.f32 %v5070_v9, %v239_v10  ;;  %v755_v21 = vmul.f32 %v5075_v32, %v230_v13  ;;  %v1383_v10 = vld [vmem:[%s6499_s0 + $0x630] sm:$0xff]  ;;  %v302_v13 = vld [vmem:[%s4389_s26 + $0x250] sm:$0xff] }
  0xda   : > { %2367 = vmatprep.mubr.f32.mxu0 %v1086_v18  ;;  %v1377_v18 = vld [vmem:[%s6499_s0 + $0x600] sm:$0xff] }
  0xdb   : > { %v781_v42 = vmul.f32 %v5081_v14, %v256_v31  ;;  %v346_v49 = vld [vmem:[%s4389_s26 + $0x3b0] sm:$0xff] }
  0xdc   : > { %1628 = vmatmul.mubr.f32.gmra.mrb[36].mxu1 %v1077_v23  ;;  %v257_v23 = vld [vmem:[%s4389_s26 + $0xe8] sm:$0xff]  ;;  %v871_v61 = vmul.f32 %v5081_v14, %v346_v49  ;;  %v410_v49 = vld [vmem:[%s4389_s26 + $0x5b0] sm:$0xff] }
  0xdd   : > { %2368 = vmatmul.mubr.f32.gmra.mrb[36].mxu0 %v1085_v24  ;;  %1632 = vmatprep.mubr.f32.mxu1 %v1096_v26  ;;  %v763_v24 = vmul.f32 %v5081_v14, %v238_v17  ;;  %v3353_v26 = vpack.c.bf16 %v1250_v55, %v1249_v52  ;;  %v310_v17 = vld [vmem:[%s4389_s26 + $0x290] sm:$0xff]  ;;  %v321_v52 = vld [vmem:[%s4389_s26 + $0x2e8] sm:$0xff] }
  0xde   : > { %2372 = vmatprep.mubr.f32.mxu0 %v1104_v29  ;;  %v3545_v29 = vpack.c.bf16 %v1378_v19, %v1377_v18  ;;  %v329_v18 = vld [vmem:[%s4389_s26 + $0x328] sm:$0xff] }
  0xdf   : > { %v854_v31 = vmul.f32 %v5070_v9, %v329_v18  ;;  %v393_v18 = vld [vmem:[%s4389_s26 + $0x528] sm:$0xff] }
  0xe0   : > { %1633 = vmatmul.mubr.f32.gmra.mrb[38].mxu1 %v1095_v34  ;;  %v782_v34 = vmul.f32 %v5070_v9, %v257_v23  ;;  %v827_v23 = vmul.f32 %v5075_v32, %v302_v13 }
  0xe1   : > { %2373 = vmatmul.mubr.f32.gmra.mrb[38].mxu0 %v1103_v35  ;;  %1637 = vmatprep.mubr.f32.mxu1 %v1114_v37  ;;  %v1251_v35 = vld [vmem:[%s6499_s0 + $0x210] sm:$0xff]  ;;  %v1252_v37 = vld [vmem:[%s6499_s0 + $0x218] sm:$0xff] }
  0xe2   : > { %2377 = vmatprep.mubr.f32.mxu0 %v1122_v39  ;;  %v773_v39 = vmul.f32 %v5075_v32, %v248_v27  ;;  %v835_v27 = vmul.f32 %v5081_v14, %v310_v17  ;;  %v374_v17 = vld [vmem:[%s4389_s26 + $0x490] sm:$0xff] }
  0xe4   : > { %1638 = vmatmul.mubr.f32.gmra.mrb[40].mxu1 %v1113_v43  ;;  %v792_v43 = vmul.f32 %v5064_v5, %v267_v33  ;;  %v328_v33 = vld [vmem:[%s4389_s26 + $0x320] sm:$0xff] }
  0xe5   : > { %2378 = vmatmul.mubr.f32.gmra.mrb[40].mxu0 %v1121_v44  ;;  %1642 = vmatprep.mubr.f32.mxu1 %v1132_v46  ;;  %v266_v44 = vld [vmem:[%s4389_s26 + $0x130] sm:$0xff]  ;;  %v3356_v46 = vpack.c.bf16 %v1252_v37, %v1251_v35  ;;  %v347_v37 = vld [vmem:[%s4389_s26 + $0x3b8] sm:$0xff] }
  0xe6   : > { %2382 = vmatprep.mubr.f32.mxu0 %v1140_v48  ;;  %v274_v48 = vld [vmem:[%s4389_s26 + $0x170] sm:$0xff] }
  0xe8   : > { %1643 = vmatmul.mubr.f32.gmra.mrb[42].mxu1 %v1131_v53  ;;  %v1253_v53 = vld [vmem:[%s6499_s0 + $0x220] sm:$0xff] }
  0xe9   : > { %2383 = vmatmul.mubr.f32.gmra.mrb[42].mxu0 %v1139_v54  ;;  %1647 = vmatprep.mubr.f32.mxu1 %v1150_v56  ;;  %v1254_v54 = vld [vmem:[%s6499_s0 + $0x228] sm:$0xff]  ;;  %v791_v56 = vmul.f32 %v5075_v32, %v266_v44  ;;  %v853_v44 = vmul.f32 %v5081_v14, %v328_v33  ;;  %v392_v33 = vld [vmem:[%s4389_s26 + $0x520] sm:$0xff] }
  0xea   : > { %2387 = vmatprep.mubr.f32.mxu0 %v1158_v59  ;;  %v799_v59 = vmul.f32 %v5081_v14, %v274_v48  ;;  %v3359_v1 = vpack.c.bf16 %v1254_v54, %v1253_v53  ;;  %v872_v48 = vmul.f32 %v5070_v9, %v347_v37  ;;  %v365_v53 = vld [vmem:[%s4389_s26 + $0x448] sm:$0xff]  ;;  %v411_v37 = vld [vmem:[%s4389_s26 + $0x5b8] sm:$0xff] }
  0xec   : > { %1648 = vmatmul.mubr.f32.gmra.mrb[44].mxu1 %v1149_v63  ;;  %v292_v63 = vld [vmem:[%s4389_s26 + $0x200] sm:$0xff] }
  0xed   : > { %2388 = vmatmul.mubr.f32.gmra.mrb[44].mxu0 %v1157_v2  ;;  %1652 = vmatprep.mubr.f32.mxu1 %v1168_v3  ;;  %v303_v2 = vld [vmem:[%s4389_s26 + $0x258] sm:$0xff]  ;;  %v3551_v3 = vpack.c.bf16 %v1382_v58, %v1381_v57 }
  0xee   : > { %2392 = vmatprep.mubr.f32.mxu0 %v1176_v6  ;;  %v1255_v6 = vld [vmem:[%s6499_s0 + $0x230] sm:$0xff]  ;;  %v1262_v57 = vld [vmem:[%s6499_s0 + $0x268] sm:$0xff] }
  0xef   : > { %v3362_v55 = vpack.c.bf16 %v1256_v7, %v1255_v6  ;;  %v383_v6 = vld [vmem:[%s4389_s26 + $0x4d8] sm:$0xff] }
  0xf0   : > { %1653 = vmatmul.mubr.f32.gmra.mrb[46].mxu1 %v1167_v11  ;;  %v1384_v11 = vld [vmem:[%s6499_s0 + $0x638] sm:$0xff] }
  0xf1   : > { %2393 = vmatmul.mubr.f32.gmra.mrb[46].mxu0 %v1175_v12  ;;  %1722 = vmatprep.mubr.f32.mxu1 %v756_v36  ;;  %v817_v12 = vmul.f32 %v5081_v14, %v292_v63  ;;  %v828_v36 = vmul.f32 %v5064_v5, %v303_v2  ;;  %v3554_v19 = vpack.c.bf16 %v1384_v11, %v1383_v10  ;;  %v356_v63 = vld [vmem:[%s4389_s26 + $0x400] sm:$0xff] }
  0xf2   : > { %2462 = vmatprep.mubr.f32.mxu0 %v764_v16  ;;  %v836_v16 = vmul.f32 %v5070_v9, %v311_v4  ;;  %v364_v2 = vld [vmem:[%s4389_s26 + $0x440] sm:$0xff]  ;;  %v881_v11 = vmul.f32 %v5075_v32, %v356_v63 }
  0xf3   : > { %v1264_v10 = vld [vmem:[%s6499_s0 + $0x278] sm:$0xff]  ;;  %v889_v13 = vmul.f32 %v5081_v14, %v364_v2 }
  0xf4   : > { %1723 = vmatmul.mubr.f32.vlgmr.msra.gmra.mrb[0].mxu1 %v755_v21  ;;  %v1258_v21 = vld [vmem:[%s6499_s0 + $0x248] sm:$0xff]  ;;  %v428_v2 = vld [vmem:[%s4389_s26 + $0x640] sm:$0xff] }
  0xf5   : > { %2463 = vmatmul.mubr.f32.vlgmr.msra.gmra.mrb[0].mxu0 %v763_v24  ;;  %3354 = vmatpush1.bf16.msra.mxu1 %v3353_v26  ;;  %v1385_v24 = vld [vmem:[%s6499_s0 + $0x640] sm:$0xff]  ;;  %v1386_v26 = vld [vmem:[%s6499_s0 + $0x648] sm:$0xff]  ;;  %v3365_v35 = vpack.c.bf16 %v1258_v21, %v1257_v20 }
  0xf6   : > { %3546 = vmatpush1.bf16.msra.mxu0 %v3545_v29  ;;  %1727 = vmatprep.mubr.f32.mxu1 %v774_v30  ;;  %v846_v29 = vmul.f32 %v5064_v5, %v321_v52  ;;  %v320_v30 = vld [vmem:[%s4389_s26 + $0x2e0] sm:$0xff]  ;;  %v3557_v38 = vpack.c.bf16 %v1386_v26, %v1385_v24  ;;  %v908_v52 = vmul.f32 %v5070_v9, %v383_v6  ;;  %v401_v20 = vld [vmem:[%s4389_s26 + $0x568] sm:$0xff]  ;;  %v1266_v24 = vld [vmem:[%s6499_s0 + $0x288] sm:$0xff] }
  0xf7   : > { %2467 = vmatprep.mubr.f32.mxu0 %v782_v34  ;;  %3355 = vmatprep.subr.bf16.mxu1 %v4239_v0  ;;  %v339_v34 = vld [vmem:[%s4389_s26 + $0x378] sm:$0xff]  ;;  %v845_v41 = vmul.f32 %v5075_v32, %v320_v30  ;;  %v899_v26 = vmul.f32 %v5075_v32, %v374_v17 }
  0xf8   : > { %1728 = vmatmul.mubr.f32.gmra.mrb[2].mxu1 %v773_v39  ;;  %3547 = vmatprep.subr.bf16.mxu0 %v4239_v0  ;;  %v1259_v39 = vld [vmem:[%s6499_s0 + $0x250] sm:$0xff] }
  0xf9   : > { %2468 = vmatmul.mubr.f32.gmra.mrb[2].mxu0 %v781_v42  ;;  %1732 = vmatprep.mubr.f32.mxu1 %v792_v43  ;;  %v1387_v42 = vld [vmem:[%s6499_s0 + $0x650] sm:$0xff]  ;;  %v1388_v43 = vld [vmem:[%s6499_s0 + $0x658] sm:$0xff]  ;;  %v3368_v51 = vpack.c.bf16 %v1260_v40, %v1259_v39 }
  0xfa   : > { %3357 = vmatpush1.bf16.msra.mxu1 %v3356_v46  ;;  %2472 = vmatprep.mubr.f32.mxu0 %v800_v47  ;;  %v864_v46 = vmul.f32 %v5064_v5, %v339_v34  ;;  %v338_v47 = vld [vmem:[%s4389_s26 + $0x370] sm:$0xff]  ;;  %v3560_v54 = vpack.c.bf16 %v1388_v43, %v1387_v42  ;;  %v926_v34 = vmul.f32 %v5070_v9, %v401_v20  ;;  %v419_v39 = vld [vmem:[%s4389_s26 + $0x5f8] sm:$0xff]  ;;  %v1268_v42 = vld [vmem:[%s6499_s0 + $0x298] sm:$0xff] }
  0xfb   : > { %3549 = vmatpush1.bf16.msra.mxu0 %v3548_v50  ;;  %3358 = vmatprep.subr.bf16.mxu1 %v4239_v0  ;;  %v357_v50 = vld [vmem:[%s4389_s26 + $0x408] sm:$0xff]  ;;  %v863_v58 = vmul.f32 %v5075_v32, %v338_v47  ;;  %v917_v43 = vmul.f32 %v5075_v32, %v392_v33  ;;  %v447_v6 = vld [vmem:[%s4389_s26 + $0x6d8] sm:$0xff] }
  0xfc   : > { %1733 = vmatmul.mubr.f32.gmra.mrb[4].mxu1 %v791_v56  ;;  %3550 = vmatprep.subr.bf16.mxu0 %v4239_v0  ;;  %v1261_v56 = vld [vmem:[%s6499_s0 + $0x260] sm:$0xff] }
  0xfd   : > { %2473 = vmatmul.mubr.f32.gmra.mrb[4].mxu0 %v799_v59  ;;  %1737 = vmatprep.mubr.f32.mxu1 %v810_v60  ;;  %v1389_v59 = vld [vmem:[%s6499_s0 + $0x660] sm:$0xff]  ;;  %v1390_v60 = vld [vmem:[%s6499_s0 + $0x668] sm:$0xff]  ;;  %v3371_v4 = vpack.c.bf16 %v1262_v57, %v1261_v56 }
  0xfe   : > { %2477 = vmatprep.mubr.f32.mxu0 %v818_v62  ;;  %3360 = vmatpush1.bf16.msra.mxu1 %v3359_v1  ;;  %v882_v62 = vmul.f32 %v5064_v5, %v357_v50  ;;  %v890_v1 = vmul.f32 %v5070_v9, %v365_v53  ;;  %v3563_v7 = vpack.c.bf16 %v1390_v60, %v1389_v59  ;;  %v429_v53 = vld [vmem:[%s4389_s26 + $0x648] sm:$0xff]  ;;  %v1270_v59 = vld [vmem:[%s6499_s0 + $0x2a8] sm:$0xff] }
  0xff   : > { %3552 = vmatpush1.bf16.msra.mxu0 %v3551_v3  ;;  %3361 = vmatprep.subr.bf16.mxu1 %v4239_v0  ;;  %v375_v3 = vld [vmem:[%s4389_s26 + $0x498] sm:$0xff]  ;;  %v944_v50 = vmul.f32 %v5070_v9, %v419_v39  ;;  %v437_v56 = vld [vmem:[%s4389_s26 + $0x688] sm:$0xff]  ;;  %v935_v60 = vmul.f32 %v5075_v32, %v410_v49 }
 0x100   : > { %1738 = vmatmul.mubr.f32.gmra.mrb[6].mxu1 %v809_v8  ;;  %3553 = vmatprep.subr.bf16.mxu0 %v4239_v0  ;;  %v1263_v8 = vld [vmem:[%s6499_s0 + $0x270] sm:$0xff]  ;;  %v465_v20 = vld [vmem:[%s4389_s26 + $0x768] sm:$0xff] }
 0x101   : > { %2478 = vmatmul.mubr.f32.gmra.mrb[6].mxu0 %v817_v12  ;;  %1742 = vmatprep.mubr.f32.mxu1 %v828_v36  ;;  %v1391_v12 = vld [vmem:[%s6499_s0 + $0x670] sm:$0xff]  ;;  %v1392_v36 = vld [vmem:[%s6499_s0 + $0x678] sm:$0xff] }
 0x102   : > { %2482 = vmatprep.mubr.f32.mxu0 %v836_v16  ;;  %3363 = vmatpush1.bf16.msra.mxu1 %v3362_v55  ;;  %v900_v16 = vmul.f32 %v5064_v5, %v375_v3  ;;  %v382_v55 = vld [vmem:[%s4389_s26 + $0x4d0] sm:$0xff]  ;;  %v3566_v21 = vpack.c.bf16 %v1392_v36, %v1391_v12  ;;  %v962_v3 = vmul.f32 %v5070_v9, %v437_v56  ;;  %v1272_v12 = vld [vmem:[%s6499_s0 + $0x2b8] sm:$0xff]  ;;  %v483_v39 = vld [vmem:[%s4389_s26 + $0x7f8] sm:$0xff] }
 0x103   : > { %3555 = vmatpush1.bf16.msra.mxu0 %v3554_v19  ;;  %3364 = vmatprep.subr.bf16.mxu1 %v4239_v0  ;;  %v3374_v19 = vpack.c.bf16 %v1264_v10, %v1263_v8  ;;  %v907_v30 = vmul.f32 %v5081_v14, %v382_v55  ;;  %v455_v8 = vld [vmem:[%s4389_s26 + $0x718] sm:$0xff]  ;;  %v953_v36 = vmul.f32 %v5075_v32, %v428_v2  ;;  %v446_v55 = vld [vmem:[%s4389_s26 + $0x6d0] sm:$0xff]  ;;  %v501_v56 = vld [vmem:[%s4389_s26 + $0x888] sm:$0xff] }
 0x104   : > { %1743 = vmatmul.mubr.f32.gmra.mrb[8].mxu1 %v827_v23  ;;  %3556 = vmatprep.subr.bf16.mxu0 %v4239_v0  ;;  %v1265_v23 = vld [vmem:[%s6499_s0 + $0x280] sm:$0xff] }
 0x105   : > { %2483 = vmatmul.mubr.f32.gmra.mrb[8].mxu0 %v835_v27  ;;  %1747 = vmatprep.mubr.f32.mxu1 %v846_v29  ;;  %v1393_v27 = vld [vmem:[%s6499_s0 + $0x680] sm:$0xff]  ;;  %v1394_v29 = vld [vmem:[%s6499_s0 + $0x688] sm:$0xff] }
 0x106   : > { %2487 = vmatprep.mubr.f32.mxu0 %v854_v31  ;;  %3366 = vmatpush1.bf16.msra.mxu1 %v3365_v35  ;;  %v918_v31 = vmul.f32 %v5064_v5, %v393_v18  ;;  %v400_v35 = vld [vmem:[%s4389_s26 + $0x560] sm:$0xff]  ;;  %v3569_v40 = vpack.c.bf16 %v1394_v29, %v1393_v27  ;;  %v980_v18 = vmul.f32 %v5070_v9, %v455_v8  ;;  %v1274_v27 = vld [vmem:[%s6499_s0 + $0x2c8] sm:$0xff] }
 0x107   : > { %3558 = vmatpush1.bf16.msra.mxu0 %v3557_v38  ;;  %3367 = vmatprep.subr.bf16.mxu1 %v4239_v0  ;;  %v3377_v38 = vpack.c.bf16 %v1266_v24, %v1265_v23  ;;  %v925_v47 = vmul.f32 %v5081_v14, %v400_v35  ;;  %v473_v23 = vld [vmem:[%s4389_s26 + $0x7a8] sm:$0xff]  ;;  %v971_v29 = vmul.f32 %v5075_v32, %v446_v55  ;;  %v464_v35 = vld [vmem:[%s4389_s26 + $0x760] sm:$0xff]  ;;  %v519_v8 = vld [vmem:[%s4389_s26 + $0x918] sm:$0xff] }
 0x108   : > { %1748 = vmatmul.mubr.f32.gmra.mrb[10].mxu1 %v845_v41  ;;  %3559 = vmatprep.subr.bf16.mxu0 %v4239_v0  ;;  %v1267_v41 = vld [vmem:[%s6499_s0 + $0x290] sm:$0xff] }
 0x109   : > { %2488 = vmatmul.mubr.f32.gmra.mrb[10].mxu0 %v853_v44  ;;  %1752 = vmatprep.mubr.f32.mxu1 %v864_v46  ;;  %v1395_v44 = vld [vmem:[%s6499_s0 + $0x690] sm:$0xff]  ;;  %v1396_v46 = vld [vmem:[%s6499_s0 + $0x698] sm:$0xff] }
 0x10a   : > { %2492 = vmatprep.mubr.f32.mxu0 %v872_v48  ;;  %3369 = vmatpush1.bf16.msra.mxu1 %v3368_v51  ;;  %v936_v48 = vmul.f32 %v5064_v5, %v411_v37  ;;  %v418_v51 = vld [vmem:[%s4389_s26 + $0x5f0] sm:$0xff]  ;;  %v3572_v57 = vpack.c.bf16 %v1396_v46, %v1395_v44  ;;  %v998_v37 = vmul.f32 %v5070_v9, %v473_v23  ;;  %v1276_v44 = vld [vmem:[%s6499_s0 + $0x2d8] sm:$0xff] }
 0x10b   : > { %3561 = vmatpush1.bf16.msra.mxu0 %v3560_v54  ;;  %3370 = vmatprep.subr.bf16.mxu1 %v4239_v0  ;;  %v3380_v54 = vpack.c.bf16 %v1268_v42, %v1267_v41  ;;  %v943_v63 = vmul.f32 %v5081_v14, %v418_v51  ;;  %v491_v41 = vld [vmem:[%s4389_s26 + $0x838] sm:$0xff]  ;;  %v989_v46 = vmul.f32 %v5075_v32, %v464_v35  ;;  %v482_v51 = vld [vmem:[%s4389_s26 + $0x7f0] sm:$0xff]  ;;  %v537_v23 = vld [vmem:[%s4389_s26 + $0x9a8] sm:$0xff] }
 0x10c   : > { %1753 = vmatmul.mubr.f32.gmra.mrb[12].mxu1 %v863_v58  ;;  %3562 = vmatprep.subr.bf16.mxu0 %v4239_v0  ;;  %v1269_v58 = vld [vmem:[%s6499_s0 + $0x2a0] sm:$0xff]  ;;  %v544_v35 = vld [vmem:[%s4389_s26 + $0x9e0] sm:$0xff] }
 0x10d   : > { %2493 = vmatmul.mubr.f32.gmra.mrb[12].mxu0 %v871_v61  ;;  %1757 = vmatprep.mubr.f32.mxu1 %v882_v62  ;;  %v1397_v61 = vld [vmem:[%s6499_s0 + $0x6a0] sm:$0xff]  ;;  %v1398_v62 = vld [vmem:[%s6499_s0 + $0x6a8] sm:$0xff] }
 0x10e   : > { %2497 = vmatprep.mubr.f32.mxu0 %v890_v1  ;;  %3372 = vmatpush1.bf16.msra.mxu1 %v3371_v4  ;;  %v954_v1 = vmul.f32 %v5064_v5, %v429_v53  ;;  %v436_v4 = vld [vmem:[%s4389_s26 + $0x680] sm:$0xff]  ;;  %v3575_v10 = vpack.c.bf16 %v1398_v62, %v1397_v61  ;;  %v1016_v53 = vmul.f32 %v5070_v9, %v491_v41  ;;  %v1278_v61 = vld [vmem:[%s6499_s0 + $0x2e8] sm:$0xff] }
 0x10f   : > { %3564 = vmatpush1.bf16.msra.mxu0 %v3563_v7  ;;  %3373 = vmatprep.subr.bf16.mxu1 %v4239_v0  ;;  %v3383_v7 = vpack.c.bf16 %v1270_v59, %v1269_v58  ;;  %v961_v17 = vmul.f32 %v5081_v14, %v436_v4  ;;  %v509_v58 = vld [vmem:[%s4389_s26 + $0x8c8] sm:$0xff]  ;;  %v1007_v62 = vmul.f32 %v5075_v32, %v482_v51  ;;  %v500_v4 = vld [vmem:[%s4389_s26 + $0x880] sm:$0xff] }
 0x110   : > { %1758 = vmatmul.mubr.f32.gmra.mrb[14].mxu1 %v881_v11  ;;  %3565 = vmatprep.subr.bf16.mxu0 %v4239_v0  ;;  %v1271_v11 = vld [vmem:[%s6499_s0 + $0x2b0] sm:$0xff] }
 0x111   : > { %2498 = vmatmul.mubr.f32.gmra.mrb[14].mxu0 %v889_v13  ;;  %1762 = vmatprep.mubr.f32.mxu1 %v900_v16  ;;  %v1399_v13 = vld [vmem:[%s6499_s0 + $0x6b0] sm:$0xff]  ;;  %v1400_v16 = vld [vmem:[%s6499_s0 + $0x6b8] sm:$0xff] }
 0x112   : > { %2502 = vmatprep.mubr.f32.mxu0 %v908_v52  ;;  %3375 = vmatpush1.bf16.msra.mxu1 %v3374_v19  ;;  %v972_v52 = vmul.f32 %v5064_v5, %v447_v6  ;;  %v454_v19 = vld [vmem:[%s4389_s26 + $0x710] sm:$0xff]  ;;  %v3578_v24 = vpack.c.bf16 %v1400_v16, %v1399_v13  ;;  %v1034_v6 = vmul.f32 %v5070_v9, %v509_v58  ;;  %v1280_v13 = vld [vmem:[%s6499_s0 + $0x2f8] sm:$0xff] }
 0x113   : > { %3567 = vmatpush1.bf16.msra.mxu0 %v3566_v21  ;;  %3376 = vmatprep.subr.bf16.mxu1 %v4239_v0  ;;  %v3386_v21 = vpack.c.bf16 %v1272_v12, %v1271_v11  ;;  %v979_v33 = vmul.f32 %v5081_v14, %v454_v19  ;;  %v527_v11 = vld [vmem:[%s4389_s26 + $0x958] sm:$0xff]  ;;  %v1025_v16 = vmul.f32 %v5075_v32, %v500_v4  ;;  %v518_v19 = vld [vmem:[%s4389_s26 + $0x910] sm:$0xff]  ;;  %v572_v51 = vld [vmem:[%s4389_s26 + $0xac0] sm:$0xff] }
 0x114   : > { %1763 = vmatmul.mubr.f32.gmra.mrb[16].mxu1 %v899_v26  ;;  %3568 = vmatprep.subr.bf16.mxu0 %v4239_v0  ;;  %v1273_v26 = vld [vmem:[%s6499_s0 + $0x2c0] sm:$0xff]  ;;  %v1097_v58 = vmul.f32 %v5075_v32, %v572_v51 }
 0x115   : > { %2503 = vmatmul.mubr.f32.gmra.mrb[16].mxu0 %v907_v30  ;;  %1767 = vmatprep.mubr.f32.mxu1 %v918_v31  ;;  %v1401_v30 = vld [vmem:[%s6499_s0 + $0x6c0] sm:$0xff]  ;;  %v1402_v31 = vld [vmem:[%s6499_s0 + $0x6c8] sm:$0xff] }
 0x116   : > { %2507 = vmatprep.mubr.f32.mxu0 %v926_v34  ;;  %3378 = vmatpush1.bf16.msra.mxu1 %v3377_v38  ;;  %v990_v34 = vmul.f32 %v5064_v5, %v465_v20  ;;  %v472_v38 = vld [vmem:[%s4389_s26 + $0x7a0] sm:$0xff]  ;;  %v3581_v42 = vpack.c.bf16 %v1402_v31, %v1401_v30  ;;  %v1052_v20 = vmul.f32 %v5070_v9, %v527_v11  ;;  %v627_v11 = vld [vmem:[%s4389_s26 + $0xc78] sm:$0xff]  ;;  %v250_v51 = vld [vmem:[%s4389_s26 + $0xb0] sm:$0xff] }
 0x117   : > { %3570 = vmatpush1.bf16.msra.mxu0 %v3569_v40  ;;  %3379 = vmatprep.subr.bf16.mxu1 %v4239_v0  ;;  %v3389_v40 = vpack.c.bf16 %v1274_v27, %v1273_v26  ;;  %v997_v49 = vmul.f32 %v5081_v14, %v472_v38  ;;  %v545_v26 = vld [vmem:[%s4389_s26 + $0x9e8] sm:$0xff]  ;;  %v1062_v31 = vmul.f32 %v5064_v5, %v537_v23  ;;  %v563_v38 = vld [vmem:[%s4389_s26 + $0xa78] sm:$0xff]  ;;  %v681_v23 = vsub.s32 4, %v4554_v15 }
 0x118   : > { %1768 = vmatmul.mubr.f32.gmra.mrb[18].mxu1 %v917_v43  ;;  %3571 = vmatprep.subr.bf16.mxu0 %v4239_v0  ;;  %v1275_v43 = vld [vmem:[%s6499_s0 + $0x2d0] sm:$0xff] }
 0x119   : > { %2508 = vmatmul.mubr.f32.gmra.mrb[18].mxu0 %v925_v47  ;;  %1772 = vmatprep.mubr.f32.mxu1 %v936_v48  ;;  %v1403_v47 = vld [vmem:[%s6499_s0 + $0x6d0] sm:$0xff]  ;;  %v1404_v48 = vld [vmem:[%s6499_s0 + $0x6d8] sm:$0xff] }
 0x11a   : > { %2512 = vmatprep.mubr.f32.mxu0 %v944_v50  ;;  %3381 = vmatpush1.bf16.msra.mxu1 %v3380_v54  ;;  %v1008_v50 = vmul.f32 %v5064_v5, %v483_v39  ;;  %v490_v54 = vld [vmem:[%s4389_s26 + $0x830] sm:$0xff]  ;;  %v3584_v59 = vpack.c.bf16 %v1404_v48, %v1403_v47  ;;  %v581_v47 = vld [vmem:[%s4389_s26 + $0xb08] sm:$0xff] }
 0x11b   : > { %3573 = vmatpush1.bf16.msra.mxu0 %v3572_v57  ;;  %3382 = vmatprep.subr.bf16.mxu1 %v4239_v0  ;;  %v3392_v57 = vpack.c.bf16 %v1276_v44, %v1275_v43  ;;  %v1015_v2 = vmul.f32 %v5081_v14, %v490_v54  ;;  %v1088_v43 = vmul.f32 %v5070_v9, %v563_v38  ;;  %v562_v44 = vld [vmem:[%s4389_s26 + $0xa70] sm:$0xff]  ;;  %v580_v54 = vld [vmem:[%s4389_s26 + $0xb00] sm:$0xff] }
 0x11c   : > { %1773 = vmatmul.mubr.f32.gmra.mrb[20].mxu1 %v935_v60  ;;  %3574 = vmatprep.subr.bf16.mxu0 %v4239_v0  ;;  %v1277_v60 = vld [vmem:[%s6499_s0 + $0x2e0] sm:$0xff] }
 0x11d   : > { %2513 = vmatmul.mubr.f32.gmra.mrb[20].mxu0 %v943_v63  ;;  %1777 = vmatprep.mubr.f32.mxu1 %v954_v1  ;;  %v1405_v63 = vld [vmem:[%s6499_s0 + $0x6e0] sm:$0xff]  ;;  %v1406_v1 = vld [vmem:[%s6499_s0 + $0x6e8] sm:$0xff] }
 0x11e   : > { %2517 = vmatprep.mubr.f32.mxu0 %v962_v3  ;;  %3384 = vmatpush1.bf16.msra.mxu1 %v3383_v7  ;;  %v1026_v3 = vmul.f32 %v5064_v5, %v501_v56  ;;  %v508_v7 = vld [vmem:[%s4389_s26 + $0x8c0] sm:$0xff]  ;;  %v3587_v12 = vpack.c.bf16 %v1406_v1, %v1405_v63  ;;  %v591_v56 = vld [vmem:[%s4389_s26 + $0xb58] sm:$0xff]  ;;  %v598_v63 = vld [vmem:[%s4389_s26 + $0xb90] sm:$0xff] }
 0x11f   : > { %3576 = vmatpush1.bf16.msra.mxu0 %v3575_v10  ;;  %3385 = vmatprep.subr.bf16.mxu1 %v4239_v0  ;;  %v3395_v10 = vpack.c.bf16 %v1278_v61, %v1277_v60  ;;  %v1033_v55 = vmul.f32 %v5081_v14, %v508_v7  ;;  %v1116_v60 = vmul.f32 %v5064_v5, %v591_v56  ;;  %v590_v61 = vld [vmem:[%s4389_s26 + $0xb50] sm:$0xff]  ;;  %v609_v1 = vld [vmem:[%s4389_s26 + $0xbe8] sm:$0xff]  ;;  %v608_v7 = vld [vmem:[%s4389_s26 + $0xbe0] sm:$0xff] }
 0x120   : > { %1778 = vmatmul.mubr.f32.gmra.mrb[22].mxu1 %v953_v36  ;;  %3577 = vmatprep.subr.bf16.mxu0 %v4239_v0  ;;  %v1279_v36 = vld [vmem:[%s6499_s0 + $0x2f0] sm:$0xff]  ;;  %v1123_v4 = vmul.f32 %v5081_v14, %v598_v63  ;;  %v258_v56 = vld [vmem:[%s4389_s26 + $0xf0] sm:$0xff] }
 0x121   : > { %2518 = vmatmul.mubr.f32.gmra.mrb[22].mxu0 %v961_v17  ;;  %1782 = vmatprep.mubr.f32.mxu1 %v972_v52  ;;  %v1407_v17 = vld [vmem:[%s6499_s0 + $0x6f0] sm:$0xff]  ;;  %v1408_v52 = vld [vmem:[%s6499_s0 + $0x6f8] sm:$0xff] }
 0x122   : > { %2522 = vmatprep.mubr.f32.mxu0 %v980_v18  ;;  %3387 = vmatpush1.bf16.msra.mxu1 %v3386_v21  ;;  %v1044_v18 = vmul.f32 %v5064_v5, %v519_v8  ;;  %v526_v21 = vld [vmem:[%s4389_s26 + $0x950] sm:$0xff]  ;;  %v3590_v27 = vpack.c.bf16 %v1408_v52, %v1407_v17  ;;  %v685_v52 = vsub.s32 5, %v4554_v15  ;;  %v1411_v63 = vld [vmem:[%s6499_s0 + $0x710] sm:$0xff] }
 0x123   : > { %3579 = vmatpush1.bf16.msra.mxu0 %v3578_v24  ;;  %3388 = vmatprep.subr.bf16.mxu1 %v4239_v0  ;;  %v3398_v24 = vpack.c.bf16 %v1280_v13, %v1279_v36  ;;  %v1051_v30 = vmul.f32 %v5081_v14, %v526_v21  ;;  %v1133_v36 = vmul.f32 %v5075_v32, %v608_v7  ;;  %v626_v17 = vld [vmem:[%s4389_s26 + $0xc70] sm:$0xff] }
 0x124   : > { %1783 = vmatmul.mubr.f32.gmra.mrb[24].mxu1 %v971_v29  ;;  %3580 = vmatprep.subr.bf16.mxu0 %v4239_v0  ;;  %v1043_v29 = vmul.f32 %v5075_v32, %v518_v19  ;;  %v645_v19 = vld [vmem:[%s4389_s26 + $0xd08] sm:$0xff]  ;;  %v1151_v21 = vmul.f32 %v5075_v32, %v626_v17 }
 0x125   : > { %2523 = vmatmul.mubr.f32.gmra.mrb[24].mxu0 %v979_v33  ;;  %1787 = vmatprep.mubr.f32.mxu1 %v990_v34  ;;  %v536_v33 = vld [vmem:[%s4389_s26 + $0x9a0] sm:$0xff]  ;;  %v1070_v34 = vmul.f32 %v5070_v9, %v545_v26  ;;  %v1170_v26 = vmul.f32 %v5064_v5, %v645_v19  ;;  %v1413_v17 = vld [vmem:[%s6499_s0 + $0x720] sm:$0xff] }
 0x126   : > { %2527 = vmatprep.mubr.f32.mxu0 %v998_v37  ;;  %3390 = vmatpush1.bf16.msra.mxu1 %v3389_v40  ;;  %v555_v37 = vld [vmem:[%s4389_s26 + $0xa38] sm:$0xff]  ;;  %v1061_v39 = vmul.f32 %v5075_v32, %v536_v33  ;;  %v1069_v40 = vmul.f32 %v5081_v14, %v544_v35  ;;  %v233_v33 = vld [vmem:[%s4389_s26 + $0x28] sm:$0xff]  ;;  %v286_v19 = vld [vmem:[%s4389_s26 + $0x1d0] sm:$0xff] }
 0x127   : > { %3582 = vmatpush1.bf16.msra.mxu0 %v3581_v42  ;;  %3391 = vmatprep.subr.bf16.mxu1 %v4239_v0  ;;  %v1080_v41 = vmul.f32 %v5064_v5, %v555_v37  ;;  %v554_v42 = vld [vmem:[%s4389_s26 + $0xa30] sm:$0xff]  ;;  %v241_v35 = vld [vmem:[%s4389_s26 + $0x68] sm:$0xff] }
 0x128   : > { %1788 = vmatmul.mubr.f32.gmra.mrb[26].mxu1 %v989_v46  ;;  %3583 = vmatprep.subr.bf16.mxu0 %v4239_v0  ;;  %v573_v46 = vld [vmem:[%s4389_s26 + $0xac8] sm:$0xff]  ;;  %v1079_v48 = vmul.f32 %v5075_v32, %v554_v42  ;;  %v240_v42 = vld [vmem:[%s4389_s26 + $0x60] sm:$0xff] }
 0x129   : > { %2528 = vmatmul.mubr.f32.gmra.mrb[26].mxu0 %v997_v49  ;;  %1792 = vmatprep.mubr.f32.mxu1 %v1008_v50  ;;  %v1087_v49 = vmul.f32 %v5081_v14, %v562_v44  ;;  %v1098_v50 = vmul.f32 %v5064_v5, %v573_v46  ;;  %v1410_v44 = vld [vmem:[%s6499_s0 + $0x708] sm:$0xff] }
 0x12a   : > { %2532 = vmatprep.mubr.f32.mxu0 %v1016_v53  ;;  %3393 = vmatpush1.bf16.msra.mxu1 %v3392_v57  ;;  %v1106_v53 = vmul.f32 %v5070_v9, %v581_v47  ;;  %v599_v57 = vld [vmem:[%s4389_s26 + $0xb98] sm:$0xff] }
 0x12b   : > { %3585 = vmatpush1.bf16.msra.mxu0 %v3584_v59  ;;  %3394 = vmatprep.subr.bf16.mxu1 %v4239_v0  ;;  %v1105_v59 = vmul.f32 %v5081_v14, %v580_v54  ;;  %v251_v46 = vld [vmem:[%s4389_s26 + $0xb8] sm:$0xff] }
 0x12c   : > { %1793 = vmatmul.mubr.f32.gmra.mrb[28].mxu1 %v1007_v62  ;;  %3586 = vmatprep.subr.bf16.mxu0 %v4239_v0  ;;  %v1124_v62 = vmul.f32 %v5070_v9, %v599_v57  ;;  %v269_v57 = vld [vmem:[%s4389_s26 + $0x148] sm:$0xff] }
 0x12d   : > { %2533 = vmatmul.mubr.f32.gmra.mrb[28].mxu0 %v1015_v2  ;;  %1797 = vmatprep.mubr.f32.mxu1 %v1026_v3  ;;  %v617_v2 = vld [vmem:[%s4389_s26 + $0xc28] sm:$0xff]  ;;  %v1115_v3 = vmul.f32 %v5075_v32, %v590_v61 }
 0x12e   : > { %2537 = vmatprep.mubr.f32.mxu0 %v1034_v6  ;;  %3396 = vmatpush1.bf16.msra.mxu1 %v3395_v10  ;;  %v1134_v6 = vmul.f32 %v5064_v5, %v609_v1  ;;  %v1142_v8 = vmul.f32 %v5070_v9, %v617_v2  ;;  %v616_v10 = vld [vmem:[%s4389_s26 + $0xc20] sm:$0xff]  ;;  %v277_v61 = vld [vmem:[%s4389_s26 + $0x188] sm:$0xff] }
 0x12f   : > { %3588 = vmatpush1.bf16.msra.mxu0 %v3587_v12  ;;  %3397 = vmatprep.subr.bf16.mxu1 %v4239_v0  ;;  %v635_v12 = vld [vmem:[%s4389_s26 + $0xcb8] sm:$0xff]  ;;  %v1141_v13 = vmul.f32 %v5081_v14, %v616_v10  ;;  %v1412_v1 = vld [vmem:[%s6499_s0 + $0x718] sm:$0xff] }
 0x130   : > { %1798 = vmatmul.mubr.f32.gmra.mrb[30].mxu1 %v1025_v16  ;;  %3589 = vmatprep.subr.bf16.mxu0 %v4239_v0  ;;  %v1152_v16 = vmul.f32 %v5064_v5, %v627_v11  ;;  %v5505_v5 = vrot.slane %v4580_v25, %v681_v23  ;;  %v287_v10 = vld [vmem:[%s4389_s26 + $0x1d8] sm:$0xff]  ;;  %v3596_v11 = vpack.c.bf16 %v1412_v1, %v1411_v63  ;;  %v1292_v63 = vld [vmem:[%s6499_s0 + $0x358] sm:$0xff] }
 0x131   : > { %2538 = vmatmul.mubr.f32.gmra.mrb[30].mxu0 %v1033_v55  ;;  %1802 = vmatprep.mubr.f32.mxu1 %v1044_v18  ;;  %v1160_v55 = vmul.f32 %v5070_v9, %v635_v12  ;;  %v634_v18 = vld [vmem:[%s4389_s26 + $0xcb0] sm:$0xff]  ;;  %v295_v12 = vld [vmem:[%s4389_s26 + $0x218] sm:$0xff] }
 0x132   : > { %2542 = vmatprep.mubr.f32.mxu0 %v1052_v20  ;;  %3399 = vmatpush1.bf16.msra.mxu1 %v3398_v24  ;;  %v653_v20 = vld [vmem:[%s4389_s26 + $0xd48] sm:$0xff]  ;;  %v1159_v24 = vmul.f32 %v5081_v14, %v634_v18 }
 0x133   : > { %3591 = vmatpush1.bf16.msra.mxu0 %v3590_v27  ;;  %3400 = vmatprep.subr.bf16.mxu1 %v4239_v0  ;;  %v644_v27 = vld [vmem:[%s4389_s26 + $0xd00] sm:$0xff] }
 0x134   : > { %1803 = vmatmul.mubr.f32.gmra.mrb[32].mxu1 %v1043_v29  ;;  %3592 = vmatprep.subr.bf16.mxu0 %v4239_v0  ;;  %v5494_v29 = vrot.slane %v4580_v25, %v685_v52  ;;  %v1169_v37 = vmul.f32 %v5075_v32, %v644_v27  ;;  %v1281_v32 = vld [vmem:[%s6499_s0 + $0x300] sm:$0xff] }
 0x135   : > { %2543 = vmatmul.mubr.f32.gmra.mrb[32].mxu0 %v1051_v30  ;;  %1807 = vmatprep.mubr.f32.mxu1 %v1062_v31  ;;  %v1178_v30 = vmul.f32 %v5070_v9, %v653_v20  ;;  %v652_v31 = vld [vmem:[%s4389_s26 + $0xd40] sm:$0xff]  ;;  %v313_v27 = vld [vmem:[%s4389_s26 + $0x2a8] sm:$0xff] }
 0x136   : > { %2547 = vmatprep.mubr.f32.mxu0 %v1070_v34  ;;  %v5500_v34 = vrot.slane %v4583_v28, %v685_v52  ;;  %v1177_v38 = vmul.f32 %v5081_v14, %v652_v31  ;;  %v758_v9 = vmul.f32 %v5494_v29, %v233_v33  ;;  %v1282_v14 = vld [vmem:[%s6499_s0 + $0x308] sm:$0xff]  ;;  %v776_v54 = vmul.f32 %v5494_v29, %v251_v46  ;;  %v1288_v31 = vld [vmem:[%s6499_s0 + $0x338] sm:$0xff]  ;;  %v1289_v46 = vld [vmem:[%s6499_s0 + $0x340] sm:$0xff] }
 0x137   : > { %v1414_v52 = vld [vmem:[%s6499_s0 + $0x728] sm:$0xff]  ;;  %v812_v18 = vmul.f32 %v5494_v29, %v287_v10  ;;  %v811_v33 = vmul.f32 %v5505_v5, %v286_v19  ;;  %v348_v10 = vld [vmem:[%s4389_s26 + $0x3c0] sm:$0xff] }
 0x138   : > { %1808 = vmatmul.mubr.f32.gmra.mrb[34].mxu1 %v1061_v39  ;;  %v232_v39 = vld [vmem:[%s4389_s26 + $0x20] sm:$0xff]  ;;  %v802_v7 = vmul.f32 %v5500_v34, %v277_v61  ;;  %v820_v20 = vmul.f32 %v5500_v34, %v295_v12 }
 0x139   : > { %2548 = vmatmul.mubr.f32.gmra.mrb[34].mxu0 %v1069_v40  ;;  %1812 = vmatprep.mubr.f32.mxu1 %v1080_v41  ;;  %v5511_v40 = vrot.slane %v4583_v28, %v681_v23  ;;  %v766_v41 = vmul.f32 %v5500_v34, %v241_v35  ;;  %v757_v47 = vmul.f32 %v5505_v5, %v232_v39  ;;  %v1415_v35 = vld [vmem:[%s6499_s0 + $0x730] sm:$0xff] }
 0x13a   : > { %2552 = vmatprep.mubr.f32.mxu0 %v1088_v43  ;;  %v1409_v43 = vld [vmem:[%s6499_s0 + $0x700] sm:$0xff]  ;;  %v304_v39 = vld [vmem:[%s4389_s26 + $0x260] sm:$0xff] }
 0x13b   : > { %v783_v2 = vmul.f32 %v5511_v40, %v258_v56  ;;  %v873_v19 = vmul.f32 %v5511_v40, %v348_v10  ;;  %v412_v10 = vld [vmem:[%s4389_s26 + $0x5c0] sm:$0xff] }
 0x13c   : > { %1813 = vmatmul.mubr.f32.gmra.mrb[36].mxu1 %v1079_v48  ;;  %v259_v48 = vld [vmem:[%s4389_s26 + $0xf8] sm:$0xff] }
 0x13d   : > { %2553 = vmatmul.mubr.f32.gmra.mrb[36].mxu0 %v1087_v49  ;;  %1817 = vmatprep.mubr.f32.mxu1 %v1098_v50  ;;  %v765_v49 = vmul.f32 %v5511_v40, %v240_v42  ;;  %v3401_v50 = vpack.c.bf16 %v1282_v14, %v1281_v32  ;;  %v312_v42 = vld [vmem:[%s4389_s26 + $0x2a0] sm:$0xff]  ;;  %v323_v32 = vld [vmem:[%s4389_s26 + $0x2f8] sm:$0xff] }
 0x13e   : > { %2557 = vmatprep.mubr.f32.mxu0 %v1106_v53  ;;  %v3593_v53 = vpack.c.bf16 %v1410_v44, %v1409_v43  ;;  %v331_v43 = vld [vmem:[%s4389_s26 + $0x338] sm:$0xff] }
 0x13f   : > { %v856_v56 = vmul.f32 %v5500_v34, %v331_v43  ;;  %v395_v43 = vld [vmem:[%s4389_s26 + $0x538] sm:$0xff] }
 0x140   : > { %1818 = vmatmul.mubr.f32.gmra.mrb[38].mxu1 %v1097_v58  ;;  %v784_v58 = vmul.f32 %v5500_v34, %v259_v48  ;;  %v829_v48 = vmul.f32 %v5505_v5, %v304_v39 }
 0x141   : > { %2558 = vmatmul.mubr.f32.gmra.mrb[38].mxu0 %v1105_v59  ;;  %1822 = vmatprep.mubr.f32.mxu1 %v1116_v60  ;;  %v1283_v59 = vld [vmem:[%s6499_s0 + $0x310] sm:$0xff]  ;;  %v1284_v60 = vld [vmem:[%s6499_s0 + $0x318] sm:$0xff] }
 0x142   : > { %2562 = vmatprep.mubr.f32.mxu0 %v1124_v62  ;;  %v775_v62 = vmul.f32 %v5505_v5, %v250_v51  ;;  %v837_v51 = vmul.f32 %v5511_v40, %v312_v42  ;;  %v376_v42 = vld [vmem:[%s4389_s26 + $0x4a0] sm:$0xff] }
 0x144   : > { %1823 = vmatmul.mubr.f32.gmra.mrb[40].mxu1 %v1115_v3  ;;  %v794_v3 = vmul.f32 %v5494_v29, %v269_v57  ;;  %v330_v57 = vld [vmem:[%s4389_s26 + $0x330] sm:$0xff] }
 0x145   : > { %2563 = vmatmul.mubr.f32.gmra.mrb[40].mxu0 %v1123_v4  ;;  %1827 = vmatprep.mubr.f32.mxu1 %v1134_v6  ;;  %v268_v4 = vld [vmem:[%s4389_s26 + $0x140] sm:$0xff]  ;;  %v3404_v6 = vpack.c.bf16 %v1284_v60, %v1283_v59  ;;  %v349_v60 = vld [vmem:[%s4389_s26 + $0x3c8] sm:$0xff] }
 0x146   : > { %2567 = vmatprep.mubr.f32.mxu0 %v1142_v8  ;;  %v276_v8 = vld [vmem:[%s4389_s26 + $0x180] sm:$0xff] }
 0x148   : > { %1828 = vmatmul.mubr.f32.gmra.mrb[42].mxu1 %v1133_v36  ;;  %v1285_v36 = vld [vmem:[%s6499_s0 + $0x320] sm:$0xff] }
 0x149   : > { %2568 = vmatmul.mubr.f32.gmra.mrb[42].mxu0 %v1141_v13  ;;  %1832 = vmatprep.mubr.f32.mxu1 %v1152_v16  ;;  %v1286_v13 = vld [vmem:[%s6499_s0 + $0x328] sm:$0xff]  ;;  %v793_v16 = vmul.f32 %v5505_v5, %v268_v4  ;;  %v855_v4 = vmul.f32 %v5511_v40, %v330_v57 }
 0x14a   : > { %2572 = vmatprep.mubr.f32.mxu0 %v1160_v55  ;;  %v801_v55 = vmul.f32 %v5511_v40, %v276_v8  ;;  %v3407_v23 = vpack.c.bf16 %v1286_v13, %v1285_v36  ;;  %v874_v8 = vmul.f32 %v5500_v34, %v349_v60  ;;  %v367_v36 = vld [vmem:[%s4389_s26 + $0x458] sm:$0xff]  ;;  %v394_v57 = vld [vmem:[%s4389_s26 + $0x530] sm:$0xff]  ;;  %v413_v60 = vld [vmem:[%s4389_s26 + $0x5c8] sm:$0xff] }
 0x14c   : > { %1833 = vmatmul.mubr.f32.gmra.mrb[44].mxu1 %v1151_v21  ;;  %v294_v21 = vld [vmem:[%s4389_s26 + $0x210] sm:$0xff] }
 0x14d   : > { %2573 = vmatmul.mubr.f32.gmra.mrb[44].mxu0 %v1159_v24  ;;  %1837 = vmatprep.mubr.f32.mxu1 %v1170_v26  ;;  %v305_v24 = vld [vmem:[%s4389_s26 + $0x268] sm:$0xff]  ;;  %v3599_v26 = vpack.c.bf16 %v1414_v52, %v1413_v17  ;;  %v1294_v17 = vld [vmem:[%s6499_s0 + $0x368] sm:$0xff] }
 0x14e   : > { %2577 = vmatprep.mubr.f32.mxu0 %v1178_v30  ;;  %v1287_v30 = vld [vmem:[%s6499_s0 + $0x330] sm:$0xff] }
 0x14f   : > { %v3410_v14 = vpack.c.bf16 %v1288_v31, %v1287_v30  ;;  %v385_v30 = vld [vmem:[%s4389_s26 + $0x4e8] sm:$0xff] }
 0x150   : > { %1838 = vmatmul.mubr.f32.gmra.mrb[46].mxu1 %v1169_v37  ;;  %v1416_v37 = vld [vmem:[%s6499_s0 + $0x738] sm:$0xff] }
 0x151   : > { %2578 = vmatmul.mubr.f32.gmra.mrb[46].mxu0 %v1177_v38  ;;  %1907 = vmatprep.mubr.f32.mxu1 %v758_v9  ;;  %v819_v38 = vmul.f32 %v5511_v40, %v294_v21  ;;  %v830_v9 = vmul.f32 %v5494_v29, %v305_v24  ;;  %v3602_v44 = vpack.c.bf16 %v1416_v37, %v1415_v35  ;;  %v358_v21 = vld [vmem:[%s4389_s26 + $0x410] sm:$0xff]  ;;  %v1296_v35 = vld [vmem:[%s6499_s0 + $0x378] sm:$0xff] }
 0x152   : > { %2647 = vmatprep.mubr.f32.mxu0 %v766_v41  ;;  %v838_v41 = vmul.f32 %v5500_v34, %v313_v27  ;;  %v366_v24 = vld [vmem:[%s4389_s26 + $0x450] sm:$0xff]  ;;  %v883_v37 = vmul.f32 %v5505_v5, %v358_v21 }
 0x153   : > { %v891_v39 = vmul.f32 %v5511_v40, %v366_v24  ;;  %v430_v24 = vld [vmem:[%s4389_s26 + $0x650] sm:$0xff] }
 0x154   : > { %1908 = vmatmul.mubr.f32.vlgmr.msra.gmra.mrb[0].mxu1 %v757_v47  ;;  %v1290_v47 = vld [vmem:[%s6499_s0 + $0x348] sm:$0xff] }
 0x155   : > { %2648 = vmatmul.mubr.f32.vlgmr.msra.gmra.mrb[0].mxu0 %v765_v49  ;;  %3402 = vmatpush1.bf16.msra.mxu1 %v3401_v50  ;;  %v1417_v49 = vld [vmem:[%s6499_s0 + $0x740] sm:$0xff]  ;;  %v1418_v50 = vld [vmem:[%s6499_s0 + $0x748] sm:$0xff]  ;;  %v3413_v59 = vpack.c.bf16 %v1290_v47, %v1289_v46 }
 0x156   : > { %3594 = vmatpush1.bf16.msra.mxu0 %v3593_v53  ;;  %1912 = vmatprep.mubr.f32.mxu1 %v776_v54  ;;  %v848_v53 = vmul.f32 %v5494_v29, %v323_v32  ;;  %v322_v54 = vld [vmem:[%s4389_s26 + $0x2f0] sm:$0xff]  ;;  %v3605_v61 = vpack.c.bf16 %v1418_v50, %v1417_v49  ;;  %v910_v32 = vmul.f32 %v5500_v34, %v385_v30  ;;  %v403_v46 = vld [vmem:[%s4389_s26 + $0x578] sm:$0xff]  ;;  %v449_v30 = vld [vmem:[%s4389_s26 + $0x6e8] sm:$0xff] }
 0x157   : > { %2652 = vmatprep.mubr.f32.mxu0 %v784_v58  ;;  %3403 = vmatprep.subr.bf16.mxu1 %v4239_v0  ;;  %v341_v58 = vld [vmem:[%s4389_s26 + $0x388] sm:$0xff]  ;;  %v847_v1 = vmul.f32 %v5505_v5, %v322_v54  ;;  %v1298_v49 = vld [vmem:[%s6499_s0 + $0x388] sm:$0xff]  ;;  %v901_v50 = vmul.f32 %v5505_v5, %v376_v42 }
 0x158   : > { %1913 = vmatmul.mubr.f32.gmra.mrb[2].mxu1 %v775_v62  ;;  %3595 = vmatprep.subr.bf16.mxu0 %v4239_v0  ;;  %v1291_v62 = vld [vmem:[%s6499_s0 + $0x350] sm:$0xff] }
 0x159   : > { %2653 = vmatmul.mubr.f32.gmra.mrb[2].mxu0 %v783_v2  ;;  %1917 = vmatprep.mubr.f32.mxu1 %v794_v3  ;;  %v1419_v2 = vld [vmem:[%s6499_s0 + $0x750] sm:$0xff]  ;;  %v1420_v3 = vld [vmem:[%s6499_s0 + $0x758] sm:$0xff]  ;;  %v3416_v12 = vpack.c.bf16 %v1292_v63, %v1291_v62 }
 0x15a   : > { %3405 = vmatpush1.bf16.msra.mxu1 %v3404_v6  ;;  %2657 = vmatprep.mubr.f32.mxu0 %v802_v7  ;;  %v866_v6 = vmul.f32 %v5494_v29, %v341_v58  ;;  %v340_v7 = vld [vmem:[%s4389_s26 + $0x380] sm:$0xff]  ;;  %v3608_v13 = vpack.c.bf16 %v1420_v3, %v1419_v2  ;;  %v928_v58 = vmul.f32 %v5500_v34, %v403_v46  ;;  %v421_v62 = vld [vmem:[%s4389_s26 + $0x608] sm:$0xff]  ;;  %v467_v46 = vld [vmem:[%s4389_s26 + $0x778] sm:$0xff] }
 0x15b   : > { %3597 = vmatpush1.bf16.msra.mxu0 %v3596_v11  ;;  %3406 = vmatprep.subr.bf16.mxu1 %v4239_v0  ;;  %v359_v11 = vld [vmem:[%s4389_s26 + $0x418] sm:$0xff]  ;;  %v865_v52 = vmul.f32 %v5505_v5, %v340_v7  ;;  %v1300_v2 = vld [vmem:[%s6499_s0 + $0x398] sm:$0xff]  ;;  %v919_v3 = vmul.f32 %v5505_v5, %v394_v57 }
 0x15c   : > { %1918 = vmatmul.mubr.f32.gmra.mrb[4].mxu1 %v793_v16  ;;  %3598 = vmatprep.subr.bf16.mxu0 %v4239_v0  ;;  %v1293_v16 = vld [vmem:[%s6499_s0 + $0x360] sm:$0xff] }
 0x15d   : > { %2658 = vmatmul.mubr.f32.gmra.mrb[4].mxu0 %v801_v55  ;;  %1922 = vmatprep.mubr.f32.mxu1 %v812_v18  ;;  %v1421_v55 = vld [vmem:[%s6499_s0 + $0x760] sm:$0xff]  ;;  %v1422_v18 = vld [vmem:[%s6499_s0 + $0x768] sm:$0xff]  ;;  %v3419_v27 = vpack.c.bf16 %v1294_v17, %v1293_v16 }
 0x15e   : > { %2662 = vmatprep.mubr.f32.mxu0 %v820_v20  ;;  %3408 = vmatpush1.bf16.msra.mxu1 %v3407_v23  ;;  %v884_v20 = vmul.f32 %v5494_v29, %v359_v11  ;;  %v892_v23 = vmul.f32 %v5500_v34, %v367_v36  ;;  %v3611_v31 = vpack.c.bf16 %v1422_v18, %v1421_v55  ;;  %v431_v36 = vld [vmem:[%s4389_s26 + $0x658] sm:$0xff] }
 0x15f   : > { %3600 = vmatpush1.bf16.msra.mxu0 %v3599_v26  ;;  %3409 = vmatprep.subr.bf16.mxu1 %v4239_v0  ;;  %v377_v26 = vld [vmem:[%s4389_s26 + $0x4a8] sm:$0xff]  ;;  %v946_v11 = vmul.f32 %v5500_v34, %v421_v62  ;;  %v439_v16 = vld [vmem:[%s4389_s26 + $0x698] sm:$0xff]  ;;  %v937_v18 = vmul.f32 %v5505_v5, %v412_v10 }
 0x160   : > { %1923 = vmatmul.mubr.f32.gmra.mrb[6].mxu1 %v811_v33  ;;  %3601 = vmatprep.subr.bf16.mxu0 %v4239_v0  ;;  %v1295_v33 = vld [vmem:[%s6499_s0 + $0x370] sm:$0xff]  ;;  %v1302_v55 = vld [vmem:[%s6499_s0 + $0x3a8] sm:$0xff]  ;;  %v485_v62 = vld [vmem:[%s4389_s26 + $0x808] sm:$0xff] }
 0x161   : > { %2663 = vmatmul.mubr.f32.gmra.mrb[6].mxu0 %v819_v38  ;;  %1927 = vmatprep.mubr.f32.mxu1 %v830_v9  ;;  %v1423_v38 = vld [vmem:[%s6499_s0 + $0x770] sm:$0xff]  ;;  %v1424_v9 = vld [vmem:[%s6499_s0 + $0x778] sm:$0xff] }
 0x162   : > { %2667 = vmatprep.mubr.f32.mxu0 %v838_v41  ;;  %3411 = vmatpush1.bf16.msra.mxu1 %v3410_v14  ;;  %v902_v41 = vmul.f32 %v5494_v29, %v377_v26  ;;  %v384_v14 = vld [vmem:[%s4389_s26 + $0x4e0] sm:$0xff]  ;;  %v3614_v47 = vpack.c.bf16 %v1424_v9, %v1423_v38  ;;  %v964_v26 = vmul.f32 %v5500_v34, %v439_v16  ;;  %v503_v16 = vld [vmem:[%s4389_s26 + $0x898] sm:$0xff] }
 0x163   : > { %3603 = vmatpush1.bf16.msra.mxu0 %v3602_v44  ;;  %3412 = vmatprep.subr.bf16.mxu1 %v4239_v0  ;;  %v3422_v44 = vpack.c.bf16 %v1296_v35, %v1295_v33  ;;  %v909_v54 = vmul.f32 %v5511_v40, %v384_v14  ;;  %v457_v33 = vld [vmem:[%s4389_s26 + $0x728] sm:$0xff]  ;;  %v955_v9 = vmul.f32 %v5505_v5, %v430_v24  ;;  %v448_v14 = vld [vmem:[%s4389_s26 + $0x6e0] sm:$0xff] }
 0x164   : > { %1928 = vmatmul.mubr.f32.gmra.mrb[8].mxu1 %v829_v48  ;;  %3604 = vmatprep.subr.bf16.mxu0 %v4239_v0  ;;  %v1297_v48 = vld [vmem:[%s6499_s0 + $0x380] sm:$0xff]  ;;  %v1304_v38 = vld [vmem:[%s6499_s0 + $0x3b8] sm:$0xff] }
 0x165   : > { %2668 = vmatmul.mubr.f32.gmra.mrb[8].mxu0 %v837_v51  ;;  %1932 = vmatprep.mubr.f32.mxu1 %v848_v53  ;;  %v1425_v51 = vld [vmem:[%s6499_s0 + $0x780] sm:$0xff]  ;;  %v1426_v53 = vld [vmem:[%s6499_s0 + $0x788] sm:$0xff] }
 0x166   : > { %2672 = vmatprep.mubr.f32.mxu0 %v856_v56  ;;  %3414 = vmatpush1.bf16.msra.mxu1 %v3413_v59  ;;  %v920_v56 = vmul.f32 %v5494_v29, %v395_v43  ;;  %v402_v59 = vld [vmem:[%s4389_s26 + $0x570] sm:$0xff]  ;;  %v3617_v63 = vpack.c.bf16 %v1426_v53, %v1425_v51  ;;  %v982_v43 = vmul.f32 %v5500_v34, %v457_v33  ;;  %v521_v33 = vld [vmem:[%s4389_s26 + $0x928] sm:$0xff] }
 0x167   : > { %3606 = vmatpush1.bf16.msra.mxu0 %v3605_v61  ;;  %3415 = vmatprep.subr.bf16.mxu1 %v4239_v0  ;;  %v3425_v61 = vpack.c.bf16 %v1298_v49, %v1297_v48  ;;  %v927_v7 = vmul.f32 %v5511_v40, %v402_v59  ;;  %v475_v48 = vld [vmem:[%s4389_s26 + $0x7b8] sm:$0xff]  ;;  %v973_v53 = vmul.f32 %v5505_v5, %v448_v14  ;;  %v466_v59 = vld [vmem:[%s4389_s26 + $0x770] sm:$0xff] }
 0x168   : > { %1933 = vmatmul.mubr.f32.gmra.mrb[10].mxu1 %v847_v1  ;;  %3607 = vmatprep.subr.bf16.mxu0 %v4239_v0  ;;  %v1299_v1 = vld [vmem:[%s6499_s0 + $0x390] sm:$0xff]  ;;  %v1306_v51 = vld [vmem:[%s6499_s0 + $0x3c8] sm:$0xff] }
 0x169   : > { %2673 = vmatmul.mubr.f32.gmra.mrb[10].mxu0 %v855_v4  ;;  %1937 = vmatprep.mubr.f32.mxu1 %v866_v6  ;;  %v1427_v4 = vld [vmem:[%s6499_s0 + $0x790] sm:$0xff]  ;;  %v1428_v6 = vld [vmem:[%s6499_s0 + $0x798] sm:$0xff] }
 0x16a   : > { %2677 = vmatprep.mubr.f32.mxu0 %v874_v8  ;;  %3417 = vmatpush1.bf16.msra.mxu1 %v3416_v12  ;;  %v938_v8 = vmul.f32 %v5494_v29, %v413_v60  ;;  %v420_v12 = vld [vmem:[%s4389_s26 + $0x600] sm:$0xff]  ;;  %v3620_v17 = vpack.c.bf16 %v1428_v6, %v1427_v4  ;;  %v1000_v60 = vmul.f32 %v5500_v34, %v475_v48  ;;  %v539_v48 = vld [vmem:[%s4389_s26 + $0x9b8] sm:$0xff] }
 0x16b   : > { %3609 = vmatpush1.bf16.msra.mxu0 %v3608_v13  ;;  %3418 = vmatprep.subr.bf16.mxu1 %v4239_v0  ;;  %v3428_v13 = vpack.c.bf16 %v1300_v2, %v1299_v1  ;;  %v945_v21 = vmul.f32 %v5511_v40, %v420_v12  ;;  %v493_v1 = vld [vmem:[%s4389_s26 + $0x848] sm:$0xff]  ;;  %v991_v6 = vmul.f32 %v5505_v5, %v466_v59  ;;  %v484_v12 = vld [vmem:[%s4389_s26 + $0x800] sm:$0xff]  ;;  %v546_v59 = vld [vmem:[%s4389_s26 + $0x9f0] sm:$0xff] }
 0x16c   : > { %1938 = vmatmul.mubr.f32.gmra.mrb[12].mxu1 %v865_v52  ;;  %3610 = vmatprep.subr.bf16.mxu0 %v4239_v0  ;;  %v1301_v52 = vld [vmem:[%s6499_s0 + $0x3a0] sm:$0xff]  ;;  %v1308_v4 = vld [vmem:[%s6499_s0 + $0x3d8] sm:$0xff] }
 0x16d   : > { %2678 = vmatmul.mubr.f32.gmra.mrb[12].mxu0 %v873_v19  ;;  %1942 = vmatprep.mubr.f32.mxu1 %v884_v20  ;;  %v1429_v19 = vld [vmem:[%s6499_s0 + $0x7a0] sm:$0xff]  ;;  %v1430_v20 = vld [vmem:[%s6499_s0 + $0x7a8] sm:$0xff] }
 0x16e   : > { %2682 = vmatprep.mubr.f32.mxu0 %v892_v23  ;;  %3420 = vmatpush1.bf16.msra.mxu1 %v3419_v27  ;;  %v956_v23 = vmul.f32 %v5494_v29, %v431_v36  ;;  %v438_v27 = vld [vmem:[%s4389_s26 + $0x690] sm:$0xff]  ;;  %v3623_v35 = vpack.c.bf16 %v1430_v20, %v1429_v19  ;;  %v1018_v36 = vmul.f32 %v5500_v34, %v493_v1 }
 0x16f   : > { %3612 = vmatpush1.bf16.msra.mxu0 %v3611_v31  ;;  %3421 = vmatprep.subr.bf16.mxu1 %v4239_v0  ;;  %v3431_v31 = vpack.c.bf16 %v1302_v55, %v1301_v52  ;;  %v963_v42 = vmul.f32 %v5511_v40, %v438_v27  ;;  %v511_v52 = vld [vmem:[%s4389_s26 + $0x8d8] sm:$0xff]  ;;  %v1009_v20 = vmul.f32 %v5505_v5, %v484_v12  ;;  %v502_v27 = vld [vmem:[%s4389_s26 + $0x890] sm:$0xff] }
 0x170   : > { %1943 = vmatmul.mubr.f32.gmra.mrb[14].mxu1 %v883_v37  ;;  %3613 = vmatprep.subr.bf16.mxu0 %v4239_v0  ;;  %v1303_v37 = vld [vmem:[%s6499_s0 + $0x3b0] sm:$0xff]  ;;  %v1310_v19 = vld [vmem:[%s6499_s0 + $0x3e8] sm:$0xff] }
 0x171   : > { %2683 = vmatmul.mubr.f32.gmra.mrb[14].mxu0 %v891_v39  ;;  %1947 = vmatprep.mubr.f32.mxu1 %v902_v41  ;;  %v1431_v39 = vld [vmem:[%s6499_s0 + $0x7b0] sm:$0xff]  ;;  %v1432_v41 = vld [vmem:[%s6499_s0 + $0x7b8] sm:$0xff]  ;;  %v574_v12 = vld [vmem:[%s4389_s26 + $0xad0] sm:$0xff] }
 0x172   : > { %2687 = vmatprep.mubr.f32.mxu0 %v910_v32  ;;  %3423 = vmatpush1.bf16.msra.mxu1 %v3422_v44  ;;  %v974_v32 = vmul.f32 %v5494_v29, %v449_v30  ;;  %v456_v44 = vld [vmem:[%s4389_s26 + $0x720] sm:$0xff]  ;;  %v3626_v49 = vpack.c.bf16 %v1432_v41, %v1431_v39  ;;  %v1036_v30 = vmul.f32 %v5500_v34, %v511_v52 }
 0x173   : > { %3615 = vmatpush1.bf16.msra.mxu0 %v3614_v47  ;;  %3424 = vmatprep.subr.bf16.mxu1 %v4239_v0  ;;  %v3434_v47 = vpack.c.bf16 %v1304_v38, %v1303_v37  ;;  %v981_v57 = vmul.f32 %v5511_v40, %v456_v44  ;;  %v529_v37 = vld [vmem:[%s4389_s26 + $0x968] sm:$0xff]  ;;  %v1027_v41 = vmul.f32 %v5505_v5, %v502_v27  ;;  %v520_v44 = vld [vmem:[%s4389_s26 + $0x920] sm:$0xff] }
 0x174   : > { %1948 = vmatmul.mubr.f32.gmra.mrb[16].mxu1 %v901_v50  ;;  %3616 = vmatprep.subr.bf16.mxu0 %v4239_v0  ;;  %v1305_v50 = vld [vmem:[%s6499_s0 + $0x3c0] sm:$0xff]  ;;  %v1312_v39 = vld [vmem:[%s6499_s0 + $0x3f8] sm:$0xff]  ;;  %v1099_v52 = vmul.f32 %v5505_v5, %v574_v12  ;;  %v279_v12 = vld [vmem:[%s4389_s26 + $0x198] sm:$0xff] }
 0x175   : > { %2688 = vmatmul.mubr.f32.gmra.mrb[16].mxu0 %v909_v54  ;;  %1952 = vmatprep.mubr.f32.mxu1 %v920_v56  ;;  %v1433_v54 = vld [vmem:[%s6499_s0 + $0x7c0] sm:$0xff]  ;;  %v1434_v56 = vld [vmem:[%s6499_s0 + $0x7c8] sm:$0xff] }
 0x176   : > { %2692 = vmatprep.mubr.f32.mxu0 %v928_v58  ;;  %3426 = vmatpush1.bf16.msra.mxu1 %v3425_v61  ;;  %v992_v58 = vmul.f32 %v5494_v29, %v467_v46  ;;  %v474_v61 = vld [vmem:[%s4389_s26 + $0x7b0] sm:$0xff]  ;;  %v3629_v2 = vpack.c.bf16 %v1434_v56, %v1433_v54  ;;  %v1054_v46 = vmul.f32 %v5500_v34, %v529_v37  ;;  %v629_v37 = vld [vmem:[%s4389_s26 + $0xc88] sm:$0xff] }
 0x177   : > { %3618 = vmatpush1.bf16.msra.mxu0 %v3617_v63  ;;  %3427 = vmatprep.subr.bf16.mxu1 %v4239_v0  ;;  %v3437_v63 = vpack.c.bf16 %v1306_v51, %v1305_v50  ;;  %v999_v10 = vmul.f32 %v5511_v40, %v474_v61  ;;  %v547_v50 = vld [vmem:[%s4389_s26 + $0x9f8] sm:$0xff]  ;;  %v1064_v56 = vmul.f32 %v5494_v29, %v539_v48  ;;  %v565_v61 = vld [vmem:[%s4389_s26 + $0xa88] sm:$0xff]  ;;  %v689_v48 = vsub.s32 6, %v4554_v15 }
 0x178   : > { %1953 = vmatmul.mubr.f32.gmra.mrb[18].mxu1 %v919_v3  ;;  %3619 = vmatprep.subr.bf16.mxu0 %v4239_v0  ;;  %v1307_v3 = vld [vmem:[%s6499_s0 + $0x3d0] sm:$0xff] }
 0x179   : > { %2693 = vmatmul.mubr.f32.gmra.mrb[18].mxu0 %v927_v7  ;;  %1957 = vmatprep.mubr.f32.mxu1 %v938_v8  ;;  %v1435_v7 = vld [vmem:[%s6499_s0 + $0x7d0] sm:$0xff]  ;;  %v1436_v8 = vld [vmem:[%s6499_s0 + $0x7d8] sm:$0xff] }
 0x17a   : > { %2697 = vmatprep.mubr.f32.mxu0 %v946_v11  ;;  %3429 = vmatpush1.bf16.msra.mxu1 %v3428_v13  ;;  %v1010_v11 = vmul.f32 %v5494_v29, %v485_v62  ;;  %v492_v13 = vld [vmem:[%s4389_s26 + $0x840] sm:$0xff]  ;;  %v3632_v55 = vpack.c.bf16 %v1436_v8, %v1435_v7  ;;  %v583_v7 = vld [vmem:[%s4389_s26 + $0xb18] sm:$0xff] }
 0x17b   : > { %3621 = vmatpush1.bf16.msra.mxu0 %v3620_v17  ;;  %3430 = vmatprep.subr.bf16.mxu1 %v4239_v0  ;;  %v3440_v17 = vpack.c.bf16 %v1308_v4, %v1307_v3  ;;  %v1017_v24 = vmul.f32 %v5511_v40, %v492_v13  ;;  %v1090_v3 = vmul.f32 %v5500_v34, %v565_v61  ;;  %v564_v4 = vld [vmem:[%s4389_s26 + $0xa80] sm:$0xff]  ;;  %v582_v13 = vld [vmem:[%s4389_s26 + $0xb10] sm:$0xff] }
 0x17c   : > { %1958 = vmatmul.mubr.f32.gmra.mrb[20].mxu1 %v937_v18  ;;  %3622 = vmatprep.subr.bf16.mxu0 %v4239_v0  ;;  %v1309_v18 = vld [vmem:[%s6499_s0 + $0x3e0] sm:$0xff] }
 0x17d   : > { %2698 = vmatmul.mubr.f32.gmra.mrb[20].mxu0 %v945_v21  ;;  %1962 = vmatprep.mubr.f32.mxu1 %v956_v23  ;;  %v1437_v21 = vld [vmem:[%s6499_s0 + $0x7e0] sm:$0xff]  ;;  %v1438_v23 = vld [vmem:[%s6499_s0 + $0x7e8] sm:$0xff] }
 0x17e   : > { %2702 = vmatprep.mubr.f32.mxu0 %v964_v26  ;;  %3432 = vmatpush1.bf16.msra.mxu1 %v3431_v31  ;;  %v1028_v26 = vmul.f32 %v5494_v29, %v503_v16  ;;  %v510_v31 = vld [vmem:[%s4389_s26 + $0x8d0] sm:$0xff]  ;;  %v3635_v38 = vpack.c.bf16 %v1438_v23, %v1437_v21  ;;  %v593_v16 = vld [vmem:[%s4389_s26 + $0xb68] sm:$0xff]  ;;  %v600_v21 = vld [vmem:[%s4389_s26 + $0xba0] sm:$0xff] }
 0x17f   : > { %3624 = vmatpush1.bf16.msra.mxu0 %v3623_v35  ;;  %3433 = vmatprep.subr.bf16.mxu1 %v4239_v0  ;;  %v3443_v35 = vpack.c.bf16 %v1310_v19, %v1309_v18  ;;  %v1035_v14 = vmul.f32 %v5511_v40, %v510_v31  ;;  %v1118_v18 = vmul.f32 %v5494_v29, %v593_v16  ;;  %v592_v19 = vld [vmem:[%s4389_s26 + $0xb60] sm:$0xff]  ;;  %v611_v23 = vld [vmem:[%s4389_s26 + $0xbf8] sm:$0xff]  ;;  %v610_v31 = vld [vmem:[%s4389_s26 + $0xbf0] sm:$0xff] }
 0x180   : > { %1963 = vmatmul.mubr.f32.gmra.mrb[22].mxu1 %v955_v9  ;;  %3625 = vmatprep.subr.bf16.mxu0 %v4239_v0  ;;  %v1311_v9 = vld [vmem:[%s6499_s0 + $0x3f0] sm:$0xff]  ;;  %v1125_v27 = vmul.f32 %v5511_v40, %v600_v21  ;;  %v234_v61 = vld [vmem:[%s4389_s26 + $0x30] sm:$0xff]  ;;  %v289_v21 = vld [vmem:[%s4389_s26 + $0x1e8] sm:$0xff] }
 0x181   : > { %2703 = vmatmul.mubr.f32.gmra.mrb[22].mxu0 %v963_v42  ;;  %1967 = vmatprep.mubr.f32.mxu1 %v974_v32  ;;  %v1439_v42 = vld [vmem:[%s6499_s0 + $0x7f0] sm:$0xff]  ;;  %v1440_v32 = vld [vmem:[%s6499_s0 + $0x7f8] sm:$0xff] }
 0x182   : > { %2707 = vmatprep.mubr.f32.mxu0 %v982_v43  ;;  %3435 = vmatpush1.bf16.msra.mxu1 %v3434_v47  ;;  %v1046_v43 = vmul.f32 %v5494_v29, %v521_v33  ;;  %v528_v47 = vld [vmem:[%s4389_s26 + $0x960] sm:$0xff]  ;;  %v3638_v51 = vpack.c.bf16 %v1440_v32, %v1439_v42  ;;  %v693_v32 = vsub.s32 7, %v4554_v15  ;;  %v243_v15 = vld [vmem:[%s4389_s26 + $0x78] sm:$0xff] }
 0x183   : > { %3627 = vmatpush1.bf16.msra.mxu0 %v3626_v49  ;;  %3436 = vmatprep.subr.bf16.mxu1 %v4239_v0  ;;  %v3446_v49 = vpack.c.bf16 %v1312_v39, %v1311_v9  ;;  %v1053_v54 = vmul.f32 %v5511_v40, %v528_v47  ;;  %v1135_v9 = vmul.f32 %v5505_v5, %v610_v31  ;;  %v628_v42 = vld [vmem:[%s4389_s26 + $0xc80] sm:$0xff] }
 0x184   : > { %1968 = vmatmul.mubr.f32.gmra.mrb[24].mxu1 %v973_v53  ;;  %3628 = vmatprep.subr.bf16.mxu0 %v4239_v0  ;;  %v1045_v53 = vmul.f32 %v5505_v5, %v520_v44  ;;  %v647_v44 = vld [vmem:[%s4389_s26 + $0xd18] sm:$0xff]  ;;  %v1153_v47 = vmul.f32 %v5505_v5, %v628_v42  ;;  %v1448_v42 = vld [vmem:[%s6499_s0 + $0x838] sm:$0xff] }
 0x185   : > { %2708 = vmatmul.mubr.f32.gmra.mrb[24].mxu0 %v981_v57  ;;  %1972 = vmatprep.mubr.f32.mxu1 %v992_v58  ;;  %v538_v57 = vld [vmem:[%s4389_s26 + $0x9b0] sm:$0xff]  ;;  %v1072_v58 = vmul.f32 %v5500_v34, %v547_v50  ;;  %v1172_v50 = vmul.f32 %v5494_v29, %v647_v44 }
 0x186   : > { %2712 = vmatprep.mubr.f32.mxu0 %v1000_v60  ;;  %3438 = vmatpush1.bf16.msra.mxu1 %v3437_v63  ;;  %v557_v60 = vld [vmem:[%s4389_s26 + $0xa48] sm:$0xff]  ;;  %v1063_v62 = vmul.f32 %v5505_v5, %v538_v57  ;;  %v1071_v63 = vmul.f32 %v5511_v40, %v546_v59  ;;  %v235_v57 = vld [vmem:[%s4389_s26 + $0x38] sm:$0xff]  ;;  %v306_v44 = vld [vmem:[%s4389_s26 + $0x270] sm:$0xff] }
 0x187   : > { %3630 = vmatpush1.bf16.msra.mxu0 %v3629_v2  ;;  %3439 = vmatprep.subr.bf16.mxu1 %v4239_v0  ;;  %v1082_v1 = vmul.f32 %v5494_v29, %v557_v60  ;;  %v556_v2 = vld [vmem:[%s4389_s26 + $0xa40] sm:$0xff] }
 0x188   : > { %1973 = vmatmul.mubr.f32.gmra.mrb[26].mxu1 %v991_v6  ;;  %3631 = vmatprep.subr.bf16.mxu0 %v4239_v0  ;;  %v575_v6 = vld [vmem:[%s4389_s26 + $0xad8] sm:$0xff]  ;;  %v1081_v8 = vmul.f32 %v5505_v5, %v556_v2  ;;  %v261_v2 = vld [vmem:[%s4389_s26 + $0x108] sm:$0xff] }
 0x189   : > { %2713 = vmatmul.mubr.f32.gmra.mrb[26].mxu0 %v999_v10  ;;  %1977 = vmatprep.mubr.f32.mxu1 %v1010_v11  ;;  %v1089_v10 = vmul.f32 %v5511_v40, %v564_v4  ;;  %v1100_v11 = vmul.f32 %v5494_v29, %v575_v6  ;;  %v252_v6 = vld [vmem:[%s4389_s26 + $0xc0] sm:$0xff] }
 0x18a   : > { %2717 = vmatprep.mubr.f32.mxu0 %v1018_v36  ;;  %3441 = vmatpush1.bf16.msra.mxu1 %v3440_v17  ;;  %v1108_v36 = vmul.f32 %v5500_v34, %v583_v7  ;;  %v601_v17 = vld [vmem:[%s4389_s26 + $0xba8] sm:$0xff] }
 0x18b   : > { %3633 = vmatpush1.bf16.msra.mxu0 %v3632_v55  ;;  %3442 = vmatprep.subr.bf16.mxu1 %v4239_v0  ;;  %v1107_v55 = vmul.f32 %v5511_v40, %v582_v13  ;;  %v1444_v13 = vld [vmem:[%s6499_s0 + $0x818] sm:$0xff] }
 0x18c   : > { %1978 = vmatmul.mubr.f32.gmra.mrb[28].mxu1 %v1009_v20  ;;  %3634 = vmatprep.subr.bf16.mxu0 %v4239_v0  ;;  %v1126_v20 = vmul.f32 %v5500_v34, %v601_v17 }
 0x18d   : > { %2718 = vmatmul.mubr.f32.gmra.mrb[28].mxu0 %v1017_v24  ;;  %1982 = vmatprep.mubr.f32.mxu1 %v1028_v26  ;;  %v619_v24 = vld [vmem:[%s4389_s26 + $0xc38] sm:$0xff]  ;;  %v1117_v26 = vmul.f32 %v5505_v5, %v592_v19 }
 0x18e   : > { %2722 = vmatprep.mubr.f32.mxu0 %v1036_v30  ;;  %3444 = vmatpush1.bf16.msra.mxu1 %v3443_v35  ;;  %v1136_v30 = vmul.f32 %v5494_v29, %v611_v23  ;;  %v1144_v33 = vmul.f32 %v5500_v34, %v619_v24  ;;  %v618_v35 = vld [vmem:[%s4389_s26 + $0xc30] sm:$0xff]  ;;  %v297_v23 = vld [vmem:[%s4389_s26 + $0x228] sm:$0xff] }
 0x18f   : > { %3636 = vmatpush1.bf16.msra.mxu0 %v3635_v38  ;;  %3445 = vmatprep.subr.bf16.mxu1 %v4239_v0  ;;  %v637_v38 = vld [vmem:[%s4389_s26 + $0xcc8] sm:$0xff]  ;;  %v1143_v39 = vmul.f32 %v5511_v40, %v618_v35 }
 0x190   : > { %1983 = vmatmul.mubr.f32.gmra.mrb[30].mxu1 %v1027_v41  ;;  %3637 = vmatprep.subr.bf16.mxu0 %v4239_v0  ;;  %v1154_v41 = vmul.f32 %v5494_v29, %v629_v37  ;;  %v5935_v29 = vrot.slane %v4580_v25, %v689_v48  ;;  %v1445_v24 = vld [vmem:[%s6499_s0 + $0x820] sm:$0xff]  ;;  %v296_v37 = vld [vmem:[%s4389_s26 + $0x220] sm:$0xff] }
 0x191   : > { %2723 = vmatmul.mubr.f32.gmra.mrb[30].mxu0 %v1035_v14  ;;  %1987 = vmatprep.mubr.f32.mxu1 %v1046_v43  ;;  %v1162_v14 = vmul.f32 %v5500_v34, %v637_v38  ;;  %v636_v43 = vld [vmem:[%s4389_s26 + $0xcc0] sm:$0xff] }
 0x192   : > { %2727 = vmatprep.mubr.f32.mxu0 %v1054_v46  ;;  %3447 = vmatpush1.bf16.msra.mxu1 %v3446_v49  ;;  %v655_v46 = vld [vmem:[%s4389_s26 + $0xd58] sm:$0xff]  ;;  %v1161_v49 = vmul.f32 %v5511_v40, %v636_v43  ;;  %v777_v16 = vmul.f32 %v5935_v29, %v252_v6  ;;  %v350_v6 = vld [vmem:[%s4389_s26 + $0x3d0] sm:$0xff] }
 0x193   : > { %3639 = vmatpush1.bf16.msra.mxu0 %v3638_v51  ;;  %3688 = vmatprep.subr.bf16.mxu1 %v4239_v0  ;;  %v646_v51 = vld [vmem:[%s4389_s26 + $0xd10] sm:$0xff] }
 0x194   : > { %1988 = vmatmul.mubr.f32.gmra.mrb[32].mxu1 %v1045_v53  ;;  %3640 = vmatprep.subr.bf16.mxu0 %v4239_v0  ;;  %v5924_v53 = vrot.slane %v4580_v25, %v693_v32  ;;  %v1171_v59 = vmul.f32 %v5505_v5, %v646_v51  ;;  %v242_v5 = vld [vmem:[%s4389_s26 + $0x70] sm:$0xff] }
 0x195   : > { %2728 = vmatmul.mubr.f32.gmra.mrb[32].mxu0 %v1053_v54  ;;  %1992 = vmatprep.mubr.f32.mxu1 %v1064_v56  ;;  %v1180_v54 = vmul.f32 %v5500_v34, %v655_v46  ;;  %v654_v56 = vld [vmem:[%s4389_s26 + $0xd50] sm:$0xff] }
 0x196   : > { %2732 = vmatprep.mubr.f32.mxu0 %v1072_v58  ;;  %v5930_v58 = vrot.slane %v4583_v28, %v693_v32  ;;  %v1179_v60 = vmul.f32 %v5511_v40, %v654_v56  ;;  %v760_v34 = vmul.f32 %v5924_v53, %v235_v57  ;;  %v1441_v25 = vld [vmem:[%s6499_s0 + $0x800] sm:$0xff]  ;;  %v1442_v40 = vld [vmem:[%s6499_s0 + $0x808] sm:$0xff]  ;;  %v814_v31 = vmul.f32 %v5924_v53, %v289_v21  ;;  %v1455_v21 = vld [vmem:[%s6499_s0 + $0x870] sm:$0xff] }
 0x197   : > { %v3641_v4 = vpack.c.bf16 %v1442_v40, %v1441_v25  ;;  %v1449_v51 = vld [vmem:[%s6499_s0 + $0x840] sm:$0xff]  ;;  %v831_v56 = vmul.f32 %v5935_v29, %v306_v44  ;;  %v1451_v25 = vld [vmem:[%s6499_s0 + $0x850] sm:$0xff]  ;;  %v1452_v40 = vld [vmem:[%s6499_s0 + $0x858] sm:$0xff] }
 0x198   : > { %1993 = vmatmul.mubr.f32.gmra.mrb[34].mxu1 %v1063_v62  ;;  %v5941_v62 = vrot.slane %v4583_v28, %v689_v48  ;;  %v759_v28 = vmul.f32 %v5935_v29, %v234_v61  ;;  %v822_v35 = vmul.f32 %v5930_v58, %v297_v23  ;;  %v325_v48 = vld [vmem:[%s4389_s26 + $0x308] sm:$0xff]  ;;  %v343_v61 = vld [vmem:[%s4389_s26 + $0x398] sm:$0xff]  ;;  %v404_v44 = vld [vmem:[%s4389_s26 + $0x580] sm:$0xff] }
 0x199   : > { %2733 = vmatmul.mubr.f32.gmra.mrb[34].mxu0 %v1071_v63  ;;  %1997 = vmatprep.mubr.f32.mxu1 %v1082_v1  ;;  %v768_v63 = vmul.f32 %v5930_v58, %v243_v15  ;;  %v253_v1 = vld [vmem:[%s4389_s26 + $0xc8] sm:$0xff]  ;;  %v850_v15 = vmul.f32 %v5924_v53, %v325_v48  ;;  %v423_v48 = vld [vmem:[%s4389_s26 + $0x618] sm:$0xff] }
 0x19a   : > { %2737 = vmatprep.mubr.f32.mxu0 %v1090_v3  ;;  %v767_v3 = vmul.f32 %v5941_v62, %v242_v5  ;;  %v778_v7 = vmul.f32 %v5924_v53, %v253_v1  ;;  %v351_v5 = vld [vmem:[%s4389_s26 + $0x3d8] sm:$0xff]  ;;  %v1456_v23 = vld [vmem:[%s6499_s0 + $0x878] sm:$0xff] }
 0x19c   : > { %1998 = vmatmul.mubr.f32.gmra.mrb[36].mxu1 %v1081_v8  ;;  %v260_v8 = vld [vmem:[%s4389_s26 + $0x100] sm:$0xff] }
 0x19d   : > { %2738 = vmatmul.mubr.f32.gmra.mrb[36].mxu0 %v1089_v10  ;;  %2002 = vmatprep.mubr.f32.mxu1 %v1100_v11  ;;  %v271_v10 = vld [vmem:[%s4389_s26 + $0x158] sm:$0xff]  ;;  %v786_v11 = vmul.f32 %v5930_v58, %v261_v2  ;;  %v785_v17 = vmul.f32 %v5941_v62, %v260_v8  ;;  %v868_v2 = vmul.f32 %v5924_v53, %v343_v61  ;;  %v441_v61 = vld [vmem:[%s4389_s26 + $0x6a8] sm:$0xff] }
 0x19e   : > { %2742 = vmatprep.mubr.f32.mxu0 %v1108_v36  ;;  %v1443_v36 = vld [vmem:[%s6499_s0 + $0x810] sm:$0xff]  ;;  %v3656_v8 = vpack.c.bf16 %v1452_v40, %v1451_v25 }
 0x19f   : > { %v3644_v19 = vpack.c.bf16 %v1444_v13, %v1443_v36  ;;  %v875_v13 = vmul.f32 %v5941_v62, %v350_v6 }
 0x1a0   : > { %2003 = vmatmul.mubr.f32.gmra.mrb[38].mxu1 %v1099_v52  ;;  %v796_v52 = vmul.f32 %v5924_v53, %v271_v10  ;;  %v369_v10 = vld [vmem:[%s4389_s26 + $0x468] sm:$0xff] }
 0x1a1   : > { %2743 = vmatmul.mubr.f32.gmra.mrb[38].mxu0 %v1107_v55  ;;  %2007 = vmatprep.mubr.f32.mxu1 %v1118_v18  ;;  %v270_v55 = vld [vmem:[%s4389_s26 + $0x150] sm:$0xff]  ;;  %v804_v18 = vmul.f32 %v5930_v58, %v279_v12 }
 0x1a2   : > { %2747 = vmatprep.mubr.f32.mxu0 %v1126_v20  ;;  %v278_v20 = vld [vmem:[%s4389_s26 + $0x190] sm:$0xff] }
 0x1a3   : > { %v1454_v12 = vld [vmem:[%s6499_s0 + $0x868] sm:$0xff] }
 0x1a4   : > { %2008 = vmatmul.mubr.f32.gmra.mrb[40].mxu1 %v1117_v26  ;;  %v1446_v26 = vld [vmem:[%s6499_s0 + $0x828] sm:$0xff] }
 0x1a5   : > { %2748 = vmatmul.mubr.f32.gmra.mrb[40].mxu0 %v1125_v27  ;;  %2012 = vmatprep.mubr.f32.mxu1 %v1136_v30  ;;  %v795_v27 = vmul.f32 %v5935_v29, %v270_v55  ;;  %v803_v30 = vmul.f32 %v5941_v62, %v278_v20  ;;  %v3647_v38 = vpack.c.bf16 %v1446_v26, %v1445_v24  ;;  %v368_v55 = vld [vmem:[%s4389_s26 + $0x460] sm:$0xff]  ;;  %v387_v20 = vld [vmem:[%s4389_s26 + $0x4f8] sm:$0xff] }
 0x1a6   : > { %2752 = vmatprep.mubr.f32.mxu0 %v1144_v33  ;;  %v288_v33 = vld [vmem:[%s4389_s26 + $0x1e0] sm:$0xff]  ;;  %v893_v26 = vmul.f32 %v5941_v62, %v368_v55 }
 0x1a7   : > { %v813_v32 = vmul.f32 %v5935_v29, %v288_v33  ;;  %v386_v33 = vld [vmem:[%s4389_s26 + $0x4f0] sm:$0xff] }
 0x1a8   : > { %2013 = vmatmul.mubr.f32.gmra.mrb[42].mxu1 %v1135_v9  ;;  %v307_v9 = vld [vmem:[%s4389_s26 + $0x278] sm:$0xff] }
 0x1a9   : > { %2753 = vmatmul.mubr.f32.gmra.mrb[42].mxu0 %v1143_v39  ;;  %2017 = vmatprep.mubr.f32.mxu1 %v1154_v41  ;;  %v315_v39 = vld [vmem:[%s4389_s26 + $0x2b8] sm:$0xff]  ;;  %v832_v43 = vmul.f32 %v5924_v53, %v307_v9  ;;  %v1457_v9 = vld [vmem:[%s6499_s0 + $0x880] sm:$0xff] }
 0x1aa   : > { %2757 = vmatprep.mubr.f32.mxu0 %v1162_v14  ;;  %v1447_v41 = vld [vmem:[%s6499_s0 + $0x830] sm:$0xff]  ;;  %v821_v14 = vmul.f32 %v5941_v62, %v296_v37  ;;  %v840_v46 = vmul.f32 %v5930_v58, %v315_v39  ;;  %v3662_v37 = vpack.c.bf16 %v1456_v23, %v1455_v21  ;;  %v1458_v39 = vld [vmem:[%s6499_s0 + $0x888] sm:$0xff] }
 0x1ac   : > { %2018 = vmatmul.mubr.f32.gmra.mrb[44].mxu1 %v1153_v47  ;;  %v314_v47 = vld [vmem:[%s4389_s26 + $0x2b0] sm:$0xff] }
 0x1ad   : > { %2758 = vmatmul.mubr.f32.gmra.mrb[44].mxu0 %v1161_v49  ;;  %2022 = vmatprep.mubr.f32.mxu1 %v1172_v50  ;;  %v3650_v49 = vpack.c.bf16 %v1448_v42, %v1447_v41  ;;  %v333_v50 = vld [vmem:[%s4389_s26 + $0x348] sm:$0xff]  ;;  %v839_v57 = vmul.f32 %v5941_v62, %v314_v47  ;;  %v911_v42 = vmul.f32 %v5941_v62, %v386_v33 }
 0x1ae   : > { %2762 = vmatprep.mubr.f32.mxu0 %v1180_v54  ;;  %v1450_v54 = vld [vmem:[%s6499_s0 + $0x848] sm:$0xff]  ;;  %v3665_v47 = vpack.c.bf16 %v1458_v39, %v1457_v9  ;;  %v209_v39 = vld [vmem:[#allocation2 + $0x10] sm:$0x3] }
 0x1b0   : > { %2023 = vmatmul.mubr.f32.gmra.mrb[46].mxu1 %v1171_v59  ;;  %v324_v59 = vld [vmem:[%s4389_s26 + $0x300] sm:$0xff] }
 0x1b1   : > { %2763 = vmatmul.mubr.f32.gmra.mrb[46].mxu0 %v1179_v60  ;;  %2092 = vmatprep.mubr.f32.mxu1 %v760_v34  ;;  %v858_v60 = vmul.f32 %v5930_v58, %v333_v50  ;;  %v332_v34 = vld [vmem:[%s4389_s26 + $0x340] sm:$0xff]  ;;  %v849_v1 = vmul.f32 %v5935_v29, %v324_v59  ;;  %v422_v59 = vld [vmem:[%s4389_s26 + $0x610] sm:$0xff] }
 0x1b2   : > { %2832 = vmatprep.mubr.f32.mxu0 %v768_v63  ;;  %v3653_v63 = vpack.c.bf16 %v1450_v54, %v1449_v51  ;;  %v1460_v50 = vld [vmem:[%s6499_s0 + $0x898] sm:$0xff]  ;;  %v929_v54 = vmul.f32 %v5941_v62, %v404_v44  ;;  %v947_v40 = vmul.f32 %v5941_v62, %v422_v59 }
 0x1b3   : > { %v505_v44 = vld [vmem:[%s4389_s26 + $0x8a8] sm:$0xff]  ;;  %v512_v59 = vld [vmem:[%s4389_s26 + $0x8e0] sm:$0xff] }
 0x1b4   : > { %2093 = vmatmul.mubr.f32.vlgmr.msra.gmra.mrb[0].mxu1 %v759_v28  ;;  %v857_v28 = vmul.f32 %v5941_v62, %v332_v34 }
 0x1b5   : > { %2833 = vmatmul.mubr.f32.vlgmr.msra.gmra.mrb[0].mxu0 %v767_v3  ;;  %3704 = vmatpush1.bf16.msra.mxu1 %v3641_v4  ;;  %v342_v3 = vld [vmem:[%s4389_s26 + $0x390] sm:$0xff] }
 0x1b6   : > { %3642 = vmatpush1.bf16.msra.mxu0 %v3641_v4  ;;  %2097 = vmatprep.mubr.f32.mxu1 %v778_v7  ;;  %v876_v4 = vmul.f32 %v5930_v58, %v351_v5  ;;  %v361_v7 = vld [vmem:[%s4389_s26 + $0x428] sm:$0xff]  ;;  %v867_v36 = vmul.f32 %v5935_v29, %v342_v3  ;;  %v1462_v5 = vld [vmem:[%s6499_s0 + $0x8a8] sm:$0xff]  ;;  %v440_v3 = vld [vmem:[%s4389_s26 + $0x6a0] sm:$0xff] }
 0x1b7   : > { %2837 = vmatprep.mubr.f32.mxu0 %v786_v11  ;;  %3643 = vmatprep.subr.bf16.mxu0 %v4239_v0  ;;  %v1453_v11 = vld [vmem:[%s6499_s0 + $0x860] sm:$0xff] }
 0x1b8   : > { %2098 = vmatmul.mubr.f32.gmra.mrb[2].mxu1 %v777_v16  ;;  %3689 = vmatprep.subr.bf16.mxu1 %v4239_v0  ;;  %v886_v16 = vmul.f32 %v5924_v53, %v361_v7  ;;  %v459_v7 = vld [vmem:[%s4389_s26 + $0x738] sm:$0xff] }
 0x1b9   : > { %2838 = vmatmul.mubr.f32.gmra.mrb[2].mxu0 %v785_v17  ;;  %2102 = vmatprep.mubr.f32.mxu1 %v796_v52  ;;  %v360_v17 = vld [vmem:[%s4389_s26 + $0x420] sm:$0xff]  ;;  %v894_v52 = vmul.f32 %v5930_v58, %v369_v10 }
 0x1ba   : > { %2842 = vmatprep.mubr.f32.mxu0 %v804_v18  ;;  %3645 = vmatpush1.bf16.msra.mxu0 %v3644_v19  ;;  %v379_v18 = vld [vmem:[%s4389_s26 + $0x4b8] sm:$0xff]  ;;  %v885_v24 = vmul.f32 %v5935_v29, %v360_v17  ;;  %v1464_v10 = vld [vmem:[%s6499_s0 + $0x8b8] sm:$0xff]  ;;  %v458_v17 = vld [vmem:[%s4389_s26 + $0x730] sm:$0xff] }
 0x1bb   : > { %3705 = vmatpush1.bf16.msra.mxu1 %v3644_v19  ;;  %3646 = vmatprep.subr.bf16.mxu0 %v4239_v0  ;;  %v3659_v19 = vpack.c.bf16 %v1454_v12, %v1453_v11  ;;  %v965_v12 = vmul.f32 %v5941_v62, %v440_v3  ;;  %v983_v23 = vmul.f32 %v5941_v62, %v458_v17  ;;  %v530_v3 = vld [vmem:[%s4389_s26 + $0x970] sm:$0xff]  ;;  %v567_v17 = vld [vmem:[%s4389_s26 + $0xa98] sm:$0xff] }
 0x1bc   : > { %2103 = vmatmul.mubr.f32.gmra.mrb[4].mxu1 %v795_v27  ;;  %3690 = vmatprep.subr.bf16.mxu1 %v4239_v0  ;;  %v904_v27 = vmul.f32 %v5924_v53, %v379_v18  ;;  %v477_v18 = vld [vmem:[%s4389_s26 + $0x7c8] sm:$0xff] }
 0x1bd   : > { %2843 = vmatmul.mubr.f32.gmra.mrb[4].mxu0 %v803_v30  ;;  %2107 = vmatprep.mubr.f32.mxu1 %v814_v31  ;;  %v378_v30 = vld [vmem:[%s4389_s26 + $0x4b0] sm:$0xff]  ;;  %v912_v31 = vmul.f32 %v5930_v58, %v387_v20 }
 0x1be   : > { %2847 = vmatprep.mubr.f32.mxu0 %v822_v35  ;;  %3648 = vmatpush1.bf16.msra.mxu0 %v3647_v38  ;;  %v397_v35 = vld [vmem:[%s4389_s26 + $0x548] sm:$0xff]  ;;  %v903_v41 = vmul.f32 %v5935_v29, %v378_v30  ;;  %v1466_v20 = vld [vmem:[%s6499_s0 + $0x8c8] sm:$0xff]  ;;  %v476_v30 = vld [vmem:[%s4389_s26 + $0x7c0] sm:$0xff] }
 0x1bf   : > { %3706 = vmatpush1.bf16.msra.mxu1 %v3647_v38  ;;  %3649 = vmatprep.subr.bf16.mxu0 %v4239_v0  ;;  %v405_v38 = vld [vmem:[%s4389_s26 + $0x588] sm:$0xff] }
 0x1c0   : > { %2108 = vmatmul.mubr.f32.gmra.mrb[6].mxu1 %v813_v32  ;;  %3691 = vmatprep.subr.bf16.mxu1 %v4239_v0  ;;  %v922_v32 = vmul.f32 %v5924_v53, %v397_v35  ;;  %v495_v35 = vld [vmem:[%s4389_s26 + $0x858] sm:$0xff] }
 0x1c1   : > { %2848 = vmatmul.mubr.f32.gmra.mrb[6].mxu0 %v821_v14  ;;  %2112 = vmatprep.mubr.f32.mxu1 %v832_v43  ;;  %v396_v14 = vld [vmem:[%s4389_s26 + $0x540] sm:$0xff]  ;;  %v930_v43 = vmul.f32 %v5930_v58, %v405_v38 }
 0x1c2   : > { %2852 = vmatprep.mubr.f32.mxu0 %v840_v46  ;;  %3651 = vmatpush1.bf16.msra.mxu0 %v3650_v49  ;;  %v415_v46 = vld [vmem:[%s4389_s26 + $0x5d8] sm:$0xff]  ;;  %v921_v51 = vmul.f32 %v5935_v29, %v396_v14  ;;  %v1468_v38 = vld [vmem:[%s6499_s0 + $0x8d8] sm:$0xff]  ;;  %v1020_v14 = vmul.f32 %v5930_v58, %v495_v35 }
 0x1c3   : > { %3707 = vmatpush1.bf16.msra.mxu1 %v3650_v49  ;;  %3652 = vmatprep.subr.bf16.mxu0 %v4239_v0  ;;  %v1459_v49 = vld [vmem:[%s6499_s0 + $0x890] sm:$0xff] }
 0x1c4   : > { %2113 = vmatmul.mubr.f32.gmra.mrb[8].mxu1 %v831_v56  ;;  %3692 = vmatprep.subr.bf16.mxu1 %v4239_v0  ;;  %v940_v56 = vmul.f32 %v5924_v53, %v415_v46  ;;  %v3668_v34 = vpack.c.bf16 %v1460_v50, %v1459_v49  ;;  %v1470_v49 = vld [vmem:[%s6499_s0 + $0x8e8] sm:$0xff]  ;;  %v3253_v50 = vmul.f32 -1.442695, %v209_v39 }
 0x1c5   : > { %2853 = vmatmul.mubr.f32.gmra.mrb[8].mxu0 %v839_v57  ;;  %2117 = vmatprep.mubr.f32.mxu1 %v850_v15  ;;  %v414_v57 = vld [vmem:[%s4389_s26 + $0x5d0] sm:$0xff]  ;;  %v948_v15 = vmul.f32 %v5930_v58, %v423_v48 }
 0x1c6   : > { %2857 = vmatprep.mubr.f32.mxu0 %v858_v60  ;;  %3654 = vmatpush1.bf16.msra.mxu0 %v3653_v63  ;;  %v433_v60 = vld [vmem:[%s4389_s26 + $0x668] sm:$0xff]  ;;  %v939_v25 = vmul.f32 %v5935_v29, %v414_v57  ;;  %v504_v57 = vld [vmem:[%s4389_s26 + $0x8a0] sm:$0xff]  ;;  %4133 = vpow2.f32 %v3253_v50 }
 0x1c7   : > { %3708 = vmatpush1.bf16.msra.mxu1 %v3653_v63  ;;  %3655 = vmatprep.subr.bf16.mxu0 %v4239_v0  ;;  %v1461_v63 = vld [vmem:[%s6499_s0 + $0x8a0] sm:$0xff]  ;;  %v612_v50 = vld [vmem:[%s4389_s26 + $0xc00] sm:$0xff] }
 0x1c8   : > { %2118 = vmatmul.mubr.f32.gmra.mrb[10].mxu1 %v849_v1  ;;  %3693 = vmatprep.subr.bf16.mxu1 %v4239_v0  ;;  %v958_v1 = vmul.f32 %v5924_v53, %v433_v60  ;;  %v3671_v6 = vpack.c.bf16 %v1462_v5, %v1461_v63  ;;  %v1469_v48 = vld [vmem:[%s6499_s0 + $0x8e0] sm:$0xff]  ;;  %v523_v60 = vld [vmem:[%s4389_s26 + $0x938] sm:$0xff]  ;;  %v1472_v5 = vld [vmem:[%s6499_s0 + $0x8f8] sm:$0xff] }
 0x1c9   : > { %2858 = vmatmul.mubr.f32.gmra.mrb[10].mxu0 %v857_v28  ;;  %2122 = vmatprep.mubr.f32.mxu1 %v868_v2  ;;  %v432_v28 = vld [vmem:[%s4389_s26 + $0x660] sm:$0xff]  ;;  %v966_v2 = vmul.f32 %v5930_v58, %v441_v61  ;;  %v531_v61 = vld [vmem:[%s4389_s26 + $0x978] sm:$0xff] }
 0x1ca   : > { %2862 = vmatprep.mubr.f32.mxu0 %v876_v4  ;;  %3657 = vmatpush1.bf16.msra.mxu0 %v3656_v8  ;;  %v451_v4 = vld [vmem:[%s4389_s26 + $0x6f8] sm:$0xff]  ;;  %v957_v11 = vmul.f32 %v5935_v29, %v432_v28  ;;  %v522_v28 = vld [vmem:[%s4389_s26 + $0x930] sm:$0xff] }
 0x1cb   : > { %3709 = vmatpush1.bf16.msra.mxu1 %v3656_v8  ;;  %3658 = vmatprep.subr.bf16.mxu0 %v4239_v0  ;;  %v1463_v8 = vld [vmem:[%s6499_s0 + $0x8b0] sm:$0xff] }
 0x1cc   : > { %2123 = vmatmul.mubr.f32.gmra.mrb[12].mxu1 %v867_v36  ;;  %3694 = vmatprep.subr.bf16.mxu1 %v4239_v0  ;;  %v976_v36 = vmul.f32 %v5924_v53, %v451_v4  ;;  %v3674_v55 = vpack.c.bf16 %v1464_v10, %v1463_v8  ;;  %v1471_v63 = vld [vmem:[%s6499_s0 + $0x8f0] sm:$0xff]  ;;  %v541_v4 = vld [vmem:[%s4389_s26 + $0x9c8] sm:$0xff]  ;;  %v1047_v8 = vmul.f32 %v5935_v29, %v522_v28 }
 0x1cd   : > { %2863 = vmatmul.mubr.f32.gmra.mrb[12].mxu0 %v875_v13  ;;  %2127 = vmatprep.mubr.f32.mxu1 %v886_v16  ;;  %v450_v13 = vld [vmem:[%s4389_s26 + $0x6f0] sm:$0xff]  ;;  %v984_v16 = vmul.f32 %v5930_v58, %v459_v7  ;;  %v549_v7 = vld [vmem:[%s4389_s26 + $0xa08] sm:$0xff]  ;;  %v1055_v10 = vmul.f32 %v5941_v62, %v530_v3  ;;  %v648_v3 = vld [vmem:[%s4389_s26 + $0xd20] sm:$0xff] }
 0x1ce   : > { %2867 = vmatprep.mubr.f32.mxu0 %v894_v52  ;;  %3660 = vmatpush1.bf16.msra.mxu0 %v3659_v19  ;;  %v469_v52 = vld [vmem:[%s4389_s26 + $0x788] sm:$0xff]  ;;  %v975_v21 = vmul.f32 %v5935_v29, %v450_v13  ;;  %v548_v13 = vld [vmem:[%s4389_s26 + $0xa00] sm:$0xff] }
 0x1cf   : > { %3710 = vmatpush1.bf16.msra.mxu1 %v3659_v19  ;;  %3661 = vmatprep.subr.bf16.mxu0 %v4239_v0  ;;  %v1465_v19 = vld [vmem:[%s6499_s0 + $0x8c0] sm:$0xff] }
 0x1d0   : > { %2128 = vmatmul.mubr.f32.gmra.mrb[14].mxu1 %v885_v24  ;;  %3695 = vmatprep.subr.bf16.mxu1 %v4239_v0  ;;  %v994_v24 = vmul.f32 %v5924_v53, %v469_v52  ;;  %v3677_v33 = vpack.c.bf16 %v1466_v20, %v1465_v19  ;;  %v4134_v52 = vpop.eup %4133  ;;  %v558_v19 = vld [vmem:[%s4389_s26 + $0xa50] sm:$0xff]  ;;  %v1092_v20 = vmul.f32 %v5930_v58, %v567_v17 }
 0x1d1   : > { %2868 = vmatmul.mubr.f32.gmra.mrb[14].mxu0 %v893_v26  ;;  %2132 = vmatprep.mubr.f32.mxu1 %v904_v27  ;;  %v468_v26 = vld [vmem:[%s4389_s26 + $0x780] sm:$0xff]  ;;  %v1002_v27 = vmul.f32 %v5930_v58, %v477_v18 }
 0x1d2   : > { %2872 = vmatprep.mubr.f32.mxu0 %v912_v31  ;;  %3663 = vmatpush1.bf16.msra.mxu0 %v3662_v37  ;;  %v487_v31 = vld [vmem:[%s4389_s26 + $0x818] sm:$0xff]  ;;  %v993_v9 = vmul.f32 %v5935_v29, %v468_v26  ;;  %v1083_v26 = vmul.f32 %v5935_v29, %v558_v19  ;;  %v281_v19 = vld [vmem:[%s4389_s26 + $0x1a8] sm:$0xff] }
 0x1d3   : > { %3711 = vmatpush1.bf16.msra.mxu1 %v3662_v37  ;;  %3664 = vmatprep.subr.bf16.mxu0 %v4239_v0  ;;  %v1467_v37 = vld [vmem:[%s6499_s0 + $0x8d0] sm:$0xff] }
 0x1d4   : > { %2133 = vmatmul.mubr.f32.gmra.mrb[16].mxu1 %v903_v41  ;;  %3696 = vmatprep.subr.bf16.mxu1 %v4239_v0  ;;  %v1001_v41 = vmul.f32 %v5941_v62, %v476_v30  ;;  %v3680_v46 = vpack.c.bf16 %v1468_v38, %v1467_v37  ;;  %v584_v37 = vld [vmem:[%s4389_s26 + $0xb20] sm:$0xff]  ;;  %v595_v38 = vld [vmem:[%s4389_s26 + $0xb78] sm:$0xff] }
 0x1d5   : > { %2873 = vmatmul.mubr.f32.gmra.mrb[16].mxu0 %v911_v42  ;;  %2137 = vmatprep.mubr.f32.mxu1 %v922_v32  ;;  %v1012_v42 = vmul.f32 %v5924_v53, %v487_v31  ;;  %v486_v32 = vld [vmem:[%s4389_s26 + $0x810] sm:$0xff] }
 0x1d6   : > { %2877 = vmatprep.mubr.f32.mxu0 %v930_v43  ;;  %3666 = vmatpush1.bf16.msra.mxu0 %v3665_v47  ;;  %v494_v43 = vld [vmem:[%s4389_s26 + $0x850] sm:$0xff] }
 0x1d7   : > { %3712 = vmatpush1.bf16.msra.mxu1 %v3665_v47  ;;  %3667 = vmatprep.subr.bf16.mxu0 %v4239_v0  ;;  %v513_v47 = vld [vmem:[%s4389_s26 + $0x8e8] sm:$0xff] }
 0x1d8   : > { %2138 = vmatmul.mubr.f32.gmra.mrb[18].mxu1 %v921_v51  ;;  %3697 = vmatprep.subr.bf16.mxu1 %v4239_v0  ;;  %v1011_v51 = vmul.f32 %v5935_v29, %v486_v32  ;;  %v594_v32 = vld [vmem:[%s4389_s26 + $0xb70] sm:$0xff] }
 0x1d9   : > { %2878 = vmatmul.mubr.f32.gmra.mrb[18].mxu0 %v929_v54  ;;  %2142 = vmatprep.mubr.f32.mxu1 %v940_v56  ;;  %v1019_v54 = vmul.f32 %v5941_v62, %v494_v43  ;;  %v1030_v56 = vmul.f32 %v5924_v53, %v505_v44  ;;  %v602_v43 = vld [vmem:[%s4389_s26 + $0xbb0] sm:$0xff]  ;;  %v613_v44 = vld [vmem:[%s4389_s26 + $0xc08] sm:$0xff] }
 0x1da   : > { %2882 = vmatprep.mubr.f32.mxu0 %v948_v15  ;;  %3669 = vmatpush1.bf16.msra.mxu0 %v3668_v34  ;;  %v1038_v15 = vmul.f32 %v5930_v58, %v513_v47  ;;  %v1119_v47 = vmul.f32 %v5935_v29, %v594_v32 }
 0x1db   : > { %3713 = vmatpush1.bf16.msra.mxu1 %v3668_v34  ;;  %3670 = vmatprep.subr.bf16.mxu0 %v4239_v0  ;;  %v3683_v34 = vpack.c.bf16 %v1470_v49, %v1469_v48  ;;  %v1127_v48 = vmul.f32 %v5941_v62, %v602_v43  ;;  %v1138_v49 = vmul.f32 %v5924_v53, %v613_v44  ;;  %v532_v44 = vld [vmem:[%s4389_s26 + $0x980] sm:$0xff] }
 0x1dc   : > { %2143 = vmatmul.mubr.f32.gmra.mrb[20].mxu1 %v939_v25  ;;  %3698 = vmatprep.subr.bf16.mxu1 %v4239_v0  ;;  %v1029_v25 = vmul.f32 %v5935_v29, %v504_v57  ;;  %v639_v57 = vld [vmem:[%s4389_s26 + $0xcd8] sm:$0xff] }
 0x1dd   : > { %2883 = vmatmul.mubr.f32.gmra.mrb[20].mxu0 %v947_v40  ;;  %2147 = vmatprep.mubr.f32.mxu1 %v958_v1  ;;  %v1037_v40 = vmul.f32 %v5941_v62, %v512_v59  ;;  %v1048_v1 = vmul.f32 %v5924_v53, %v523_v60 }
 0x1de   : > { %2887 = vmatprep.mubr.f32.mxu0 %v966_v2  ;;  %3672 = vmatpush1.bf16.msra.mxu0 %v3671_v6  ;;  %v1056_v2 = vmul.f32 %v5930_v58, %v531_v61 }
 0x1df   : > { %3714 = vmatpush1.bf16.msra.mxu1 %v3671_v6  ;;  %3673 = vmatprep.subr.bf16.mxu0 %v4239_v0  ;;  %v3686_v6 = vpack.c.bf16 %v1472_v5, %v1471_v63  ;;  %v1164_v63 = vmul.f32 %v5930_v58, %v639_v57  ;;  %v638_v5 = vld [vmem:[%s4389_s26 + $0xcd0] sm:$0xff] }
 0x1e0   : > { %2148 = vmatmul.mubr.f32.gmra.mrb[22].mxu1 %v957_v11  ;;  %3699 = vmatprep.subr.bf16.mxu1 %v4239_v0  ;;  %v1066_v11 = vmul.f32 %v5924_v53, %v541_v4  ;;  %v1163_v28 = vmul.f32 %v5941_v62, %v638_v5  ;;  %v568_v5 = vld [vmem:[%s4389_s26 + $0xaa0] sm:$0xff] }
 0x1e1   : > { %2888 = vmatmul.mubr.f32.gmra.mrb[22].mxu0 %v965_v12  ;;  %2152 = vmatprep.mubr.f32.mxu1 %v976_v36  ;;  %v540_v12 = vld [vmem:[%s4389_s26 + $0x9c0] sm:$0xff]  ;;  %v1074_v36 = vmul.f32 %v5930_v58, %v549_v7 }
 0x1e2   : > { %2892 = vmatprep.mubr.f32.mxu0 %v984_v16  ;;  %3675 = vmatpush1.bf16.msra.mxu0 %v3674_v55  ;;  %v559_v16 = vld [vmem:[%s4389_s26 + $0xa58] sm:$0xff]  ;;  %v656_v7 = vld [vmem:[%s4389_s26 + $0xd60] sm:$0xff] }
 0x1e3   : > { %3715 = vmatpush1.bf16.msra.mxu1 %v3674_v55  ;;  %3676 = vmatprep.subr.bf16.mxu0 %v4239_v0  ;;  %v1073_v55 = vmul.f32 %v5941_v62, %v548_v13  ;;  %v1084_v18 = vmul.f32 %v5924_v53, %v559_v16  ;;  %v244_v13 = vld [vmem:[%s4389_s26 + $0x80] sm:$0xff]  ;;  %v479_v16 = vld [vmem:[%s4389_s26 + $0x7d8] sm:$0xff] }
 0x1e4   : > { %2153 = vmatmul.mubr.f32.gmra.mrb[24].mxu1 %v975_v21  ;;  %3700 = vmatprep.subr.bf16.mxu1 %v4239_v0  ;;  %v566_v21 = vld [vmem:[%s4389_s26 + $0xa90] sm:$0xff] }
 0x1e5   : > { %2893 = vmatmul.mubr.f32.gmra.mrb[24].mxu0 %v983_v23  ;;  %2157 = vmatprep.mubr.f32.mxu1 %v994_v24  ;;  %v577_v23 = vld [vmem:[%s4389_s26 + $0xae8] sm:$0xff]  ;;  %v1091_v30 = vmul.f32 %v5941_v62, %v566_v21 }
 0x1e6   : > { %2897 = vmatprep.mubr.f32.mxu0 %v1002_v27  ;;  %3678 = vmatpush1.bf16.msra.mxu0 %v3677_v33  ;;  %v585_v24 = vld [vmem:[%s4389_s26 + $0xb28] sm:$0xff]  ;;  %v221_v27 = vadd.f32 1.0, %v4134_v52  ;;  %v1102_v31 = vmul.f32 %v5924_v53, %v577_v23 }
 0x1e7   : > { %3716 = vmatpush1.bf16.msra.mxu1 %v3677_v33  ;;  %3679 = vmatprep.subr.bf16.mxu0 %v4239_v0  ;;  %v576_v33 = vld [vmem:[%s4389_s26 + $0xae0] sm:$0xff]  ;;  %v1110_v35 = vmul.f32 %v5930_v58, %v585_v24 }
 0x1e8   : > { %2158 = vmatmul.mubr.f32.gmra.mrb[26].mxu1 %v993_v9  ;;  %3701 = vmatprep.subr.bf16.mxu1 %v4239_v0  ;;  %v603_v9 = vld [vmem:[%s4389_s26 + $0xbb8] sm:$0xff]  ;;  %v1101_v39 = vmul.f32 %v5935_v29, %v576_v33  ;;  %4135 = vrcp.f32 %v221_v27  ;;  %v496_v24 = vld [vmem:[%s4389_s26 + $0x860] sm:$0xff] }
 0x1e9   : > { %2898 = vmatmul.mubr.f32.gmra.mrb[26].mxu0 %v1001_v41  ;;  %2162 = vmatprep.mubr.f32.mxu1 %v1012_v42  ;;  %v1109_v41 = vmul.f32 %v5941_v62, %v584_v37  ;;  %v1120_v42 = vmul.f32 %v5924_v53, %v595_v38  ;;  %v280_v27 = vld [vmem:[%s4389_s26 + $0x1a0] sm:$0xff]  ;;  %v514_v38 = vld [vmem:[%s4389_s26 + $0x8f0] sm:$0xff] }
 0x1ea   : > { %2902 = vmatprep.mubr.f32.mxu0 %v1020_v14  ;;  %3681 = vmatpush1.bf16.msra.mxu0 %v3680_v46  ;;  %v1128_v14 = vmul.f32 %v5930_v58, %v603_v9 }
 0x1eb   : > { %3717 = vmatpush1.bf16.msra.mxu1 %v3680_v46  ;;  %3682 = vmatprep.subr.bf16.mxu0 %v4239_v0  ;;  %v621_v46 = vld [vmem:[%s4389_s26 + $0xc48] sm:$0xff] }
 0x1ec   : > { %2163 = vmatmul.mubr.f32.gmra.mrb[28].mxu1 %v1011_v51  ;;  %3702 = vmatprep.subr.bf16.mxu1 %v4239_v0  ;;  %v1146_v51 = vmul.f32 %v5930_v58, %v621_v46 }
 0x1ed   : > { %2903 = vmatmul.mubr.f32.gmra.mrb[28].mxu0 %v1019_v54  ;;  %2167 = vmatprep.mubr.f32.mxu1 %v1030_v56  ;;  %v620_v54 = vld [vmem:[%s4389_s26 + $0xc40] sm:$0xff]  ;;  %v631_v56 = vld [vmem:[%s4389_s26 + $0xc98] sm:$0xff] }
 0x1ee   : > { %2907 = vmatprep.mubr.f32.mxu0 %v1038_v15  ;;  %3684 = vmatpush1.bf16.msra.mxu0 %v3683_v34  ;;  %v1137_v15 = vmul.f32 %v5935_v29, %v612_v50  ;;  %v1145_v59 = vmul.f32 %v5941_v62, %v620_v54  ;;  %v1156_v60 = vmul.f32 %v5924_v53, %v631_v56  ;;  %v550_v56 = vld [vmem:[%s4389_s26 + $0xa10] sm:$0xff] }
 0x1ef   : > { %3718 = vmatpush1.bf16.msra.mxu1 %v3683_v34  ;;  %3685 = vmatprep.subr.bf16.mxu0 %v4239_v0  ;;  %v630_v34 = vld [vmem:[%s4389_s26 + $0xc90] sm:$0xff] }
 0x1f0   : > { %2168 = vmatmul.mubr.f32.gmra.mrb[30].mxu1 %v1029_v25  ;;  %3703 = vmatprep.subr.bf16.mxu1 %v4239_v0  ;;  %v1065_v0 = vmul.f32 %v5935_v29, %v540_v12  ;;  %v649_v25 = vld [vmem:[%s4389_s26 + $0xd28] sm:$0xff] }
 0x1f1   : > { %2908 = vmatmul.mubr.f32.gmra.mrb[30].mxu0 %v1037_v40  ;;  %2172 = vmatprep.mubr.f32.mxu1 %v1048_v1  ;;  %v657_v40 = vld [vmem:[%s4389_s26 + $0xd68] sm:$0xff]  ;;  %v1155_v1 = vmul.f32 %v5935_v29, %v630_v34 }
 0x1f2   : > { %2912 = vmatprep.mubr.f32.mxu0 %v1056_v2  ;;  %3687 = vmatpush1.bf16.msra.mxu0 %v3686_v6  ;;  %v4136_v61 = vpop.eup %4135  ;;  %v1174_v2 = vmul.f32 %v5924_v53, %v649_v25 }
 0x1f3   : > { %3719 = vmatpush1.bf16.msra.mxu1 %v3686_v6  ;;  %v6254_v4 = vrot.slane %v4136_v61, %v4571_v22  ;;  %v1182_v6 = vmul.f32 %v5930_v58, %v657_v40  ;;  %v6262_v12 = vrot.slane %v4136_v61, %v4625_v45  ;;  %v1181_v22 = vmul.f32 %v5941_v62, %v656_v7  ;;  %v352_v40 = vld [vmem:[%s4389_s26 + $0x3e0] sm:$0xff]  ;;  %v586_v7 = vld [vmem:[%s4389_s26 + $0xb30] sm:$0xff] }
 0x1f4   : > { %2173 = vmatmul.mubr.f32.gmra.mrb[32].mxu1 %v1047_v8  ;;  %v461_v8 = vld [vmem:[%s4389_s26 + $0x748] sm:$0xff] }
 0x1f5   : > { %2913 = vmatmul.mubr.f32.gmra.mrb[32].mxu0 %v1055_v10  ;;  %2177 = vmatprep.mubr.f32.mxu1 %v1066_v11  ;;  %v245_v10 = vld [vmem:[%s4389_s26 + $0x88] sm:$0xff]  ;;  %v1173_v11 = vmul.f32 %v5935_v29, %v648_v3  ;;  %v986_v53 = vmul.f32 %v6254_v4, %v461_v8  ;;  %v263_v29 = vld [vmem:[%s4389_s26 + $0x118] sm:$0xff]  ;;  %v769_v62 = vmul.f32 %v6262_v12, %v244_v13  ;;  %v604_v13 = vld [vmem:[%s4389_s26 + $0xbc0] sm:$0xff] }
 0x1f6   : > { %2917 = vmatprep.mubr.f32.mxu0 %v1074_v36  ;;  %v460_v36 = vld [vmem:[%s4389_s26 + $0x740] sm:$0xff]  ;;  %v770_v58 = vmul.f32 %v6254_v4, %v245_v10  ;;  %v1004_v17 = vmul.f32 %v6254_v4, %v479_v16  ;;  %v788_v52 = vmul.f32 %v6254_v4, %v263_v29  ;;  %v1021_v33 = vmul.f32 %v6262_v12, %v496_v24  ;;  %v370_v10 = vld [vmem:[%s4389_s26 + $0x470] sm:$0xff] }
 0x1f7   : > { %v985_v45 = vmul.f32 %v6262_v12, %v460_v36  ;;  %v1039_v32 = vmul.f32 %v6262_v12, %v514_v38  ;;  %v1057_v50 = vmul.f32 %v6262_v12, %v532_v44  ;;  %v1075_v34 = vmul.f32 %v6262_v12, %v550_v56  ;;  %v388_v29 = vld [vmem:[%s4389_s26 + $0x500] sm:$0xff] }
 0x1f8   : > { %2178 = vmatmul.mubr.f32.gmra.mrb[34].mxu1 %v1065_v0  ;;  %v478_v0 = vld [vmem:[%s4389_s26 + $0x7d0] sm:$0xff]  ;;  %v877_v3 = vmul.f32 %v6262_v12, %v352_v40  ;;  %v895_v36 = vmul.f32 %v6262_v12, %v370_v10 }
 0x1f9   : > { %2918 = vmatmul.mubr.f32.gmra.mrb[34].mxu0 %v1073_v55  ;;  %2182 = vmatprep.mubr.f32.mxu1 %v1084_v18  ;;  %v262_v55 = vld [vmem:[%s4389_s26 + $0x110] sm:$0xff]  ;;  %v497_v18 = vld [vmem:[%s4389_s26 + $0x868] sm:$0xff] }
 0x1fa   : > { %2922 = vmatprep.mubr.f32.mxu0 %v1092_v20  ;;  %v1003_v20 = vmul.f32 %v6262_v12, %v478_v0  ;;  %v787_v21 = vmul.f32 %v6262_v12, %v262_v55  ;;  %v1022_v23 = vmul.f32 %v6254_v4, %v497_v18  ;;  %v913_v0 = vmul.f32 %v6262_v12, %v388_v29  ;;  %v622_v55 = vld [vmem:[%s4389_s26 + $0xc50] sm:$0xff] }
 0x1fc   : > { %2183 = vmatmul.mubr.f32.gmra.mrb[36].mxu1 %v1083_v26  ;;  %v806_v26 = vmul.f32 %v6254_v4, %v281_v19  ;;  %v406_v19 = vld [vmem:[%s4389_s26 + $0x590] sm:$0xff] }
 0x1fd   : > { %2923 = vmatmul.mubr.f32.gmra.mrb[36].mxu0 %v1091_v30  ;;  %2187 = vmatprep.mubr.f32.mxu1 %v1102_v31  ;;  %v515_v30 = vld [vmem:[%s4389_s26 + $0x8f8] sm:$0xff]  ;;  %v931_v24 = vmul.f32 %v6262_v12, %v406_v19 }
 0x1fe   : > { %2927 = vmatprep.mubr.f32.mxu0 %v1110_v35  ;;  %v299_v31 = vld [vmem:[%s4389_s26 + $0x238] sm:$0xff]  ;;  %v805_v35 = vmul.f32 %v6262_v12, %v280_v27  ;;  %v1040_v37 = vmul.f32 %v6254_v4, %v515_v30  ;;  %v640_v27 = vld [vmem:[%s4389_s26 + $0xce0] sm:$0xff] }
 0x1ff   : > { %v824_v9 = vmul.f32 %v6254_v4, %v299_v31  ;;  %v424_v31 = vld [vmem:[%s4389_s26 + $0x620] sm:$0xff] }
 0x200   : > { %2188 = vmatmul.mubr.f32.gmra.mrb[38].mxu1 %v1101_v39  ;;  %v298_v39 = vld [vmem:[%s4389_s26 + $0x230] sm:$0xff]  ;;  %v949_v38 = vmul.f32 %v6262_v12, %v424_v31 }
 0x201   : > { %2928 = vmatmul.mubr.f32.gmra.mrb[38].mxu0 %v1109_v41  ;;  %2192 = vmatprep.mubr.f32.mxu1 %v1120_v42  ;;  %v533_v41 = vld [vmem:[%s4389_s26 + $0x988] sm:$0xff] }
 0x202   : > { %2932 = vmatprep.mubr.f32.mxu0 %v1128_v14  ;;  %v317_v42 = vld [vmem:[%s4389_s26 + $0x2c8] sm:$0xff]  ;;  %v823_v14 = vmul.f32 %v6262_v12, %v298_v39  ;;  %v1058_v43 = vmul.f32 %v6254_v4, %v533_v41  ;;  %v658_v39 = vld [vmem:[%s4389_s26 + $0xd70] sm:$0xff] }
 0x203   : > { %v842_v46 = vmul.f32 %v6254_v4, %v317_v42  ;;  %v442_v42 = vld [vmem:[%s4389_s26 + $0x6b0] sm:$0xff] }
 0x204   : > { %2193 = vmatmul.mubr.f32.gmra.mrb[40].mxu1 %v1119_v47  ;;  %v316_v47 = vld [vmem:[%s4389_s26 + $0x2c0] sm:$0xff] }
 0x205   : > { %2933 = vmatmul.mubr.f32.gmra.mrb[40].mxu0 %v1127_v48  ;;  %2197 = vmatprep.mubr.f32.mxu1 %v1138_v49  ;;  %v551_v48 = vld [vmem:[%s4389_s26 + $0xa18] sm:$0xff] }
 0x206   : > { %2937 = vmatprep.mubr.f32.mxu0 %v1146_v51  ;;  %v335_v49 = vld [vmem:[%s4389_s26 + $0x358] sm:$0xff]  ;;  %v841_v51 = vmul.f32 %v6262_v12, %v316_v47  ;;  %v1076_v54 = vmul.f32 %v6254_v4, %v551_v48 }
 0x207   : > { %v860_v57 = vmul.f32 %v6254_v4, %v335_v49 }
 0x208   : > { %2198 = vmatmul.mubr.f32.gmra.mrb[42].mxu1 %v1137_v15  ;;  %v334_v15 = vld [vmem:[%s4389_s26 + $0x350] sm:$0xff] }
 0x209   : > { %2938 = vmatmul.mubr.f32.gmra.mrb[42].mxu0 %v1145_v59  ;;  %2202 = vmatprep.mubr.f32.mxu1 %v1156_v60  ;;  %v569_v59 = vld [vmem:[%s4389_s26 + $0xaa8] sm:$0xff]  ;;  %v859_v61 = vmul.f32 %v6262_v12, %v334_v15 }
 0x20a   : > { %2942 = vmatprep.mubr.f32.mxu0 %v1164_v63  ;;  %v353_v60 = vld [vmem:[%s4389_s26 + $0x3e8] sm:$0xff]  ;;  %v1094_v63 = vmul.f32 %v6254_v4, %v569_v59 }
 0x20b   : > { %v878_v25 = vmul.f32 %v6254_v4, %v353_v60 }
 0x20c   : > { %2203 = vmatmul.mubr.f32.gmra.mrb[44].mxu1 %v1155_v1  ;;  %v587_v1 = vld [vmem:[%s4389_s26 + $0xb38] sm:$0xff] }
 0x20d   : > { %2943 = vmatmul.mubr.f32.gmra.mrb[44].mxu0 %v1163_v28  ;;  %2207 = vmatprep.mubr.f32.mxu1 %v1174_v2  ;;  %v371_v28 = vld [vmem:[%s4389_s26 + $0x478] sm:$0xff]  ;;  %v1093_v2 = vmul.f32 %v6262_v12, %v568_v5 }
 0x20e   : > { %2947 = vmatprep.mubr.f32.mxu0 %v1182_v6  ;;  %v1112_v6 = vmul.f32 %v6254_v4, %v587_v1  ;;  %v896_v8 = vmul.f32 %v6254_v4, %v371_v28 }
 0x210   : > { %2208 = vmatmul.mubr.f32.gmra.mrb[46].mxu1 %v1173_v11  ;;  %v605_v11 = vld [vmem:[%s4389_s26 + $0xbc8] sm:$0xff] }
 0x211   : > { %2948 = vmatmul.mubr.f32.gmra.mrb[46].mxu0 %v1181_v22  ;;  %3077 = vmatprep.mubr.f32.mxu1 %v986_v53  ;;  %v389_v22 = vld [vmem:[%s4389_s26 + $0x508] sm:$0xff]  ;;  %v1111_v53 = vmul.f32 %v6262_v12, %v586_v7 }
 0x212   : > { %3017 = vmatprep.mubr.f32.mxu0 %v770_v58  ;;  %v1130_v58 = vmul.f32 %v6254_v4, %v605_v11  ;;  %v914_v16 = vmul.f32 %v6254_v4, %v389_v22 }
 0x214   : > { %3078 = vmatmul.mubr.f32.vlgmr.msra.gmra.mrb[48].mxu1 %v985_v45  ;;  %v623_v45 = vld [vmem:[%s4389_s26 + $0xc58] sm:$0xff] }
 0x215   : > { %3018 = vmatmul.mubr.f32.vlgmr.msra.gmra.mrb[0].mxu0 %v769_v62  ;;  %3082 = vmatprep.mubr.f32.mxu1 %v1004_v17  ;;  %v407_v62 = vld [vmem:[%s4389_s26 + $0x598] sm:$0xff]  ;;  %v1129_v17 = vmul.f32 %v6262_v12, %v604_v13 }
 0x216   : > { %3022 = vmatprep.mubr.f32.mxu0 %v788_v52  ;;  %v1148_v52 = vmul.f32 %v6254_v4, %v623_v45  ;;  %v932_v18 = vmul.f32 %v6254_v4, %v407_v62 }
 0x218   : > { %3083 = vmatmul.mubr.f32.gmra.mrb[50].mxu1 %v1003_v20  ;;  %v641_v20 = vld [vmem:[%s4389_s26 + $0xce8] sm:$0xff] }
 0x219   : > { %3023 = vmatmul.mubr.f32.gmra.mrb[2].mxu0 %v787_v21  ;;  %3087 = vmatprep.mubr.f32.mxu1 %v1022_v23  ;;  %v425_v21 = vld [vmem:[%s4389_s26 + $0x628] sm:$0xff]  ;;  %v1147_v23 = vmul.f32 %v6262_v12, %v622_v55 }
 0x21a   : > { %3027 = vmatprep.mubr.f32.mxu0 %v806_v26  ;;  %v1166_v26 = vmul.f32 %v6254_v4, %v641_v20  ;;  %v950_v30 = vmul.f32 %v6254_v4, %v425_v21 }
 0x21c   : > { %3088 = vmatmul.mubr.f32.gmra.mrb[52].mxu1 %v1021_v33  ;;  %v659_v33 = vld [vmem:[%s4389_s26 + $0xd78] sm:$0xff] }
 0x21d   : > { %3028 = vmatmul.mubr.f32.gmra.mrb[4].mxu0 %v805_v35  ;;  %3092 = vmatprep.mubr.f32.mxu1 %v1040_v37  ;;  %v443_v35 = vld [vmem:[%s4389_s26 + $0x6b8] sm:$0xff]  ;;  %v1165_v37 = vmul.f32 %v6262_v12, %v640_v27  ;;  %s201_s26 = smul.u32 24, %s3242_s16 }
 0x21e   : > { %3032 = vmatprep.mubr.f32.mxu0 %v824_v9  ;;  %v1184_v9 = vmul.f32 %v6254_v4, %v659_v33  ;;  %v968_v41 = vmul.f32 %v6254_v4, %v443_v35 }
 0x21f   : > { %p202_p8 = scmp.lt.s32.totalorder %s201_s26, 47 }
 0x220   : > { %3093 = vmatmul.mubr.f32.gmra.mrb[54].mxu1 %v1039_v32  ;;  %v1183_v32 = vmul.f32 %v6262_v12, %v658_v39 }
 0x221   : > { %3033 = vmatmul.mubr.f32.gmra.mrb[6].mxu0 %v823_v14  ;;  %3097 = vmatprep.mubr.f32.mxu1 %v1058_v43  ;;  %v967_v14 = vmul.f32 %v6262_v12, %v442_v42  ;;  %s6523_s26 = smov (!%p202_p8, %s201_s26), 47 }
 0x222   : > { %3037 = vmatprep.mubr.f32.mxu0 %v842_v46  ;;  %s3250_s15 = sshll.u32 %s6523_s26, 3 }
 0x223   : > { %s6412_s4 = scalar_lea.vmem %s6502_s3, %s3250_s15 }
 0x224   : > { %3098 = vmatmul.mubr.f32.gmra.mrb[56].mxu1 %v1057_v50 }
 0x225   : > { %3038 = vmatmul.mubr.f32.gmra.mrb[8].mxu0 %v841_v51  ;;  %3102 = vmatprep.mubr.f32.mxu1 %v1076_v54 }
 0x226   : > { %3042 = vmatprep.mubr.f32.mxu0 %v860_v57 }
 0x228   : > { %3103 = vmatmul.mubr.f32.gmra.mrb[58].mxu1 %v1075_v34 }
 0x229   : > { %3043 = vmatmul.mubr.f32.gmra.mrb[10].mxu0 %v859_v61  ;;  %3107 = vmatprep.mubr.f32.mxu1 %v1094_v63 }
 0x22a   : > { %3047 = vmatprep.mubr.f32.mxu0 %v878_v25 }
 0x22c   : > { %3108 = vmatmul.mubr.f32.gmra.mrb[60].mxu1 %v1093_v2 }
 0x22d   : > { %3048 = vmatmul.mubr.f32.gmra.mrb[12].mxu0 %v877_v3  ;;  %3112 = vmatprep.mubr.f32.mxu1 %v1112_v6 }
 0x22e   : > { %3052 = vmatprep.mubr.f32.mxu0 %v896_v8 }
 0x230   : > { %3113 = vmatmul.mubr.f32.gmra.mrb[62].mxu1 %v1111_v53 }
 0x231   : > { %3053 = vmatmul.mubr.f32.gmra.mrb[14].mxu0 %v895_v36  ;;  %3117 = vmatprep.mubr.f32.mxu1 %v1130_v58 }
 0x232   : > { %3057 = vmatprep.mubr.f32.mxu0 %v914_v16 }
 0x234   : > { %3118 = vmatmul.mubr.f32.gmra.mrb[64].mxu1 %v1129_v17 }
 0x235   : > { %3058 = vmatmul.mubr.f32.gmra.mrb[16].mxu0 %v913_v0  ;;  %3122 = vmatprep.mubr.f32.mxu1 %v1148_v52 }
 0x236   : > { %3062 = vmatprep.mubr.f32.mxu0 %v932_v18 }
 0x238   : > { %3123 = vmatmul.mubr.f32.gmra.mrb[66].mxu1 %v1147_v23 }
 0x239   : > { %3063 = vmatmul.mubr.f32.gmra.mrb[18].mxu0 %v931_v24  ;;  %3127 = vmatprep.mubr.f32.mxu1 %v1166_v26 }
 0x23a   : > { %3067 = vmatprep.mubr.f32.mxu0 %v950_v30 }
 0x23c   : > { %3128 = vmatmul.mubr.f32.gmra.mrb[68].mxu1 %v1165_v37 }
 0x23d   : > { %3068 = vmatmul.mubr.f32.gmra.mrb[20].mxu0 %v949_v38  ;;  %3132 = vmatprep.mubr.f32.mxu1 %v1184_v9 }
 0x23e   : > { %3072 = vmatprep.mubr.f32.mxu0 %v968_v41 }
 0x240   : > { %3133 = vmatmul.mubr.f32.gmra.mrb[70].mxu1 %v1183_v32 }
 0x241   : > { %3073 = vmatmul.mubr.f32.gmra.mrb[22].mxu0 %v967_v14 }
 0x287   : > { %v6359_v43 = vpop.f32.mrb[0].mxu1 }
 0x288   : > { %v2096_v44 = vpop.f32.mrb[1].mxu1 }
 0x28b   : > { %v6361_v46 = vpop.f32.mrb[2].mxu1 }
 0x28c   : > { %v2101_v47 = vpop.f32.mrb[3].mxu1 }
 0x28f   : > { %v6363_v48 = vpop.f32.mrb[4].mxu1 }
 0x290   : > { %v2106_v4 = vpop.f32.mrb[5].mxu1 }
 0x293   : > { %v6365_v49 = vpop.f32.mrb[6].mxu1 }
 0x294   : > { %v2111_v50 = vpop.f32.mrb[7].mxu1 }
 0x297   : > { %v6367_v51 = vpop.f32.mrb[8].mxu1 }
 0x298   : > { %v2116_v54 = vpop.f32.mrb[9].mxu1 }
 0x29b   : > { %v6369_v56 = vpop.f32.mrb[10].mxu1 }
 0x29c   : > { %v2121_v12 = vpop.f32.mrb[11].mxu1 }
 0x29f   : > { %v6371_v57 = vpop.f32.mrb[12].mxu1 }
 0x2a0   : > { %v2126_v15 = vpop.f32.mrb[13].mxu1 }
 0x2a3   : > { %v6373_v59 = vpop.f32.mrb[14].mxu1 }
 0x2a4   : > { %v2131_v60 = vpop.f32.mrb[15].mxu1 }
 0x2a7   : > { %v6375_v34 = vpop.f32.mrb[16].mxu1 }
 0x2a8   : > { %v2136_v61 = vpop.f32.mrb[17].mxu1 }
 0x2ab   : > { %v6377_v63 = vpop.f32.mrb[18].mxu1 }
 0x2ac   : > { %v2141_v5 = vpop.f32.mrb[19].mxu1 }
 0x2af   : > { %v6379_v25 = vpop.f32.mrb[20].mxu1 }
 0x2b0   : > { %v2146_v40 = vpop.f32.mrb[21].mxu1 }
 0x2b3   : > { %v6381_v1 = vpop.f32.mrb[22].mxu1 }
 0x2b4   : > { %v2151_v28 = vpop.f32.mrb[23].mxu1 }
 0x2b7   : > { %v2154_v2 = vpop.f32.mrb[24].mxu1 }
 0x2b8   : > { %v2894_v3 = vpop.f32.mrb[24].mxu0  ;;  %v2156_v6 = vpop.f32.mrb[25].mxu1 }
 0x2b9   : > { %v6383_v7 = vadd.f32 %v2894_v3, %v2154_v2  ;;  %v2896_v8 = vpop.f32.mrb[25].mxu0 }
 0x2bb   : > { %v2159_v10 = vpop.f32.mrb[26].mxu1 }
 0x2bc   : > { %v2899_v11 = vpop.f32.mrb[26].mxu0  ;;  %v2161_v22 = vpop.f32.mrb[27].mxu1 }
 0x2bd   : > { %v6385_v53 = vadd.f32 %v2899_v11, %v2159_v10  ;;  %v2901_v36 = vpop.f32.mrb[27].mxu0 }
 0x2bf   : > { %v2164_v58 = vpop.f32.mrb[28].mxu1 }
 0x2c0   : > { %v2904_v13 = vpop.f32.mrb[28].mxu0  ;;  %v2166_v16 = vpop.f32.mrb[29].mxu1 }
 0x2c1   : > { %v6387_v29 = vadd.f32 %v2904_v13, %v2164_v58  ;;  %v2906_v45 = vpop.f32.mrb[29].mxu0 }
 0x2c3   : > { %v2169_v62 = vpop.f32.mrb[30].mxu1 }
 0x2c4   : > { %v2909_v17 = vpop.f32.mrb[30].mxu0  ;;  %v2171_v0 = vpop.f32.mrb[31].mxu1 }
 0x2c5   : > { %v6389_v52 = vadd.f32 %v2909_v17, %v2169_v62  ;;  %v2911_v55 = vpop.f32.mrb[31].mxu0 }
 0x2c7   : > { %v2174_v18 = vpop.f32.mrb[32].mxu1 }
 0x2c8   : > { %v2914_v19 = vpop.f32.mrb[32].mxu0  ;;  %v2176_v20 = vpop.f32.mrb[33].mxu1 }
 0x2c9   : > { %v6391_v21 = vadd.f32 %v2914_v19, %v2174_v18  ;;  %v2916_v23 = vpop.f32.mrb[33].mxu0 }
 0x2cb   : > { %v2179_v24 = vpop.f32.mrb[34].mxu1 }
 0x2cc   : > { %v2919_v26 = vpop.f32.mrb[34].mxu0  ;;  %v2181_v27 = vpop.f32.mrb[35].mxu1 }
 0x2cd   : > { %v6393_v30 = vadd.f32 %v2919_v26, %v2179_v24  ;;  %v2921_v31 = vpop.f32.mrb[35].mxu0 }
 0x2cf   : > { %v2184_v33 = vpop.f32.mrb[36].mxu1 }
 0x2d0   : > { %v2924_v35 = vpop.f32.mrb[36].mxu0  ;;  %v2186_v37 = vpop.f32.mrb[37].mxu1 }
 0x2d1   : > { %v6395_v38 = vadd.f32 %v2924_v35, %v2184_v33  ;;  %v2926_v9 = vpop.f32.mrb[37].mxu0 }
 0x2d3   : > { %v2189_v39 = vpop.f32.mrb[38].mxu1 }
 0x2d4   : > { %v2929_v41 = vpop.f32.mrb[38].mxu0  ;;  %v2191_v42 = vpop.f32.mrb[39].mxu1 }
 0x2d5   : > { %v6397_v32 = vadd.f32 %v2929_v41, %v2189_v39  ;;  %v2931_v14 = vpop.f32.mrb[39].mxu0 }
 0x2d7   : > { %v2194_v44 = vpop.f32.mrb[40].mxu1 }
 0x2d8   : > { %v2934_v47 = vpop.f32.mrb[40].mxu0  ;;  %v2196_v4 = vpop.f32.mrb[41].mxu1 }
 0x2d9   : > { %v6401_v50 = vadd.f32 %v2934_v47, %v2194_v44  ;;  %v2936_v54 = vpop.f32.mrb[41].mxu0 }
 0x2db   : > { %v2199_v12 = vpop.f32.mrb[42].mxu1 }
 0x2dc   : > { %v2939_v15 = vpop.f32.mrb[42].mxu0  ;;  %v2201_v60 = vpop.f32.mrb[43].mxu1 }
 0x2dd   : > { %v6403_v61 = vadd.f32 %v2939_v15, %v2199_v12  ;;  %v2941_v5 = vpop.f32.mrb[43].mxu0 }
 0x2df   : > { %v2204_v40 = vpop.f32.mrb[44].mxu1 }
 0x2e0   : > { %v2944_v28 = vpop.f32.mrb[44].mxu0  ;;  %v2206_v2 = vpop.f32.mrb[45].mxu1 }
 0x2e1   : > { %v6405_v3 = vadd.f32 %v2944_v28, %v2204_v40  ;;  %v2946_v6 = vpop.f32.mrb[45].mxu0 }
 0x2e3   : > { %v2209_v8 = vpop.f32.mrb[46].mxu1 }
 0x2e4   : > { %v2949_v10 = vpop.f32.mrb[46].mxu0  ;;  %v2211_v11 = vpop.f32.mrb[47].mxu1 }
 0x2e5   : > { %v6407_v22 = vadd.f32 %v2949_v10, %v2209_v8  ;;  %v2951_v36 = vpop.f32.mrb[47].mxu0 }
 0x2e7   : > { %v3079_v58 = vpop.f32.mrb[48].mxu1 }
 0x2e8   : > { %v3019_v13 = vpop.f32.mrb[0].mxu0  ;;  %v3733_v16 = vadd.f32 %v6383_v7, %v3079_v58  ;;  %v3081_v45 = vpop.f32.mrb[49].mxu1 }
 0x2e9   : > { %v3720_v62 = vadd.f32 %v3019_v13, %v6359_v43  ;;  %v3021_v17 = vpop.f32.mrb[1].mxu0 }
 0x2ea   : > { %3151 = vst.msk [vmem:[%s6412_s4 + $0x60] sm:$0xff] %vm3138_vm0, %v3733_v16 }
 0x2eb   : > { %3139 = vst.msk [vmem:[%s6412_s4] sm:$0xff] %vm3138_vm0, %v3720_v62  ;;  %v3084_v0 = vpop.f32.mrb[50].mxu1 }
 0x2ec   : > { %v3024_v55 = vpop.f32.mrb[2].mxu0  ;;  %v3735_v18 = vadd.f32 %v6385_v53, %v3084_v0  ;;  %v3086_v19 = vpop.f32.mrb[51].mxu1 }
 0x2ed   : > { %v3721_v20 = vadd.f32 %v3024_v55, %v6361_v46  ;;  %v3026_v23 = vpop.f32.mrb[3].mxu0 }
 0x2ee   : > { %3152 = vst.msk [vmem:[%s6412_s4 + $0x68] sm:$0xff] %vm3138_vm0, %v3735_v18 }
 0x2ef   : > { %3140 = vst.msk [vmem:[%s6412_s4 + $0x8] sm:$0xff] %vm3138_vm0, %v3721_v20  ;;  %v3089_v43 = vpop.f32.mrb[52].mxu1 }
 0x2f0   : > { %v3029_v7 = vpop.f32.mrb[4].mxu0  ;;  %v3737_v24 = vadd.f32 %v6387_v29, %v3089_v43  ;;  %v3091_v26 = vpop.f32.mrb[53].mxu1 }
 0x2f1   : > { %v3722_v27 = vadd.f32 %v3029_v7, %v6363_v48  ;;  %v3031_v31 = vpop.f32.mrb[5].mxu0 }
 0x2f2   : > { %3153 = vst.msk [vmem:[%s6412_s4 + $0x70] sm:$0xff] %vm3138_vm0, %v3737_v24 }
 0x2f3   : > { %3141 = vst.msk [vmem:[%s6412_s4 + $0x10] sm:$0xff] %vm3138_vm0, %v3722_v27  ;;  %v3094_v46 = vpop.f32.mrb[54].mxu1 }
 0x2f4   : > { %v3034_v53 = vpop.f32.mrb[6].mxu0  ;;  %v3739_v33 = vadd.f32 %v6389_v52, %v3094_v46  ;;  %v3096_v35 = vpop.f32.mrb[55].mxu1 }
 0x2f5   : > { %v3723_v37 = vadd.f32 %v3034_v53, %v6365_v49  ;;  %v3036_v9 = vpop.f32.mrb[7].mxu0 }
 0x2f6   : > { %3154 = vst.msk [vmem:[%s6412_s4 + $0x78] sm:$0xff] %vm3138_vm0, %v3739_v33 }
 0x2f7   : > { %3142 = vst.msk [vmem:[%s6412_s4 + $0x18] sm:$0xff] %vm3138_vm0, %v3723_v37  ;;  %v3099_v48 = vpop.f32.mrb[56].mxu1 }
 0x2f8   : > { %v3039_v29 = vpop.f32.mrb[8].mxu0  ;;  %v3741_v39 = vadd.f32 %v6391_v21, %v3099_v48  ;;  %v3101_v41 = vpop.f32.mrb[57].mxu1 }
 0x2f9   : > { %v3724_v42 = vadd.f32 %v3039_v29, %v6367_v51  ;;  %v3041_v14 = vpop.f32.mrb[9].mxu0 }
 0x2fa   : > { %3155 = vst.msk [vmem:[%s6412_s4 + $0x80] sm:$0xff] %vm3138_vm0, %v3741_v39 }
 0x2fb   : > { %3143 = vst.msk [vmem:[%s6412_s4 + $0x20] sm:$0xff] %vm3138_vm0, %v3724_v42  ;;  %v3104_v49 = vpop.f32.mrb[58].mxu1 }
 0x2fc   : > { %v3044_v52 = vpop.f32.mrb[10].mxu0  ;;  %v3743_v44 = vadd.f32 %v6393_v30, %v3104_v49  ;;  %v3106_v47 = vpop.f32.mrb[59].mxu1 }
 0x2fd   : > { %v3725_v4 = vadd.f32 %v3044_v52, %v6369_v56  ;;  %v3046_v54 = vpop.f32.mrb[11].mxu0 }
 0x2fe   : > { %3156 = vst.msk [vmem:[%s6412_s4 + $0x88] sm:$0xff] %vm3138_vm0, %v3743_v44 }
 0x2ff   : > { %3144 = vst.msk [vmem:[%s6412_s4 + $0x28] sm:$0xff] %vm3138_vm0, %v3725_v4  ;;  %v3109_v51 = vpop.f32.mrb[60].mxu1 }
 0x300   : > { %v3049_v21 = vpop.f32.mrb[12].mxu0  ;;  %v3745_v12 = vadd.f32 %v6395_v38, %v3109_v51  ;;  %v3111_v15 = vpop.f32.mrb[61].mxu1 }
 0x301   : > { %v3726_v60 = vadd.f32 %v3049_v21, %v6371_v57  ;;  %v3051_v5 = vpop.f32.mrb[13].mxu0 }
 0x302   : > { %3157 = vst.msk [vmem:[%s6412_s4 + $0x90] sm:$0xff] %vm3138_vm0, %v3745_v12 }
 0x303   : > { %3145 = vst.msk [vmem:[%s6412_s4 + $0x30] sm:$0xff] %vm3138_vm0, %v3726_v60  ;;  %v3114_v56 = vpop.f32.mrb[62].mxu1 }
 0x304   : > { %v3054_v30 = vpop.f32.mrb[14].mxu0  ;;  %v3747_v40 = vadd.f32 %v6397_v32, %v3114_v56  ;;  %v3116_v28 = vpop.f32.mrb[63].mxu1 }
 0x305   : > { %v3727_v2 = vadd.f32 %v3054_v30, %v6373_v59  ;;  %v3056_v6 = vpop.f32.mrb[15].mxu0 }
 0x306   : > { %3158 = vst.msk [vmem:[%s6412_s4 + $0x98] sm:$0xff] %vm3138_vm0, %v3747_v40 }
 0x307   : > { %3146 = vst.msk [vmem:[%s6412_s4 + $0x38] sm:$0xff] %vm3138_vm0, %v3727_v2  ;;  %v3119_v57 = vpop.f32.mrb[64].mxu1 }
 0x308   : > { %v3059_v38 = vpop.f32.mrb[16].mxu0  ;;  %v3749_v8 = vadd.f32 %v6401_v50, %v3119_v57  ;;  %v3121_v10 = vpop.f32.mrb[65].mxu1 }
 0x309   : > { %v3728_v11 = vadd.f32 %v3059_v38, %v6375_v34  ;;  %v3061_v36 = vpop.f32.mrb[17].mxu0 }
 0x30a   : > { %3159 = vst.msk [vmem:[%s6412_s4 + $0xa0] sm:$0xff] %vm3138_vm0, %v3749_v8 }
 0x30b   : > { %3147 = vst.msk [vmem:[%s6412_s4 + $0x40] sm:$0xff] %vm3138_vm0, %v3728_v11  ;;  %v3124_v59 = vpop.f32.mrb[66].mxu1 }
 0x30c   : > { %v3064_v32 = vpop.f32.mrb[18].mxu0  ;;  %v3751_v58 = vadd.f32 %v6403_v61, %v3124_v59  ;;  %v3126_v13 = vpop.f32.mrb[67].mxu1 }
 0x30d   : > { %v3729_v16 = vadd.f32 %v3064_v32, %v6377_v63  ;;  %v3066_v45 = vpop.f32.mrb[19].mxu0 }
 0x30e   : > { %3160 = vst.msk [vmem:[%s6412_s4 + $0xa8] sm:$0xff] %vm3138_vm0, %v3751_v58 }
 0x30f   : > { %3148 = vst.msk [vmem:[%s6412_s4 + $0x48] sm:$0xff] %vm3138_vm0, %v3729_v16  ;;  %v3129_v34 = vpop.f32.mrb[68].mxu1 }
 0x310   : > { %v3069_v50 = vpop.f32.mrb[20].mxu0  ;;  %v3753_v62 = vadd.f32 %v6405_v3, %v3129_v34  ;;  %v3131_v17 = vpop.f32.mrb[69].mxu1 }
 0x311   : > { %v3730_v0 = vadd.f32 %v3069_v50, %v6379_v25  ;;  %v3071_v55 = vpop.f32.mrb[21].mxu0 }
 0x312   : > { %3161 = vst.msk [vmem:[%s6412_s4 + $0xb0] sm:$0xff] %vm3138_vm0, %v3753_v62 }
 0x313   : > { %3149 = vst.msk [vmem:[%s6412_s4 + $0x50] sm:$0xff] %vm3138_vm0, %v3730_v0  ;;  %v3134_v63 = vpop.f32.mrb[70].mxu1 }
 0x314   : > { %v3074_v61 = vpop.f32.mrb[22].mxu0  ;;  %v3755_v18 = vadd.f32 %v6407_v22, %v3134_v63  ;;  %v3136_v19 = vpop.f32.mrb[71].mxu1 }
 0x315   : > { %v3731_v20 = vadd.f32 %v3074_v61, %v6381_v1  ;;  %v3076_v23 = vpop.f32.mrb[23].mxu0 }
 0x316   : > { %3162 = vst.msk [vmem:[%s6412_s4 + $0xb8] sm:$0xff] %vm3138_vm0, %v3755_v18 }
 0x317   : > { %3150 = vst.msk [vmem:[%s6412_s4 + $0x58] sm:$0xff] %vm3138_vm0, %v3731_v20 }
 0x318 PF: > { %p14_p3 = scmp.ge.s32.totalorder %s4280_s17, 4   ;;  %s6518_s12 = smov %s4225_s13 }
 0x319   : > { %s6519_s13 = smov %s4229_s14  ;;  %s6520_s14 = smov %s4290_s20 }
 0x31a   : > { %s6521_s15 = smov %s4280_s17  ;;  %16 = sbr.rel (!%p14_p3) target bundleno = 4 (0x4), region = 77 }
 0x321   :  { %3185 = vsyncpa [#allocation3], 1 }
 0x322   :  { %3187 = vsyncpa [#allocation3 + $0x1], 1 }
 0x323   :  { %3188 = vsyncpa [#allocation5], 1 }
 0x324   :  { %3190 = vsyncpa [#allocation5 + $0x1], 1 }

</bundles_post_ra>
